<compile_context>
chip_gen: v7x
topology: tpu7x:2x2x1
jax: 0.10.0
libtpu: 0.0.40
codegen_flags: <defaults>
</compile_context>

<pallas_src>
import functools

import jax
import jax.numpy as jnp
from jax.experimental import pallas as pl
from jax.experimental.pallas import tpu as pltpu

EPS = 1e-5                      # PyTorch BatchNorm2d default eps
LANE = 128                      # TPU lane width
VMEM_LIMIT = 48 * 1024 * 1024   # <= v7x's 64 MiB physical VMEM, > v5e/v6e default


# ---------------------------------------------------------------------------
# small helpers
# ---------------------------------------------------------------------------
def _round_up(n, m):
    return ((n + m - 1) // m) * m


def _pick_tile(m, max_tile=512):
    """Largest divisor of m that is a multiple of 8 and <= max_tile.

    Prefers a tile that yields >= 2 grid steps (keeps both v7x TensorCores
    busy); falls back to a single-step tile, then to m itself.
    """
    start = (min(max_tile, m) // 8) * 8
    single = None
    for t in range(start, 7, -8):
        if m % t == 0:
            if m // t >= 2:
                return t
            if single is None:
                single = t
    return single if single is not None else m


def _pad_axis(a, axis, target):
    pad = target - a.shape[axis]
    if pad == 0:
        return a
    widths = [(0, 0)] * a.ndim
    widths[axis] = (0, pad)
    return jnp.pad(a, widths)


def _pad_vec(v, n):
    return _pad_axis(v.astype(jnp.float32), 0, n)


def _bn_scale_shift(ssum, ssq, count, gamma_p, beta_p):
    """ssum/ssq: (Cp,) f32 column sums over all M rows.  Biased var (train BN).

    Note: var = E[x^2] - E[x]^2 in f32 can cancel when |mean| >> std; the
    max(.,0) clamp guards the rsqrt.  Conv outputs here are near zero-mean so
    this is benign; a centered two-pass variance would be the strict fix.
    """
    mean = ssum / count
    var = jnp.maximum(ssq / count - mean * mean, 0.0)
    scale = gamma_p * jax.lax.rsqrt(var + EPS)       # fold gamma into rsqrt
    shift = beta_p - mean * scale
    return scale.reshape(1, -1), shift.reshape(1, -1)


# ---------------------------------------------------------------------------
# Stage 1: conv1 (1x1) as tiled matmul + per-tile column sum / sumsq.
# Output y1 is bf16; stats are f32 (computed before the cast).
# ---------------------------------------------------------------------------
def _mm_stats_kernel(x_ref, w_ref, y_ref, ssum_ref, ssq_ref):
    y = jnp.dot(x_ref[...], w_ref[...], preferred_element_type=jnp.float32)
    ssum_ref[...] = jnp.sum(y, axis=0, keepdims=True)[None]
    ssq_ref[...] = jnp.sum(y * y, axis=0, keepdims=True)[None]
    y_ref[...] = y.astype(y_ref.dtype)


def matmul_stats(x_bf16, w_bf16, tm):
    m, k = x_bf16.shape
    c = w_bf16.shape[1]
    nt = m // tm
    y, ssum, ssq = pl.pallas_call(
        _mm_stats_kernel,
        out_shape=(jax.ShapeDtypeStruct((m, c), jnp.bfloat16),
                   jax.ShapeDtypeStruct((nt, 1, c), jnp.float32),
                   jax.ShapeDtypeStruct((nt, 1, c), jnp.float32)),
        grid=(nt,),
        in_specs=[pl.BlockSpec((tm, k), lambda i: (i, 0)),
                  pl.BlockSpec((k, c), lambda i: (0, 0))],
        out_specs=(pl.BlockSpec((tm, c), lambda i: (i, 0)),
                   pl.BlockSpec((1, 1, c), lambda i: (i, 0, 0)),
                   pl.BlockSpec((1, 1, c), lambda i: (i, 0, 0))),
        compiler_params=pltpu.CompilerParams(
            dimension_semantics=("parallel",),
            vmem_limit_bytes=VMEM_LIMIT),
        cost_estimate=pl.CostEstimate(
            flops=2 * m * k * c,
            transcendentals=0,
            bytes_accessed=2 * m * k + 2 * k * c + 2 * m * c + 8 * nt * c),
    )(x_bf16, w_bf16)
    return y, jnp.sum(ssum, axis=(0, 1)), jnp.sum(ssq, axis=(0, 1))


# ---------------------------------------------------------------------------
# Stage 2: fused bn1 -> ReLU -> conv2 (3x3, pad=1, stride=1) + stats.
# One grid step per image.  The spatial zero padding is built in VMEM (so the
# halo stays exactly zero even though BN+ReLU is applied to the interior), and
# the three kw taps are merged into the contraction dim: 3 matmuls with
# M = H*W, K = 3*Cin_p.
# ---------------------------------------------------------------------------
def _bn_relu_conv3x3_kernel(x_ref, sc_ref, sh_ref, w_ref,
                            y_ref, ssum_ref, ssq_ref):
    _, h, wo, ci = x_ref.shape
    co = y_ref.shape[3]
    sc = sc_ref[...].reshape(1, 1, ci)
    sh = sh_ref[...].reshape(1, 1, ci)
    # bn1 + ReLU on the interior block only; halo rows/cols stay exactly zero.
    act = jnp.maximum(x_ref[0].astype(jnp.float32) * sc + sh, 0.0)
    act = act.astype(jnp.bfloat16)
    zrow = jnp.zeros((1, wo, ci), jnp.bfloat16)
    zcol = jnp.zeros((h + 2, 1, ci), jnp.bfloat16)
    apad = jnp.concatenate(
        [zcol, jnp.concatenate([zrow, act, zrow], axis=0), zcol], axis=1)

    acc = jnp.zeros((h * wo, co), jnp.float32)
    for kh in range(3):
        xk = apad[kh:kh + h]                                  # (h, wo+2, ci)
        taps = jnp.concatenate(                               # merged kw taps
            [xk[:, 0:wo, :], xk[:, 1:wo + 1, :], xk[:, 2:wo + 2, :]], axis=-1)
        acc = acc + jnp.dot(taps.reshape(h * wo, 3 * ci), w_ref[kh],
                            preferred_element_type=jnp.float32)

    ssum_ref[...] = jnp.sum(acc, axis=0, keepdims=True)[None]
    ssq_ref[...] = jnp.sum(acc * acc, axis=0, keepdims=True)[None]
    y_ref[...] = acc.reshape(1, h, wo, co).astype(y_ref.dtype)


def bn_relu_conv3x3_stats(x_nhwc_bf16, scale, shift, w_merged_bf16):
    n, h, w, ci = x_nhwc_bf16.shape
    co = w_merged_bf16.shape[2]
    y, ssum, ssq = pl.pallas_call(
        _bn_relu_conv3x3_kernel,
        out_shape=(jax.ShapeDtypeStruct((n, h, w, co), jnp.bfloat16),
                   jax.ShapeDtypeStruct((n, 1, co), jnp.float32),
                   jax.ShapeDtypeStruct((n, 1, co), jnp.float32)),
        grid=(n,),
        in_specs=[pl.BlockSpec((1, h, w, ci), lambda i: (i, 0, 0, 0)),
                  pl.BlockSpec((1, ci), lambda i: (0, 0)),
                  pl.BlockSpec((1, ci), lambda i: (0, 0)),
                  pl.BlockSpec((3, 3 * ci, co), lambda i: (0, 0, 0))],
        out_specs=(pl.BlockSpec((1, h, w, co), lambda i: (i, 0, 0, 0)),
                   pl.BlockSpec((1, 1, co), lambda i: (i, 0, 0)),
                   pl.BlockSpec((1, 1, co), lambda i: (i, 0, 0))),
        compiler_params=pltpu.CompilerParams(
            dimension_semantics=("parallel",),
            vmem_limit_bytes=VMEM_LIMIT),
        cost_estimate=pl.CostEstimate(
            flops=2 * n * h * w * 9 * ci * co,
            transcendentals=0,
            bytes_accessed=(2 * n * h * w * ci + 2 * 9 * ci * co
                            + 2 * n * h * w * co + 8 * n * co + 8 * ci)),
    )(x_nhwc_bf16, scale, shift, w_merged_bf16)
    return y, jnp.sum(ssum, axis=(0, 1)), jnp.sum(ssq, axis=(0, 1))


# ---------------------------------------------------------------------------
# Stage 3: fused bn2 -> ReLU -> conv3 (1x1) as tiled matmul + stats.
# ---------------------------------------------------------------------------
def _bn_relu_mm_stats_kernel(x_ref, sc_ref, sh_ref, w_ref,
                             y_ref, ssum_ref, ssq_ref):
    a = jnp.maximum(x_ref[...].astype(jnp.float32) * sc_ref[...] + sh_ref[...],
                    0.0)
    y = jnp.dot(a.astype(jnp.bfloat16), w_ref[...],
                preferred_element_type=jnp.float32)
    ssum_ref[...] = jnp.sum(y, axis=0, keepdims=True)[None]
    ssq_ref[...] = jnp.sum(y * y, axis=0, keepdims=True)[None]
    y_ref[...] = y.astype(y_ref.dtype)


def bn_relu_matmul_stats(x_bf16, scale, shift, w_bf16, tm):
    m, k = x_bf16.shape
    c = w_bf16.shape[1]
    nt = m // tm
    y, ssum, ssq = pl.pallas_call(
        _bn_relu_mm_stats_kernel,
        out_shape=(jax.ShapeDtypeStruct((m, c), jnp.bfloat16),
                   jax.ShapeDtypeStruct((nt, 1, c), jnp.float32),
                   jax.ShapeDtypeStruct((nt, 1, c), jnp.float32)),
        grid=(nt,),
        in_specs=[pl.BlockSpec((tm, k), lambda i: (i, 0)),
                  pl.BlockSpec((1, k), lambda i: (0, 0)),
                  pl.BlockSpec((1, k), lambda i: (0, 0)),
                  pl.BlockSpec((k, c), lambda i: (0, 0))],
        out_specs=(pl.BlockSpec((tm, c), lambda i: (i, 0)),
                   pl.BlockSpec((1, 1, c), lambda i: (i, 0, 0)),
                   pl.BlockSpec((1, 1, c), lambda i: (i, 0, 0))),
        compiler_params=pltpu.CompilerParams(
            dimension_semantics=("parallel",),
            vmem_limit_bytes=VMEM_LIMIT),
        cost_estimate=pl.CostEstimate(
            flops=2 * m * k * c,
            transcendentals=0,
            bytes_accessed=2 * m * k + 2 * k * c + 2 * m * c + 8 * nt * c + 8 * k),
    )(x_bf16, scale, shift, w_bf16)
    return y, jnp.sum(ssum, axis=(0, 1)), jnp.sum(ssq, axis=(0, 1))


# ---------------------------------------------------------------------------
# Stage 4: bn3 apply + residual add + ReLU (residual buffer aliased to output).
# ---------------------------------------------------------------------------
def _bn_add_relu_kernel(y_ref, sc_ref, sh_ref, r_ref, o_ref):
    out = y_ref[...].astype(jnp.float32) * sc_ref[...] + sh_ref[...] + r_ref[...]
    o_ref[...] = jnp.maximum(out, 0.0).astype(o_ref.dtype)


def bn_add_relu(y, scale, shift, residual, tm):
    m, c = y.shape
    nt = m // tm
    return pl.pallas_call(
        _bn_add_relu_kernel,
        out_shape=jax.ShapeDtypeStruct((m, c), residual.dtype),
        grid=(nt,),
        in_specs=[pl.BlockSpec((tm, c), lambda i: (i, 0)),
                  pl.BlockSpec((1, c), lambda i: (0, 0)),
                  pl.BlockSpec((1, c), lambda i: (0, 0)),
                  pl.BlockSpec((tm, c), lambda i: (i, 0))],
        out_specs=pl.BlockSpec((tm, c), lambda i: (i, 0)),
        input_output_aliases={3: 0},
        compiler_params=pltpu.CompilerParams(
            dimension_semantics=("parallel",),
            vmem_limit_bytes=VMEM_LIMIT),
    )(y, scale, shift, residual)


# ---------------------------------------------------------------------------
# Bottleneck forward (downsample=None, stride=1, BatchNorm2d in train mode)
# ---------------------------------------------------------------------------
def bottleneck_forward(x_nchw, params, stride=1, max_tile=512):
    # TODO(synk): stride>1 and a learned `downsample` path are not implemented
    # (the identity residual of this configuration requires stride=1), and
    # BatchNorm running-stats buffers are not updated (forward uses batch stats).
    assert stride == 1, "only stride=1 / downsample=None is supported"
    n, cin, h, w = x_nchw.shape
    w1, w2, w3 = params["conv1"], params["conv2"], params["conv3"]
    c1, c2, c3 = w1.shape[0], w2.shape[0], w3.shape[0]
    assert c3 == cin, "identity residual requires in_planes == out_planes * 4"

    c_in_p = _round_up(cin, LANE)
    c1_p = _round_up(c1, LANE)
    c2_p = _round_up(c2, LANE)
    c3_p = _round_up(c3, LANE)

    m = n * h * w
    tm = _pick_tile(m, max_tile)

    # NCHW -> NHWC at the module boundary (the nn.Module contract is NCHW; if
    # the surrounding model were NHWC these two transposes could be dropped).
    x_nhwc = jnp.transpose(x_nchw, (0, 2, 3, 1)).astype(jnp.float32)
    x2d = _pad_axis(x_nhwc.reshape(m, cin), 1, c_in_p)   # f32 residual (c_in_p == c3_p)
    x2d_bf = x2d.astype(jnp.bfloat16)

    # ---- stage 1: conv1 (1x1) + stats ---------------------------------------
    w1m = _pad_axis(_pad_axis(w1.reshape(c1, cin).T, 0, c_in_p), 1, c1_p)
    y1, s1sum, s1sq = matmul_stats(x2d_bf, w1m.astype(jnp.bfloat16), tm)
    sc1, sh1 = _bn_scale_shift(s1sum, s1sq, m,
                               _pad_vec(params["bn1_gamma"], c1_p),
                               _pad_vec(params["bn1_beta"], c1_p))

    # ---- stage 2: fused bn1 -> relu -> conv2 (3x3, pad=1) + stats -----------
    # weights laid out as (kh, kw*Cin_p + cin, cout) so the kw taps share one K.
    w2t = jnp.transpose(w2, (2, 3, 1, 0))                 # (3, 3, cin, cout)
    w2t = _pad_axis(_pad_axis(w2t, 2, c1_p), 3, c2_p).reshape(3, 3 * c1_p, c2_p)
    y2, s2sum, s2sq = bn_relu_conv3x3_stats(
        y1.reshape(n, h, w, c1_p), sc1, sh1, w2t.astype(jnp.bfloat16))
    sc2, sh2 = _bn_scale_shift(s2sum, s2sq, m,
                               _pad_vec(params["bn2_gamma"], c2_p),
                               _pad_vec(params["bn2_beta"], c2_p))

    # ---- stage 3: fused bn2 -> relu -> conv3 (1x1) + stats ------------------
    w3m = _pad_axis(_pad_axis(w3.reshape(c3, c2).T, 0, c2_p), 1, c3_p)
    y3, s3sum, s3sq = bn_relu_matmul_stats(
        y2.reshape(m, c2_p), sc2, sh2, w3m.astype(jnp.bfloat16), tm)
    sc3, sh3 = _bn_scale_shift(s3sum, s3sq, m,
                               _pad_vec(params["bn3_gamma"], c3_p),
                               _pad_vec(params["bn3_beta"], c3_p))

    # ---- stage 4: bn3 -> +residual -> relu ----------------------------------
    o = bn_add_relu(y3, sc3, sh3, x2d, tm)

    out = o[:, :c3].reshape(n, h, w, c3)
    return jnp.transpose(out, (0, 3, 1, 2))


# ---------------------------------------------------------------------------
# Pure-JAX reference (lax.conv, f32, HIGHEST) for validation.
# ---------------------------------------------------------------------------
def ref_forward(x, params, stride=1):
    conv = functools.partial(
        jax.lax.conv_general_dilated,
        dimension_numbers=("NCHW", "OIHW", "NCHW"),
        precision=jax.lax.Precision.HIGHEST,
    )

    def bn(t, g, b):
        mean = t.mean(axis=(0, 2, 3), keepdims=True)
        var = ((t - mean) ** 2).mean(axis=(0, 2, 3), keepdims=True)
        return (t - mean) * jax.lax.rsqrt(var + EPS) * g.reshape(1, -1, 1, 1) \
               + b.reshape(1, -1, 1, 1)

    out = conv(x, params["conv1"], window_strides=(1, 1), padding=[(0, 0), (0, 0)])
    out = jnp.maximum(bn(out, params["bn1_gamma"], params["bn1_beta"]), 0.0)
    out = conv(out, params["conv2"], window_strides=(stride, stride), padding=[(1, 1), (1, 1)])
    out = jnp.maximum(bn(out, params["bn2_gamma"], params["bn2_beta"]), 0.0)
    out = conv(out, params["conv3"], window_strides=(1, 1), padding=[(0, 0), (0, 0)])
    out = bn(out, params["bn3_gamma"], params["bn3_beta"]) + x
    return jnp.maximum(out, 0.0)


# ---------------------------------------------------------------------------
if __name__ == "__main__":
    in_planes, out_planes = 16, 4          # in_planes == out_planes * 4
    N, H, W = 2, 16, 16

    key = jax.random.PRNGKey(0)
    kx, k1, k2, k3 = jax.random.split(key, 4)

    def kaiming(k, shape):
        fan_in = shape[1] * shape[2] * shape[3]
        return jax.random.normal(k, shape, jnp.float32) * (2.0 / fan_in) ** 0.5

    params = {
        "conv1": kaiming(k1, (out_planes, in_planes, 1, 1)),
        "conv2": kaiming(k2, (out_planes, out_planes, 3, 3)),
        "conv3": kaiming(k3, (out_planes * 4, out_planes, 1, 1)),
        # BatchNorm2d default init: weight=1, bias=0
        "bn1_gamma": jnp.ones((out_planes,), jnp.float32),
        "bn1_beta": jnp.zeros((out_planes,), jnp.float32),
        "bn2_gamma": jnp.ones((out_planes,), jnp.float32),
        "bn2_beta": jnp.zeros((out_planes,), jnp.float32),
        "bn3_gamma": jnp.ones((out_planes * 4,), jnp.float32),
        "bn3_beta": jnp.zeros((out_planes * 4,), jnp.float32),
    }

    x = jax.random.normal(kx, (N, in_planes, H, W), jnp.float32)

    fwd = jax.jit(bottleneck_forward)
    out = jax.block_until_ready(fwd(x, params))
    ref = jax.block_until_ready(ref_forward(x, params))

    assert out.shape == (N, in_planes, H, W), out.shape
    # bf16 MXU operands / bf16 intermediates vs an f32 HIGHEST reference.
    err = float(jnp.max(jnp.abs(out.astype(jnp.float32) - ref) / (1.0 + jnp.abs(ref))))
    assert err < 5e-2, f"mismatch vs reference: {err}"

    print("KERNEL_OK")
</pallas_src>

<mosaic_0001>
module attributes {stable_mosaic.version = 11 : i64} {
  func.func @_mm_stats_kernel(%arg0: i32, %arg1: memref<256x128xbf16, #tpu.memory_space<vmem>>, %arg2: memref<128x128xbf16, #tpu.memory_space<vmem>>, %arg3: memref<256x128xbf16, #tpu.memory_space<vmem>>, %arg4: memref<1x1x128xf32, #tpu.memory_space<vmem>>, %arg5: memref<1x1x128xf32, #tpu.memory_space<vmem>>) attributes {dimension_semantics = [#tpu.dimension_semantics<parallel>], iteration_bounds = array<i64: 2>, scalar_prefetch = 0 : i64, scratch_operands = 0 : i64, tpu.core_type = #tpu.core_type<tc>, window_params = [{transform_indices = @transform_0, window_bounds = array<i64: 256, 128>}, {pipeline_mode = #tpu.pipeline_mode<synchronous>, transform_indices = @transform_1, window_bounds = array<i64: 128, 128>}, {transform_indices = @transform_2, window_bounds = array<i64: 256, 128>}, {transform_indices = @transform_3, window_bounds = array<i64: 1, 1, 128>}, {transform_indices = @transform_4, window_bounds = array<i64: 1, 1, 128>}]} {
    %c0 = arith.constant 0 : index
    %c0_0 = arith.constant 0 : index
    %0 = vector.load %arg1[%c0, %c0_0] : memref<256x128xbf16, #tpu.memory_space<vmem>>, vector<256x128xbf16>
    %c0_1 = arith.constant 0 : index
    %c0_2 = arith.constant 0 : index
    %1 = vector.load %arg2[%c0_1, %c0_2] : memref<128x128xbf16, #tpu.memory_space<vmem>>, vector<128x128xbf16>
    %cst = arith.constant dense<0.000000e+00> : vector<256x128xf32>
    %2 = tpu.matmul %0, %1, %cst {dimension_numbers = #tpu.dot_dimension_numbers<[1], [0], [0], [1], [0, 0, 1, 1], [], []>} : vector<256x128xbf16>, vector<128x128xbf16>, vector<256x128xf32> -> vector<256x128xf32>
    %cst_3 = arith.constant dense<0.000000e+00> : vector<128xf32>
    %3 = vector.multi_reduction <add>, %2, %cst_3 [0] : vector<256x128xf32> to vector<128xf32>
    %4 = vector.shape_cast %3 : vector<128xf32> to vector<1x128xf32>
    %5 = vector.shape_cast %4 : vector<1x128xf32> to vector<1x1x128xf32>
    %c0_4 = arith.constant 0 : index
    %c0_5 = arith.constant 0 : index
    %c0_6 = arith.constant 0 : index
    %6 = vector.load %arg4[%c0_4, %c0_5, %c0_6] : memref<1x1x128xf32, #tpu.memory_space<vmem>>, vector<1x1x128xf32>
    tpu.vector_store %arg4[%c0_4, %c0_5, %c0_6], %5 {strides = array<i32>} : memref<1x1x128xf32, #tpu.memory_space<vmem>>, vector<1x1x128xf32>,
    %7 = arith.mulf %2, %2 : vector<256x128xf32>
    %cst_7 = arith.constant dense<0.000000e+00> : vector<128xf32>
    %8 = vector.multi_reduction <add>, %7, %cst_7 [0] : vector<256x128xf32> to vector<128xf32>
    %9 = vector.shape_cast %8 : vector<128xf32> to vector<1x128xf32>
    %10 = vector.shape_cast %9 : vector<1x128xf32> to vector<1x1x128xf32>
    %c0_8 = arith.constant 0 : index
    %c0_9 = arith.constant 0 : index
    %c0_10 = arith.constant 0 : index
    %11 = vector.load %arg5[%c0_8, %c0_9, %c0_10] : memref<1x1x128xf32, #tpu.memory_space<vmem>>, vector<1x1x128xf32>
    tpu.vector_store %arg5[%c0_8, %c0_9, %c0_10], %10 {strides = array<i32>} : memref<1x1x128xf32, #tpu.memory_space<vmem>>, vector<1x1x128xf32>,
    %12 = arith.truncf %2 : vector<256x128xf32> to vector<256x128xbf16>
    %c0_11 = arith.constant 0 : index
    %c0_12 = arith.constant 0 : index
    %13 = vector.load %arg3[%c0_11, %c0_12] : memref<256x128xbf16, #tpu.memory_space<vmem>>, vector<256x128xbf16>
    tpu.vector_store %arg3[%c0_11, %c0_12], %12 {strides = array<i32>} : memref<256x128xbf16, #tpu.memory_space<vmem>>, vector<256x128xbf16>,
    return
  }
  func.func @transform_0(%arg0: i32) -> (i32, i32) {
    %c0_i32 = arith.constant 0 : i32
    %c0_i32_0 = arith.constant 0 : i32
    return %arg0, %c0_i32 : i32, i32
  }
  func.func @transform_1(%arg0: i32) -> (i32, i32) {
    %c0_i32 = arith.constant 0 : i32
    %c0_i32_0 = arith.constant 0 : i32
    %c0_i32_1 = arith.constant 0 : i32
    return %c0_i32, %c0_i32_0 : i32, i32
  }
  func.func @transform_2(%arg0: i32) -> (i32, i32) {
    %c0_i32 = arith.constant 0 : i32
    %c0_i32_0 = arith.constant 0 : i32
    return %arg0, %c0_i32 : i32, i32
  }
  func.func @transform_3(%arg0: i32) -> (i32, i32, i32) {
    %c0_i32 = arith.constant 0 : i32
    %c0_i32_0 = arith.constant 0 : i32
    %c0_i32_1 = arith.constant 0 : i32
    return %arg0, %c0_i32, %c0_i32_0 : i32, i32, i32
  }
  func.func @transform_4(%arg0: i32) -> (i32, i32, i32) {
    %c0_i32 = arith.constant 0 : i32
    %c0_i32_0 = arith.constant 0 : i32
    %c0_i32_1 = arith.constant 0 : i32
    return %arg0, %c0_i32, %c0_i32_0 : i32, i32, i32
  }
}

module attributes {stable_mosaic.version = 11 : i64} {
  func.func @_bn_relu_conv3x3_kernel(%arg0: i32, %arg1: memref<1x16x16x128xbf16, #tpu.memory_space<vmem>>, %arg2: memref<1x128xf32, #tpu.memory_space<vmem>>, %arg3: memref<1x128xf32, #tpu.memory_space<vmem>>, %arg4: memref<3x384x128xbf16, #tpu.memory_space<vmem>>, %arg5: memref<1x16x16x128xbf16, #tpu.memory_space<vmem>>, %arg6: memref<1x1x128xf32, #tpu.memory_space<vmem>>, %arg7: memref<1x1x128xf32, #tpu.memory_space<vmem>>) attributes {dimension_semantics = [#tpu.dimension_semantics<parallel>], iteration_bounds = array<i64: 2>, scalar_prefetch = 0 : i64, scratch_operands = 0 : i64, tpu.core_type = #tpu.core_type<tc>, window_params = [{transform_indices = @transform_0, window_bounds = array<i64: 1, 16, 16, 128>}, {pipeline_mode = #tpu.pipeline_mode<synchronous>, transform_indices = @transform_1, window_bounds = array<i64: 1, 128>}, {pipeline_mode = #tpu.pipeline_mode<synchronous>, transform_indices = @transform_2, window_bounds = array<i64: 1, 128>}, {pipeline_mode = #tpu.pipeline_mode<synchronous>, transform_indices = @transform_3, window_bounds = array<i64: 3, 384, 128>}, {transform_indices = @transform_4, window_bounds = array<i64: 1, 16, 16, 128>}, {transform_indices = @transform_5, window_bounds = array<i64: 1, 1, 128>}, {transform_indices = @transform_6, window_bounds = array<i64: 1, 1, 128>}]} {
    %c0 = arith.constant 0 : index
    %c0_0 = arith.constant 0 : index
    %0 = vector.load %arg2[%c0, %c0_0] : memref<1x128xf32, #tpu.memory_space<vmem>>, vector<1x128xf32>
    %1 = vector.shape_cast %0 : vector<1x128xf32> to vector<1x1x128xf32>
    %c0_1 = arith.constant 0 : index
    %c0_2 = arith.constant 0 : index
    %2 = vector.load %arg3[%c0_1, %c0_2] : memref<1x128xf32, #tpu.memory_space<vmem>>, vector<1x128xf32>
    %3 = vector.shape_cast %2 : vector<1x128xf32> to vector<1x1x128xf32>
    %c0_3 = arith.constant 0 : index
    %c0_4 = arith.constant 0 : index
    %c0_5 = arith.constant 0 : index
    %c0_6 = arith.constant 0 : index
    %4 = vector.load %arg1[%c0_3, %c0_4, %c0_5, %c0_6] : memref<1x16x16x128xbf16, #tpu.memory_space<vmem>>, vector<1x16x16x128xbf16>
    %5 = vector.shape_cast %4 : vector<1x16x16x128xbf16> to vector<16x16x128xbf16>
    %6 = arith.extf %5 : vector<16x16x128xbf16> to vector<16x16x128xf32>
    %7 = vector.broadcast %1 : vector<1x1x128xf32> to vector<16x16x128xf32>
    %8 = arith.mulf %6, %7 : vector<16x16x128xf32>
    %9 = vector.broadcast %3 : vector<1x1x128xf32> to vector<16x16x128xf32>
    %10 = arith.addf %8, %9 : vector<16x16x128xf32>
    %cst = arith.constant 0.000000e+00 : f32
    %11 = vector.broadcast %cst : f32 to vector<16x16x128xf32>
    %12 = arith.maximumf %10, %11 : vector<16x16x128xf32>
    %13 = arith.truncf %12 : vector<16x16x128xf32> to vector<16x16x128xbf16>
    %cst_7 = arith.constant 0.000000e+00 : bf16
    %14 = vector.broadcast %cst_7 : bf16 to vector<1x16x128xbf16>
    %cst_8 = arith.constant 0.000000e+00 : bf16
    %15 = vector.broadcast %cst_8 : bf16 to vector<18x1x128xbf16>
    %16 = tpu.concatenate %14, %13, %14 in 0 : vector<1x16x128xbf16>, vector<16x16x128xbf16>, vector<1x16x128xbf16> -> vector<18x16x128xbf16>
    %17 = tpu.concatenate %15, %16, %15 in 1 : vector<18x1x128xbf16>, vector<18x16x128xbf16>, vector<18x1x128xbf16> -> vector<18x18x128xbf16>
    %cst_9 = arith.constant 0.000000e+00 : f32
    %18 = vector.broadcast %cst_9 : f32 to vector<256x128xf32>
    %19 = vector.extract_strided_slice %17 {offsets = [0, 0, 0], sizes = [16, 18, 128], strides = [1, 1, 1]} : vector<18x18x128xbf16> to vector<16x18x128xbf16>
    %20 = vector.extract_strided_slice %19 {offsets = [0, 0, 0], sizes = [16, 16, 128], strides = [1, 1, 1]} : vector<16x18x128xbf16> to vector<16x16x128xbf16>
    %21 = vector.extract_strided_slice %19 {offsets = [0, 1, 0], sizes = [16, 16, 128], strides = [1, 1, 1]} : vector<16x18x128xbf16> to vector<16x16x128xbf16>
    %22 = vector.extract_strided_slice %19 {offsets = [0, 2, 0], sizes = [16, 16, 128], strides = [1, 1, 1]} : vector<16x18x128xbf16> to vector<16x16x128xbf16>
    %23 = tpu.concatenate %20, %21, %22 in 2 : vector<16x16x128xbf16>, vector<16x16x128xbf16>, vector<16x16x128xbf16> -> vector<16x16x384xbf16>
    %24 = vector.shape_cast %23 : vector<16x16x384xbf16> to vector<256x384xbf16>
    %c0_10 = arith.constant 0 : index
    %c0_11 = arith.constant 0 : index
    %c0_12 = arith.constant 0 : index
    %25 = vector.load %arg4[%c0_10, %c0_11, %c0_12] : memref<3x384x128xbf16, #tpu.memory_space<vmem>>, vector<1x384x128xbf16>
    %26 = vector.shape_cast %25 : vector<1x384x128xbf16> to vector<384x128xbf16>
    %cst_13 = arith.constant dense<0.000000e+00> : vector<256x128xf32>
    %27 = tpu.matmul %24, %26, %cst_13 {dimension_numbers = #tpu.dot_dimension_numbers<[1], [0], [0], [1], [0, 0, 1, 1], [], []>} : vector<256x384xbf16>, vector<384x128xbf16>, vector<256x128xf32> -> vector<256x128xf32>
    %28 = arith.addf %18, %27 : vector<256x128xf32>
    %29 = vector.extract_strided_slice %17 {offsets = [1, 0, 0], sizes = [16, 18, 128], strides = [1, 1, 1]} : vector<18x18x128xbf16> to vector<16x18x128xbf16>
    %30 = vector.extract_strided_slice %29 {offsets = [0, 0, 0], sizes = [16, 16, 128], strides = [1, 1, 1]} : vector<16x18x128xbf16> to vector<16x16x128xbf16>
    %31 = vector.extract_strided_slice %29 {offsets = [0, 1, 0], sizes = [16, 16, 128], strides = [1, 1, 1]} : vector<16x18x128xbf16> to vector<16x16x128xbf16>
    %32 = vector.extract_strided_slice %29 {offsets = [0, 2, 0], sizes = [16, 16, 128], strides = [1, 1, 1]} : vector<16x18x128xbf16> to vector<16x16x128xbf16>
    %33 = tpu.concatenate %30, %31, %32 in 2 : vector<16x16x128xbf16>, vector<16x16x128xbf16>, vector<16x16x128xbf16> -> vector<16x16x384xbf16>
    %34 = vector.shape_cast %33 : vector<16x16x384xbf16> to vector<256x384xbf16>
    %c1 = arith.constant 1 : index
    %c0_14 = arith.constant 0 : index
    %c0_15 = arith.constant 0 : index
    %35 = vector.load %arg4[%c1, %c0_14, %c0_15] : memref<3x384x128xbf16, #tpu.memory_space<vmem>>, vector<1x384x128xbf16>
    %36 = vector.shape_cast %35 : vector<1x384x128xbf16> to vector<384x128xbf16>
    %cst_16 = arith.constant dense<0.000000e+00> : vector<256x128xf32>
    %37 = tpu.matmul %34, %36, %cst_16 {dimension_numbers = #tpu.dot_dimension_numbers<[1], [0], [0], [1], [0, 0, 1, 1], [], []>} : vector<256x384xbf16>, vector<384x128xbf16>, vector<256x128xf32> -> vector<256x128xf32>
    %38 = arith.addf %28, %37 : vector<256x128xf32>
    %39 = vector.extract_strided_slice %17 {offsets = [2, 0, 0], sizes = [16, 18, 128], strides = [1, 1, 1]} : vector<18x18x128xbf16> to vector<16x18x128xbf16>
    %40 = vector.extract_strided_slice %39 {offsets = [0, 0, 0], sizes = [16, 16, 128], strides = [1, 1, 1]} : vector<16x18x128xbf16> to vector<16x16x128xbf16>
    %41 = vector.extract_strided_slice %39 {offsets = [0, 1, 0], sizes = [16, 16, 128], strides = [1, 1, 1]} : vector<16x18x128xbf16> to vector<16x16x128xbf16>
    %42 = vector.extract_strided_slice %39 {offsets = [0, 2, 0], sizes = [16, 16, 128], strides = [1, 1, 1]} : vector<16x18x128xbf16> to vector<16x16x128xbf16>
    %43 = tpu.concatenate %40, %41, %42 in 2 : vector<16x16x128xbf16>, vector<16x16x128xbf16>, vector<16x16x128xbf16> -> vector<16x16x384xbf16>
    %44 = vector.shape_cast %43 : vector<16x16x384xbf16> to vector<256x384xbf16>
    %c2 = arith.constant 2 : index
    %c0_17 = arith.constant 0 : index
    %c0_18 = arith.constant 0 : index
    %45 = vector.load %arg4[%c2, %c0_17, %c0_18] : memref<3x384x128xbf16, #tpu.memory_space<vmem>>, vector<1x384x128xbf16>
    %46 = vector.shape_cast %45 : vector<1x384x128xbf16> to vector<384x128xbf16>
    %cst_19 = arith.constant dense<0.000000e+00> : vector<256x128xf32>
    %47 = tpu.matmul %44, %46, %cst_19 {dimension_numbers = #tpu.dot_dimension_numbers<[1], [0], [0], [1], [0, 0, 1, 1], [], []>} : vector<256x384xbf16>, vector<384x128xbf16>, vector<256x128xf32> -> vector<256x128xf32>
    %48 = arith.addf %38, %47 : vector<256x128xf32>
    %cst_20 = arith.constant dense<0.000000e+00> : vector<128xf32>
    %49 = vector.multi_reduction <add>, %48, %cst_20 [0] : vector<256x128xf32> to vector<128xf32>
    %50 = vector.shape_cast %49 : vector<128xf32> to vector<1x128xf32>
    %51 = vector.shape_cast %50 : vector<1x128xf32> to vector<1x1x128xf32>
    %c0_21 = arith.constant 0 : index
    %c0_22 = arith.constant 0 : index
    %c0_23 = arith.constant 0 : index
    %52 = vector.load %arg6[%c0_21, %c0_22, %c0_23] : memref<1x1x128xf32, #tpu.memory_space<vmem>>, vector<1x1x128xf32>
    tpu.vector_store %arg6[%c0_21, %c0_22, %c0_23], %51 {strides = array<i32>} : memref<1x1x128xf32, #tpu.memory_space<vmem>>, vector<1x1x128xf32>,
    %53 = arith.mulf %48, %48 : vector<256x128xf32>
    %cst_24 = arith.constant dense<0.000000e+00> : vector<128xf32>
    %54 = vector.multi_reduction <add>, %53, %cst_24 [0] : vector<256x128xf32> to vector<128xf32>
    %55 = vector.shape_cast %54 : vector<128xf32> to vector<1x128xf32>
    %56 = vector.shape_cast %55 : vector<1x128xf32> to vector<1x1x128xf32>
    %c0_25 = arith.constant 0 : index
    %c0_26 = arith.constant 0 : index
    %c0_27 = arith.constant 0 : index
    %57 = vector.load %arg7[%c0_25, %c0_26, %c0_27] : memref<1x1x128xf32, #tpu.memory_space<vmem>>, vector<1x1x128xf32>
    tpu.vector_store %arg7[%c0_25, %c0_26, %c0_27], %56 {strides = array<i32>} : memref<1x1x128xf32, #tpu.memory_space<vmem>>, vector<1x1x128xf32>,
    %58 = vector.shape_cast %48 : vector<256x128xf32> to vector<1x16x16x128xf32>
    %59 = arith.truncf %58 : vector<1x16x16x128xf32> to vector<1x16x16x128xbf16>
    %c0_28 = arith.constant 0 : index
    %c0_29 = arith.constant 0 : index
    %c0_30 = arith.constant 0 : index
    %c0_31 = arith.constant 0 : index
    %60 = vector.load %arg5[%c0_28, %c0_29, %c0_30, %c0_31] : memref<1x16x16x128xbf16, #tpu.memory_space<vmem>>, vector<1x16x16x128xbf16>
    tpu.vector_store %arg5[%c0_28, %c0_29, %c0_30, %c0_31], %59 {strides = array<i32>} : memref<1x16x16x128xbf16, #tpu.memory_space<vmem>>, vector<1x16x16x128xbf16>,
    return
  }
  func.func @transform_0(%arg0: i32) -> (i32, i32, i32, i32) {
    %c0_i32 = arith.constant 0 : i32
    %c0_i32_0 = arith.constant 0 : i32
    %c0_i32_1 = arith.constant 0 : i32
    %c0_i32_2 = arith.constant 0 : i32
    return %arg0, %c0_i32, %c0_i32_0, %c0_i32_1 : i32, i32, i32, i32
  }
  func.func @transform_1(%arg0: i32) -> (i32, i32) {
    %c0_i32 = arith.constant 0 : i32
    %c0_i32_0 = arith.constant 0 : i32
    %c0_i32_1 = arith.constant 0 : i32
    return %c0_i32, %c0_i32_0 : i32, i32
  }
  func.func @transform_2(%arg0: i32) -> (i32, i32) {
    %c0_i32 = arith.constant 0 : i32
    %c0_i32_0 = arith.constant 0 : i32
    %c0_i32_1 = arith.constant 0 : i32
    return %c0_i32, %c0_i32_0 : i32, i32
  }
  func.func @transform_3(%arg0: i32) -> (i32, i32, i32) {
    %c0_i32 = arith.constant 0 : i32
    %c0_i32_0 = arith.constant 0 : i32
    %c0_i32_1 = arith.constant 0 : i32
    %c0_i32_2 = arith.constant 0 : i32
    return %c0_i32, %c0_i32_0, %c0_i32_1 : i32, i32, i32
  }
  func.func @transform_4(%arg0: i32) -> (i32, i32, i32, i32) {
    %c0_i32 = arith.constant 0 : i32
    %c0_i32_0 = arith.constant 0 : i32
    %c0_i32_1 = arith.constant 0 : i32
    %c0_i32_2 = arith.constant 0 : i32
    return %arg0, %c0_i32, %c0_i32_0, %c0_i32_1 : i32, i32, i32, i32
  }
  func.func @transform_5(%arg0: i32) -> (i32, i32, i32) {
    %c0_i32 = arith.constant 0 : i32
    %c0_i32_0 = arith.constant 0 : i32
    %c0_i32_1 = arith.constant 0 : i32
    return %arg0, %c0_i32, %c0_i32_0 : i32, i32, i32
  }
  func.func @transform_6(%arg0: i32) -> (i32, i32, i32) {
    %c0_i32 = arith.constant 0 : i32
    %c0_i32_0 = arith.constant 0 : i32
    %c0_i32_1 = arith.constant 0 : i32
    return %arg0, %c0_i32, %c0_i32_0 : i32, i32, i32
  }
}

module attributes {stable_mosaic.version = 11 : i64} {
  func.func @_bn_relu_mm_stats_kernel(%arg0: i32, %arg1: memref<256x128xbf16, #tpu.memory_space<vmem>>, %arg2: memref<1x128xf32, #tpu.memory_space<vmem>>, %arg3: memref<1x128xf32, #tpu.memory_space<vmem>>, %arg4: memref<128x128xbf16, #tpu.memory_space<vmem>>, %arg5: memref<256x128xbf16, #tpu.memory_space<vmem>>, %arg6: memref<1x1x128xf32, #tpu.memory_space<vmem>>, %arg7: memref<1x1x128xf32, #tpu.memory_space<vmem>>) attributes {dimension_semantics = [#tpu.dimension_semantics<parallel>], iteration_bounds = array<i64: 2>, scalar_prefetch = 0 : i64, scratch_operands = 0 : i64, tpu.core_type = #tpu.core_type<tc>, window_params = [{transform_indices = @transform_0, window_bounds = array<i64: 256, 128>}, {pipeline_mode = #tpu.pipeline_mode<synchronous>, transform_indices = @transform_1, window_bounds = array<i64: 1, 128>}, {pipeline_mode = #tpu.pipeline_mode<synchronous>, transform_indices = @transform_2, window_bounds = array<i64: 1, 128>}, {pipeline_mode = #tpu.pipeline_mode<synchronous>, transform_indices = @transform_3, window_bounds = array<i64: 128, 128>}, {transform_indices = @transform_4, window_bounds = array<i64: 256, 128>}, {transform_indices = @transform_5, window_bounds = array<i64: 1, 1, 128>}, {transform_indices = @transform_6, window_bounds = array<i64: 1, 1, 128>}]} {
    %c0 = arith.constant 0 : index
    %c0_0 = arith.constant 0 : index
    %0 = vector.load %arg1[%c0, %c0_0] : memref<256x128xbf16, #tpu.memory_space<vmem>>, vector<256x128xbf16>
    %1 = arith.extf %0 : vector<256x128xbf16> to vector<256x128xf32>
    %c0_1 = arith.constant 0 : index
    %c0_2 = arith.constant 0 : index
    %2 = vector.load %arg2[%c0_1, %c0_2] : memref<1x128xf32, #tpu.memory_space<vmem>>, vector<1x128xf32>
    %3 = vector.broadcast %2 : vector<1x128xf32> to vector<256x128xf32>
    %4 = arith.mulf %1, %3 : vector<256x128xf32>
    %c0_3 = arith.constant 0 : index
    %c0_4 = arith.constant 0 : index
    %5 = vector.load %arg3[%c0_3, %c0_4] : memref<1x128xf32, #tpu.memory_space<vmem>>, vector<1x128xf32>
    %6 = vector.broadcast %5 : vector<1x128xf32> to vector<256x128xf32>
    %7 = arith.addf %4, %6 : vector<256x128xf32>
    %cst = arith.constant 0.000000e+00 : f32
    %8 = vector.broadcast %cst : f32 to vector<256x128xf32>
    %9 = arith.maximumf %7, %8 : vector<256x128xf32>
    %10 = arith.truncf %9 : vector<256x128xf32> to vector<256x128xbf16>
    %c0_5 = arith.constant 0 : index
    %c0_6 = arith.constant 0 : index
    %11 = vector.load %arg4[%c0_5, %c0_6] : memref<128x128xbf16, #tpu.memory_space<vmem>>, vector<128x128xbf16>
    %cst_7 = arith.constant dense<0.000000e+00> : vector<256x128xf32>
    %12 = tpu.matmul %10, %11, %cst_7 {dimension_numbers = #tpu.dot_dimension_numbers<[1], [0], [0], [1], [0, 0, 1, 1], [], []>} : vector<256x128xbf16>, vector<128x128xbf16>, vector<256x128xf32> -> vector<256x128xf32>
    %cst_8 = arith.constant dense<0.000000e+00> : vector<128xf32>
    %13 = vector.multi_reduction <add>, %12, %cst_8 [0] : vector<256x128xf32> to vector<128xf32>
    %14 = vector.shape_cast %13 : vector<128xf32> to vector<1x128xf32>
    %15 = vector.shape_cast %14 : vector<1x128xf32> to vector<1x1x128xf32>
    %c0_9 = arith.constant 0 : index
    %c0_10 = arith.constant 0 : index
    %c0_11 = arith.constant 0 : index
    %16 = vector.load %arg6[%c0_9, %c0_10, %c0_11] : memref<1x1x128xf32, #tpu.memory_space<vmem>>, vector<1x1x128xf32>
    tpu.vector_store %arg6[%c0_9, %c0_10, %c0_11], %15 {strides = array<i32>} : memref<1x1x128xf32, #tpu.memory_space<vmem>>, vector<1x1x128xf32>,
    %17 = arith.mulf %12, %12 : vector<256x128xf32>
    %cst_12 = arith.constant dense<0.000000e+00> : vector<128xf32>
    %18 = vector.multi_reduction <add>, %17, %cst_12 [0] : vector<256x128xf32> to vector<128xf32>
    %19 = vector.shape_cast %18 : vector<128xf32> to vector<1x128xf32>
    %20 = vector.shape_cast %19 : vector<1x128xf32> to vector<1x1x128xf32>
    %c0_13 = arith.constant 0 : index
    %c0_14 = arith.constant 0 : index
    %c0_15 = arith.constant 0 : index
    %21 = vector.load %arg7[%c0_13, %c0_14, %c0_15] : memref<1x1x128xf32, #tpu.memory_space<vmem>>, vector<1x1x128xf32>
    tpu.vector_store %arg7[%c0_13, %c0_14, %c0_15], %20 {strides = array<i32>} : memref<1x1x128xf32, #tpu.memory_space<vmem>>, vector<1x1x128xf32>,
    %22 = arith.truncf %12 : vector<256x128xf32> to vector<256x128xbf16>
    %c0_16 = arith.constant 0 : index
    %c0_17 = arith.constant 0 : index
    %23 = vector.load %arg5[%c0_16, %c0_17] : memref<256x128xbf16, #tpu.memory_space<vmem>>, vector<256x128xbf16>
    tpu.vector_store %arg5[%c0_16, %c0_17], %22 {strides = array<i32>} : memref<256x128xbf16, #tpu.memory_space<vmem>>, vector<256x128xbf16>,
    return
  }
  func.func @transform_0(%arg0: i32) -> (i32, i32) {
    %c0_i32 = arith.constant 0 : i32
    %c0_i32_0 = arith.constant 0 : i32
    return %arg0, %c0_i32 : i32, i32
  }
  func.func @transform_1(%arg0: i32) -> (i32, i32) {
    %c0_i32 = arith.constant 0 : i32
    %c0_i32_0 = arith.constant 0 : i32
    %c0_i32_1 = arith.constant 0 : i32
    return %c0_i32, %c0_i32_0 : i32, i32
  }
  func.func @transform_2(%arg0: i32) -> (i32, i32) {
    %c0_i32 = arith.constant 0 : i32
    %c0_i32_0 = arith.constant 0 : i32
    %c0_i32_1 = arith.constant 0 : i32
    return %c0_i32, %c0_i32_0 : i32, i32
  }
  func.func @transform_3(%arg0: i32) -> (i32, i32) {
    %c0_i32 = arith.constant 0 : i32
    %c0_i32_0 = arith.constant 0 : i32
    %c0_i32_1 = arith.constant 0 : i32
    return %c0_i32, %c0_i32_0 : i32, i32
  }
  func.func @transform_4(%arg0: i32) -> (i32, i32) {
    %c0_i32 = arith.constant 0 : i32
    %c0_i32_0 = arith.constant 0 : i32
    return %arg0, %c0_i32 : i32, i32
  }
  func.func @transform_5(%arg0: i32) -> (i32, i32, i32) {
    %c0_i32 = arith.constant 0 : i32
    %c0_i32_0 = arith.constant 0 : i32
    %c0_i32_1 = arith.constant 0 : i32
    return %arg0, %c0_i32, %c0_i32_0 : i32, i32, i32
  }
  func.func @transform_6(%arg0: i32) -> (i32, i32, i32) {
    %c0_i32 = arith.constant 0 : i32
    %c0_i32_0 = arith.constant 0 : i32
    %c0_i32_1 = arith.constant 0 : i32
    return %arg0, %c0_i32, %c0_i32_0 : i32, i32, i32
  }
}

module attributes {stable_mosaic.version = 11 : i64} {
  func.func @_bn_add_relu_kernel(%arg0: i32, %arg1: memref<256x128xbf16, #tpu.memory_space<vmem>>, %arg2: memref<1x128xf32, #tpu.memory_space<vmem>>, %arg3: memref<1x128xf32, #tpu.memory_space<vmem>>, %arg4: memref<256x128xf32, #tpu.memory_space<vmem>>, %arg5: memref<256x128xf32, #tpu.memory_space<vmem>>) attributes {dimension_semantics = [#tpu.dimension_semantics<parallel>], iteration_bounds = array<i64: 2>, scalar_prefetch = 0 : i64, scratch_operands = 0 : i64, tpu.core_type = #tpu.core_type<tc>, window_params = [{transform_indices = @transform_0, window_bounds = array<i64: 256, 128>}, {pipeline_mode = #tpu.pipeline_mode<synchronous>, transform_indices = @transform_1, window_bounds = array<i64: 1, 128>}, {pipeline_mode = #tpu.pipeline_mode<synchronous>, transform_indices = @transform_2, window_bounds = array<i64: 1, 128>}, {transform_indices = @transform_3, window_bounds = array<i64: 256, 128>}, {transform_indices = @transform_4, window_bounds = array<i64: 256, 128>}]} {
    %c0 = arith.constant 0 : index
    %c0_0 = arith.constant 0 : index
    %0 = vector.load %arg1[%c0, %c0_0] : memref<256x128xbf16, #tpu.memory_space<vmem>>, vector<256x128xbf16>
    %1 = arith.extf %0 : vector<256x128xbf16> to vector<256x128xf32>
    %c0_1 = arith.constant 0 : index
    %c0_2 = arith.constant 0 : index
    %2 = vector.load %arg2[%c0_1, %c0_2] : memref<1x128xf32, #tpu.memory_space<vmem>>, vector<1x128xf32>
    %3 = vector.broadcast %2 : vector<1x128xf32> to vector<256x128xf32>
    %4 = arith.mulf %1, %3 : vector<256x128xf32>
    %c0_3 = arith.constant 0 : index
    %c0_4 = arith.constant 0 : index
    %5 = vector.load %arg3[%c0_3, %c0_4] : memref<1x128xf32, #tpu.memory_space<vmem>>, vector<1x128xf32>
    %6 = vector.broadcast %5 : vector<1x128xf32> to vector<256x128xf32>
    %7 = arith.addf %4, %6 : vector<256x128xf32>
    %c0_5 = arith.constant 0 : index
    %c0_6 = arith.constant 0 : index
    %8 = vector.load %arg4[%c0_5, %c0_6] : memref<256x128xf32, #tpu.memory_space<vmem>>, vector<256x128xf32>
    %9 = arith.addf %7, %8 : vector<256x128xf32>
    %cst = arith.constant 0.000000e+00 : f32
    %10 = vector.broadcast %cst : f32 to vector<256x128xf32>
    %11 = arith.maximumf %9, %10 : vector<256x128xf32>
    %c0_7 = arith.constant 0 : index
    %c0_8 = arith.constant 0 : index
    %12 = vector.load %arg5[%c0_7, %c0_8] : memref<256x128xf32, #tpu.memory_space<vmem>>, vector<256x128xf32>
    tpu.vector_store %arg5[%c0_7, %c0_8], %11 {strides = array<i32>} : memref<256x128xf32, #tpu.memory_space<vmem>>, vector<256x128xf32>,
    return
  }
  func.func @transform_0(%arg0: i32) -> (i32, i32) {
    %c0_i32 = arith.constant 0 : i32
    %c0_i32_0 = arith.constant 0 : i32
    return %arg0, %c0_i32 : i32, i32
  }
  func.func @transform_1(%arg0: i32) -> (i32, i32) {
    %c0_i32 = arith.constant 0 : i32
    %c0_i32_0 = arith.constant 0 : i32
    %c0_i32_1 = arith.constant 0 : i32
    return %c0_i32, %c0_i32_0 : i32, i32
  }
  func.func @transform_2(%arg0: i32) -> (i32, i32) {
    %c0_i32 = arith.constant 0 : i32
    %c0_i32_0 = arith.constant 0 : i32
    %c0_i32_1 = arith.constant 0 : i32
    return %c0_i32, %c0_i32_0 : i32, i32
  }
  func.func @transform_3(%arg0: i32) -> (i32, i32) {
    %c0_i32 = arith.constant 0 : i32
    %c0_i32_0 = arith.constant 0 : i32
    return %arg0, %c0_i32 : i32, i32
  }
  func.func @transform_4(%arg0: i32) -> (i32, i32) {
    %c0_i32 = arith.constant 0 : i32
    %c0_i32_0 = arith.constant 0 : i32
    return %arg0, %c0_i32 : i32, i32
  }
}

</mosaic_0001>

<bundles_post_ra>
// kernel: bottleneck_forward.4
= control target key start
LH: loop header
LB: loop body
LE: loop exit
PB: predicated region body
PF: predicated region fallthrough
CT: control target
= control target key end

     0   :  { %s1293_s15 = smov 0   ;;  %s1472_s0 = inlined_call_operand.vmem [shape: bf16[512,128], index: 0, kind: input, shape index: {}]   ;;  %s1473_s1 = inlined_call_operand.vmem [shape: bf16[128,128], index: 1, kind: input, shape index: {}]   ;;  %s1474_s2 = inlined_call_operand.vmem [shape: bf16[512,128], index: 2, kind: output, shape index: {0}]   ;;  %s1475_s3 = inlined_call_operand.vmem [shape: f32[2,1,128], index: 3, kind: output, shape index: {1}]   ;;  %s1476_s4 = inlined_call_operand.vmem [shape: f32[2,1,128], index: 4, kind: output, shape index: {2}]  }
   0x1 LB: > { %s1299_s16 = sadd.s32 4294967295, %s1266_s15   ;;  %p950_p0 = scmp.ge.s32.totalorder %s1266_s15, 1  ;;  %s1266_s15 = sphi %s1293_s15, %s15_s15  }
   0x2   : > { %p168_p1 = scmp.lt.s32.totalorder %s1266_s15, 3 }
   0x4   : > { %p169_p2 = pnand %p950_p0, %p168_p1 }
   0x5   : > { %v1236_v0 = vld [vmem:[%s1473_s1] sm:$0xff] (!%p169_p2)   ;;  %s951_s19 = sshll.u32 (!%p169_p2), %s1299_s16, 5  ;;  %v1237_v1 = vld [vmem:[%s1473_s1 + $0x8] sm:$0xff] (!%p169_p2)   ;;  %v1238_v2 = vld [vmem:[%s1473_s1 + $0x10] sm:$0xff] (!%p169_p2)   ;;  %p212_p4 = scmp.lt.s32.totalorder (!%p169_p2), %s1299_s16, 1 }
   0x6   : > { %172 = sbr.rel (%p169_p2) target bundleno = 330 (0x14a), region = 28  ;;  %p201_p3 = scmp.lt.s32.totalorder (!%p169_p2), %s951_s19, 63  ;;  %1164 = vmatprep.subr.bf16.mxu0 (!%p169_p2), %v1236_v0  ;;  %1212 = vmatprep.subr.bf16.mxu1 (!%p169_p2), %v1236_v0  ;;  %v1239_v3 = vld [vmem:[%s1473_s1 + $0x18] sm:$0xff] (!%p169_p2)   ;;  %v1240_v5 = vld [vmem:[%s1473_s1 + $0x20] sm:$0xff] (!%p169_p2)   ;;  %v1241_v6 = vld [vmem:[%s1473_s1 + $0x28] sm:$0xff] (!%p169_p2)  }
   0x7   : > { %1165 = vmatpush3.bf16.msra.mxu0 (!%p169_p2), %v1236_v0  ;;  %1220 = vmatpush3.bf16.msra.mxu1 (!%p169_p2), %v1236_v0  ;;  %v1242_v8 = vld [vmem:[%s1473_s1 + $0x30] sm:$0xff] (!%p169_p2)   ;;  %v1243_v9 = vld [vmem:[%s1473_s1 + $0x38] sm:$0xff] (!%p169_p2)  }
   0x8   : > { %1166 = vmatprep.subr.bf16.mxu0 (!%p169_p2), %v1237_v1  ;;  %1213 = vmatprep.subr.bf16.mxu1 (!%p169_p2), %v1237_v1 }
   0xb   : > { %1167 = vmatpush3.bf16.msra.mxu0 (!%p169_p2), %v1237_v1  ;;  %1221 = vmatpush3.bf16.msra.mxu1 (!%p169_p2), %v1237_v1 }
   0xc   : > { %1168 = vmatprep.subr.bf16.mxu0 (!%p169_p2), %v1238_v2  ;;  %1214 = vmatprep.subr.bf16.mxu1 (!%p169_p2), %v1238_v2 }
   0xd   : > { %s1478_s19 = smov (!%p201_p3, %s951_s19), 63  ;;  %s1480_s16 = smov (!%p212_p4, %s1299_s16), 1 }
   0xe   : > { %s952_s24 = sshll.u32 %s1478_s19, 2  ;;  %s214_s19 = scalar_lea.vmem %s1475_s3, %s1480_s16 }
   0xf   : > { %s1321_s27 = scalar_lea.vmem %s1472_s0, %s952_s24  ;;  %1169 = vmatpush3.bf16.msra.mxu0 %v1238_v2  ;;  %1222 = vmatpush3.bf16.msra.mxu1 %v1238_v2  ;;  %s1363_s14 = scalar_lea.vmem %s1474_s2, %s952_s24 }
  0x10   : > { %v1244_v4 = vld [vmem:[%s1321_s27] sm:$0xff]   ;;  %1170 = vmatprep.subr.bf16.mxu0 %v1239_v3  ;;  %1215 = vmatprep.subr.bf16.mxu1 %v1239_v3  ;;  %v1245_v10 = vld [vmem:[%s1321_s27 + $0x8] sm:$0xff]   ;;  %v1246_v12 = vld [vmem:[%s1321_s27 + $0x10] sm:$0xff]   ;;  %s217_s22 = scalar_lea.vmem %s1476_s4, %s1480_s16 }
  0x11   : > { %1180 = vmatprep.mubr.bf16.mxu0 %v1244_v4  ;;  %v1252_v7 = vld [vmem:[%s1321_s27 + $0x40] sm:$0xff]   ;;  %v1253_v11 = vld [vmem:[%s1321_s27 + $0x48] sm:$0xff]   ;;  %v1254_v13 = vld [vmem:[%s1321_s27 + $0x50] sm:$0xff]  }
  0x12   : > { %1196 = vmatprep.mubr.bf16.mxu1 %v1252_v7  ;;  %v1247_v14 = vld [vmem:[%s1321_s27 + $0x18] sm:$0xff]   ;;  %v1248_v16 = vld [vmem:[%s1321_s27 + $0x20] sm:$0xff]   ;;  %v1249_v18 = vld [vmem:[%s1321_s27 + $0x28] sm:$0xff]  }
  0x13   : > { %1171 = vmatpush3.bf16.msra.mxu0 %v1239_v3  ;;  %1223 = vmatpush3.bf16.msra.mxu1 %v1239_v3  ;;  %v1255_v15 = vld [vmem:[%s1321_s27 + $0x58] sm:$0xff]   ;;  %v1256_v17 = vld [vmem:[%s1321_s27 + $0x60] sm:$0xff]   ;;  %v1257_v19 = vld [vmem:[%s1321_s27 + $0x68] sm:$0xff]  }
  0x14   : > { %1172 = vmatprep.subr.bf16.mxu0 %v1240_v5  ;;  %1216 = vmatprep.subr.bf16.mxu1 %v1240_v5  ;;  %v1250_v20 = vld [vmem:[%s1321_s27 + $0x30] sm:$0xff]   ;;  %v1251_v22 = vld [vmem:[%s1321_s27 + $0x38] sm:$0xff]  }
  0x15   : > { %v1258_v21 = vld [vmem:[%s1321_s27 + $0x70] sm:$0xff]   ;;  %v1259_v23 = vld [vmem:[%s1321_s27 + $0x78] sm:$0xff]  }
  0x17   : > { %1173 = vmatpush3.bf16.msra.mxu0 %v1240_v5  ;;  %1224 = vmatpush3.bf16.msra.mxu1 %v1240_v5 }
  0x18   : > { %1174 = vmatprep.subr.bf16.mxu0 %v1241_v6  ;;  %1217 = vmatprep.subr.bf16.mxu1 %v1241_v6 }
  0x1b   : > { %1175 = vmatpush3.bf16.msra.mxu0 %v1241_v6  ;;  %1225 = vmatpush3.bf16.msra.mxu1 %v1241_v6 }
  0x1c   : > { %1176 = vmatprep.subr.bf16.mxu0 %v1242_v8  ;;  %1218 = vmatprep.subr.bf16.mxu1 %v1242_v8 }
  0x1f   : > { %1177 = vmatpush3.bf16.msra.mxu0 %v1242_v8  ;;  %1226 = vmatpush3.bf16.msra.mxu1 %v1242_v8 }
  0x20   : > { %1178 = vmatprep.subr.bf16.mxu0 %v1243_v9  ;;  %1219 = vmatprep.subr.bf16.mxu1 %v1243_v9 }
  0x23   : > { %1179 = vmatpush3.bf16.msra.mxu0 %v1243_v9  ;;  %1227 = vmatpush3.bf16.msra.mxu1 %v1243_v9 }
  0x26   : > { %1181 = vmatmul.mubr.bf16.vlgmr.msra.gmra.mrb[0].mxu0 %v1245_v10  ;;  %1197 = vmatmul.mubr.bf16.vlgmr.msra.gmra.mrb[0].mxu1 %v1253_v11 }
  0x27   : > { %1184 = vmatprep.mubr.bf16.mxu0 %v1246_v12  ;;  %1200 = vmatprep.mubr.bf16.mxu1 %v1254_v13 }
  0x2e   : > { %1185 = vmatmul.mubr.bf16.gmra.mrb[4].mxu0 %v1247_v14  ;;  %1201 = vmatmul.mubr.bf16.gmra.mrb[4].mxu1 %v1255_v15 }
  0x2f   : > { %1188 = vmatprep.mubr.bf16.mxu0 %v1248_v16  ;;  %1204 = vmatprep.mubr.bf16.mxu1 %v1256_v17 }
  0x36   : > { %1189 = vmatmul.mubr.bf16.gmra.mrb[8].mxu0 %v1249_v18  ;;  %1205 = vmatmul.mubr.bf16.gmra.mrb[8].mxu1 %v1257_v19 }
  0x37   : > { %1192 = vmatprep.mubr.bf16.mxu0 %v1250_v20  ;;  %1208 = vmatprep.mubr.bf16.mxu1 %v1258_v21 }
  0x3e   : > { %1193 = vmatmul.mubr.bf16.gmra.mrb[12].mxu0 %v1251_v22  ;;  %1209 = vmatmul.mubr.bf16.gmra.mrb[12].mxu1 %v1259_v23 }
  0xf9   : > { %v1182_v24 = vpop.f32.mrb[0].mxu0  ;;  %v1354_v25 = vpop.f32.mrb[0].mxu1 }
  0xfa   : > { %v445_v26 = vpop.f32.mrb[1].mxu0  ;;  %v1356_v27 = vpop.f32.mrb[1].mxu1  ;;  %v612_v39 = vmul.f32 %v1182_v24, %v1182_v24 }
  0xfb   : > { %v1183_v28 = vpop.f32.mrb[2].mxu0  ;;  %v1365_v29 = vpop.f32.mrb[2].mxu1  ;;  %v610_v34 = vmul.f32 %v445_v26, %v445_v26 }
  0xfc   : > { %v1053_v30 = vpack.c.bf16 %v1183_v28, %v1182_v24  ;;  %v448_v31 = vpop.f32.mrb[3].mxu0  ;;  %v1093_v32 = vpack.c.bf16 %v1365_v29, %v1354_v25  ;;  %v1369_v33 = vpop.f32.mrb[3].mxu1  ;;  %v613_v42 = vmul.f32 %v1183_v28, %v1183_v28 }
  0xfd   : > { %v572_v35 = vadd.f32 %v448_v31, %v445_v26  ;;  %v611_v36 = vmul.f32 %v448_v31, %v448_v31  ;;  %v1048_v37 = vpack.c.bf16 %v448_v31, %v445_v26  ;;  %v1088_v38 = vpack.c.bf16 %v1369_v33, %v1356_v27 }
  0xfe   : > { %1125 = vst [vmem:[%s1363_s14 + $0x8] sm:$0xff] %v1053_v30   ;;  %1133 = vst [vmem:[%s1363_s14 + $0x48] sm:$0xff] %v1093_v32  }
  0xff   : > { %v573_v40 = vadd.f32 %v1182_v24, %v572_v35  ;;  %v642_v41 = vadd.f32 %v611_v36, %v610_v34  ;;  %1049 = vst [vmem:[%s1363_s14] sm:$0xff] %v1048_v37   ;;  %1132 = vst [vmem:[%s1363_s14 + $0x40] sm:$0xff] %v1088_v38  }
 0x101   : > { %v643_v43 = vadd.f32 %v642_v41, %v612_v39  ;;  %v1186_v44 = vpop.f32.mrb[4].mxu0  ;;  %v574_v45 = vadd.f32 %v1183_v28, %v573_v40  ;;  %v1377_v46 = vpop.f32.mrb[4].mxu1 }
 0x102   : > { %v461_v47 = vpop.f32.mrb[5].mxu0  ;;  %v1379_v48 = vpop.f32.mrb[5].mxu1  ;;  %v616_v63 = vmul.f32 %v1186_v44, %v1186_v44 }
 0x103   : > { %v575_v49 = vadd.f32 %v574_v45, %v461_v47  ;;  %v614_v50 = vmul.f32 %v461_v47, %v461_v47  ;;  %v644_v51 = vadd.f32 %v643_v43, %v613_v42  ;;  %v1187_v52 = vpop.f32.mrb[6].mxu0  ;;  %v1381_v53 = vpop.f32.mrb[6].mxu1 }
 0x104   : > { %v1063_v54 = vpack.c.bf16 %v1187_v52, %v1186_v44  ;;  %v464_v55 = vpop.f32.mrb[7].mxu0  ;;  %v1103_v56 = vpack.c.bf16 %v1381_v53, %v1377_v46  ;;  %v1385_v57 = vpop.f32.mrb[7].mxu1  ;;  %v617_v2 = vmul.f32 %v1187_v52, %v1187_v52 }
 0x105   : > { %v645_v58 = vadd.f32 %v644_v51, %v614_v50  ;;  %v576_v59 = vadd.f32 %v575_v49, %v464_v55  ;;  %v615_v60 = vmul.f32 %v464_v55, %v464_v55  ;;  %v1058_v61 = vpack.c.bf16 %v464_v55, %v461_v47 }
 0x106   : > { %1127 = vst [vmem:[%s1363_s14 + $0x18] sm:$0xff] %v1063_v54   ;;  %1135 = vst [vmem:[%s1363_s14 + $0x58] sm:$0xff] %v1103_v56   ;;  %v1098_v62 = vpack.c.bf16 %v1385_v57, %v1379_v48 }
 0x107   : > { %v577_v0 = vadd.f32 %v1186_v44, %v576_v59  ;;  %v646_v1 = vadd.f32 %v645_v58, %v615_v60  ;;  %1126 = vst [vmem:[%s1363_s14 + $0x10] sm:$0xff] %v1058_v61   ;;  %v626_v61 = vmul.f32 %v1356_v27, %v1356_v27 }
 0x108   : > { %1134 = vst [vmem:[%s1363_s14 + $0x50] sm:$0xff] %v1098_v62  }
 0x109   : > { %v647_v3 = vadd.f32 %v646_v1, %v616_v63  ;;  %v1190_v4 = vpop.f32.mrb[8].mxu0  ;;  %v578_v5 = vadd.f32 %v1187_v52, %v577_v0  ;;  %v1393_v6 = vpop.f32.mrb[8].mxu1 }
 0x10a   : > { %v477_v7 = vpop.f32.mrb[9].mxu0  ;;  %v1395_v8 = vpop.f32.mrb[9].mxu1  ;;  %v620_v23 = vmul.f32 %v1190_v4, %v1190_v4 }
 0x10b   : > { %v579_v9 = vadd.f32 %v578_v5, %v477_v7  ;;  %v618_v10 = vmul.f32 %v477_v7, %v477_v7  ;;  %v648_v11 = vadd.f32 %v647_v3, %v617_v2  ;;  %v1191_v12 = vpop.f32.mrb[10].mxu0  ;;  %v1397_v13 = vpop.f32.mrb[10].mxu1  ;;  %v627_v2 = vmul.f32 %v1369_v33, %v1369_v33 }
 0x10c   : > { %v1073_v14 = vpack.c.bf16 %v1191_v12, %v1190_v4  ;;  %v480_v15 = vpop.f32.mrb[11].mxu0  ;;  %v1113_v16 = vpack.c.bf16 %v1397_v13, %v1393_v6  ;;  %v1401_v17 = vpop.f32.mrb[11].mxu1  ;;  %v621_v28 = vmul.f32 %v1191_v12, %v1191_v12  ;;  %v628_v3 = vmul.f32 %v1354_v25, %v1354_v25 }
 0x10d   : > { %v649_v18 = vadd.f32 %v648_v11, %v618_v10  ;;  %v580_v19 = vadd.f32 %v579_v9, %v480_v15  ;;  %v619_v20 = vmul.f32 %v480_v15, %v480_v15  ;;  %v1068_v21 = vpack.c.bf16 %v480_v15, %v477_v7 }
 0x10e   : > { %1129 = vst [vmem:[%s1363_s14 + $0x28] sm:$0xff] %v1073_v14   ;;  %1137 = vst [vmem:[%s1363_s14 + $0x68] sm:$0xff] %v1113_v16   ;;  %v1108_v22 = vpack.c.bf16 %v1401_v17, %v1395_v8  ;;  %v629_v7 = vmul.f32 %v1365_v29, %v1365_v29  ;;  %v631_v15 = vmul.f32 %v1385_v57, %v1385_v57 }
 0x10f   : > { %v581_v24 = vadd.f32 %v1190_v4, %v580_v19  ;;  %v650_v26 = vadd.f32 %v649_v18, %v619_v20  ;;  %1128 = vst [vmem:[%s1363_s14 + $0x20] sm:$0xff] %v1068_v21  }
 0x110   : > { %1136 = vst [vmem:[%s1363_s14 + $0x60] sm:$0xff] %v1108_v22  }
 0x111   : > { %v651_v30 = vadd.f32 %v650_v26, %v620_v23  ;;  %v1194_v31 = vpop.f32.mrb[12].mxu0  ;;  %v582_v32 = vadd.f32 %v1191_v12, %v581_v24  ;;  %v1409_v34 = vpop.f32.mrb[12].mxu1  ;;  %v635_v24 = vmul.f32 %v1401_v17, %v1401_v17 }
 0x112   : > { %v493_v35 = vpop.f32.mrb[13].mxu0  ;;  %v557_v36 = vpop.f32.mrb[13].mxu1  ;;  %v624_v54 = vmul.f32 %v1194_v31, %v1194_v31 }
 0x113   : > { %v583_v37 = vadd.f32 %v582_v32, %v493_v35  ;;  %v622_v38 = vmul.f32 %v493_v35, %v493_v35  ;;  %v652_v39 = vadd.f32 %v651_v30, %v621_v28  ;;  %v1195_v40 = vpop.f32.mrb[14].mxu0  ;;  %v1411_v41 = vpop.f32.mrb[14].mxu1 }
 0x114   : > { %v1083_v42 = vpack.c.bf16 %v1195_v40, %v1194_v31  ;;  %v496_v43 = vpop.f32.mrb[15].mxu0  ;;  %v1123_v44 = vpack.c.bf16 %v1411_v41, %v1409_v34  ;;  %v560_v45 = vpop.f32.mrb[15].mxu1  ;;  %v625_v58 = vmul.f32 %v1195_v40, %v1195_v40 }
 0x115   : > { %v653_v47 = vadd.f32 %v652_v39, %v622_v38  ;;  %v584_v49 = vadd.f32 %v583_v37, %v496_v43  ;;  %v623_v50 = vmul.f32 %v496_v43, %v496_v43  ;;  %v1078_v51 = vpack.c.bf16 %v496_v43, %v493_v35 }
 0x116   : > { %1131 = vst [vmem:[%s1363_s14 + $0x38] sm:$0xff] %v1083_v42   ;;  %1139 = vst [vmem:[%s1363_s14 + $0x78] sm:$0xff] %v1123_v44   ;;  %v1118_v52 = vpack.c.bf16 %v560_v45, %v557_v36  ;;  %v640_v39 = vmul.f32 %v1409_v34, %v1409_v34  ;;  %v641_v42 = vmul.f32 %v1411_v41, %v1411_v41 }
 0x117   : > { %v585_v55 = vadd.f32 %v1194_v31, %v584_v49  ;;  %v654_v56 = vadd.f32 %v653_v47, %v623_v50  ;;  %1130 = vst [vmem:[%s1363_s14 + $0x30] sm:$0xff] %v1078_v51   ;;  %v638_v31 = vmul.f32 %v557_v36, %v557_v36 }
 0x118   : > { %1138 = vst [vmem:[%s1363_s14 + $0x70] sm:$0xff] %v1118_v52  }
 0x119   : > { %v655_v59 = vadd.f32 %v654_v56, %v624_v54  ;;  %v586_v60 = vadd.f32 %v1195_v40, %v585_v55 }
 0x11b   : > { %v587_v62 = vadd.f32 %v586_v60, %v1356_v27  ;;  %v656_v63 = vadd.f32 %v655_v59, %v625_v58  ;;  %v630_v27 = vmul.f32 %v1379_v48, %v1379_v48 }
 0x11d   : > { %v657_v0 = vadd.f32 %v656_v63, %v626_v61  ;;  %v588_v1 = vadd.f32 %v587_v62, %v1369_v33 }
 0x11f   : > { %v589_v4 = vadd.f32 %v1354_v25, %v588_v1  ;;  %v658_v5 = vadd.f32 %v657_v0, %v627_v2  ;;  %v632_v25 = vmul.f32 %v1377_v46, %v1377_v46 }
 0x121   : > { %v659_v9 = vadd.f32 %v658_v5, %v628_v3  ;;  %v590_v10 = vadd.f32 %v1365_v29, %v589_v4  ;;  %v633_v29 = vmul.f32 %v1381_v53, %v1381_v53 }
 0x123   : > { %v591_v11 = vadd.f32 %v590_v10, %v1379_v48  ;;  %v660_v12 = vadd.f32 %v659_v9, %v629_v7  ;;  %v634_v48 = vmul.f32 %v1395_v8, %v1395_v8 }
 0x125   : > { %v661_v14 = vadd.f32 %v660_v12, %v630_v27  ;;  %v592_v33 = vadd.f32 %v591_v11, %v1385_v57 }
 0x127   : > { %v593_v16 = vadd.f32 %v1377_v46, %v592_v33  ;;  %v662_v18 = vadd.f32 %v661_v14, %v631_v15  ;;  %v636_v46 = vmul.f32 %v1393_v6, %v1393_v6 }
 0x129   : > { %v663_v19 = vadd.f32 %v662_v18, %v632_v25  ;;  %v594_v20 = vadd.f32 %v1381_v53, %v593_v16  ;;  %v637_v53 = vmul.f32 %v1397_v13, %v1397_v13 }
 0x12b   : > { %v595_v21 = vadd.f32 %v594_v20, %v1395_v8  ;;  %v664_v22 = vadd.f32 %v663_v19, %v633_v29 }
 0x12d   : > { %v665_v23 = vadd.f32 %v664_v22, %v634_v48  ;;  %v596_v57 = vadd.f32 %v595_v21, %v1401_v17  ;;  %v639_v17 = vmul.f32 %v560_v45, %v560_v45 }
 0x12f   : > { %v597_v26 = vadd.f32 %v1393_v6, %v596_v57  ;;  %v666_v28 = vadd.f32 %v665_v23, %v635_v24 }
 0x131   : > { %v667_v30 = vadd.f32 %v666_v28, %v636_v46  ;;  %v598_v8 = vadd.f32 %v1397_v13, %v597_v26 }
 0x133   : > { %v599_v32 = vadd.f32 %v598_v8, %v557_v36  ;;  %v668_v35 = vadd.f32 %v667_v30, %v637_v53 }
 0x135   : > { %v669_v37 = vadd.f32 %v668_v35, %v638_v31  ;;  %v600_v38 = vadd.f32 %v599_v32, %v560_v45 }
 0x137   : > { %v601_v6 = vadd.f32 %v1409_v34, %v600_v38  ;;  %v670_v40 = vadd.f32 %v669_v37, %v639_v17 }
 0x139   : > { %v602_v43 = vadd.f32 %v1411_v41, %v601_v6  ;;  %v671_v44 = vadd.f32 %v670_v40, %v640_v39 }
 0x13b   : > { %v603_v13 = vrot.slane %v602_v43, 4  ;;  %v672_v47 = vadd.f32 %v671_v44, %v641_v42 }
 0x13d   : > { %v604_v36 = vadd.f32 %v603_v13, %v602_v43  ;;  %v673_v49 = vrot.slane %v672_v47, 4 }
 0x13f   : > { %v605_v50 = vrot.slane %v604_v36, 2  ;;  %v674_v51 = vadd.f32 %v673_v49, %v672_v47 }
 0x141   : > { %v606_v45 = vadd.f32 %v605_v50, %v604_v36  ;;  %v675_v52 = vrot.slane %v674_v51, 2 }
 0x143   : > { %v607_v54 = vrot.slane %v606_v45, 1  ;;  %v676_v55 = vadd.f32 %v675_v52, %v674_v51 }
 0x145   : > { %v608_v34 = vadd.f32 %v607_v54, %v606_v45  ;;  %v677_v56 = vrot.slane %v676_v55, 1 }
 0x147   : > { %609 = vst [vmem:[%s214_s19] sm:$0x1] %v608_v34  ;;  %v678_v41 = vadd.f32 %v677_v56, %v676_v55 }
 0x149   : > { %679 = vst [vmem:[%s217_s22] sm:$0x1] %v678_v41 }
 0x14a PF: > { %s15_s15 = sadd.s32 1, %s1266_s15  }
 0x14b   : > { %p12_p5 = scmp.ge.s32.totalorder %s15_s15, 4  }
 0x14d   :  { %14 = sbr.rel (!%p12_p5) target bundleno = 1 (0x1), region = 82 }

// kernel: bottleneck_forward.6
= control target key start
LH: loop header
LB: loop body
LE: loop exit
PB: predicated region body
PF: predicated region fallthrough
CT: control target
= control target key end

     0   :  { %s1468_s21 = smov 0   ;;  %s1739_s0 = inlined_call_operand.vmem [shape: bf16[512,128], index: 0, kind: input, shape index: {}]   ;;  %s1740_s1 = inlined_call_operand.vmem [shape: f32[1,128], index: 1, kind: input, shape index: {}]   ;;  %s1741_s2 = inlined_call_operand.vmem [shape: f32[1,128], index: 2, kind: input, shape index: {}]   ;;  %s1742_s3 = inlined_call_operand.vmem [shape: bf16[128,128], index: 3, kind: input, shape index: {}]   ;;  %s1743_s4 = inlined_call_operand.vmem [shape: bf16[512,128], index: 4, kind: output, shape index: {0}]   ;;  %s1744_s5 = inlined_call_operand.vmem [shape: f32[2,1,128], index: 5, kind: output, shape index: {1}]   ;;  %s1745_s6 = inlined_call_operand.vmem [shape: f32[2,1,128], index: 6, kind: output, shape index: {2}]  }
   0x1 LB: > { %s1474_s22 = sadd.s32 4294967295, %s1431_s21   ;;  %p1066_p0 = scmp.ge.s32.totalorder %s1431_s21, 1  ;;  %s1431_s21 = sphi %s1468_s21, %s17_s21  }
   0x2   : > { %p218_p1 = scmp.lt.s32.totalorder %s1431_s21, 3 }
   0x4   : > { %p219_p2 = pnand %p1066_p0, %p218_p1 }
   0x5   : > { %v1417_v0 = vld [vmem:[%s1742_s3] sm:$0xff] (!%p219_p2)   ;;  %s1067_s25 = sshll.u32 (!%p219_p2), %s1474_s22, 5  ;;  %v1418_v1 = vld [vmem:[%s1742_s3 + $0x8] sm:$0xff] (!%p219_p2)   ;;  %v1419_v2 = vld [vmem:[%s1742_s3 + $0x10] sm:$0xff] (!%p219_p2)   ;;  %p266_p4 = scmp.lt.s32.totalorder (!%p219_p2), %s1474_s22, 1 }
   0x6   : > { %222 = sbr.rel (%p219_p2) target bundleno = 330 (0x14a), region = 36  ;;  %p255_p3 = scmp.lt.s32.totalorder (!%p219_p2), %s1067_s25, 63  ;;  %1345 = vmatprep.subr.bf16.mxu0 (!%p219_p2), %v1417_v0  ;;  %1393 = vmatprep.subr.bf16.mxu1 (!%p219_p2), %v1417_v0  ;;  %v1420_v3 = vld [vmem:[%s1742_s3 + $0x18] sm:$0xff] (!%p219_p2)   ;;  %v1505_v5 = vld [vmem:[%s1740_s1] ss:$0 sm:$0xff] (!%p219_p2)  ;;  %v1422_v34 = vld [vmem:[%s1742_s3 + $0x28] sm:$0xff] (!%p219_p2)  }
   0x7   : > { %1346 = vmatpush3.bf16.msra.mxu0 (!%p219_p2), %v1417_v0  ;;  %1401 = vmatpush3.bf16.msra.mxu1 (!%p219_p2), %v1417_v0  ;;  %v1513_v11 = vld [vmem:[%s1741_s2] ss:$0 sm:$0xff] (!%p219_p2)  ;;  %v1423_v49 = vld [vmem:[%s1742_s3 + $0x30] sm:$0xff] (!%p219_p2)   ;;  %v1424_v63 = vld [vmem:[%s1742_s3 + $0x38] sm:$0xff] (!%p219_p2)  }
   0x8   : > { %1347 = vmatprep.subr.bf16.mxu0 (!%p219_p2), %v1418_v1  ;;  %1394 = vmatprep.subr.bf16.mxu1 (!%p219_p2), %v1418_v1  ;;  %v1421_v20 = vld [vmem:[%s1742_s3 + $0x20] sm:$0xff] (!%p219_p2)  }
   0xb   : > { %1348 = vmatpush3.bf16.msra.mxu0 (!%p219_p2), %v1418_v1  ;;  %1402 = vmatpush3.bf16.msra.mxu1 (!%p219_p2), %v1418_v1 }
   0xc   : > { %1349 = vmatprep.subr.bf16.mxu0 (!%p219_p2), %v1419_v2  ;;  %1395 = vmatprep.subr.bf16.mxu1 (!%p219_p2), %v1419_v2 }
   0xd   : > { %s1747_s25 = smov (!%p255_p3, %s1067_s25), 63  ;;  %s1749_s22 = smov (!%p266_p4, %s1474_s22), 1 }
   0xe   : > { %s1068_s30 = sshll.u32 %s1747_s25, 2  ;;  %s268_s7 = scalar_lea.vmem %s1744_s5, %s1749_s22 }
   0xf   : > { %s1496_s9 = scalar_lea.vmem %s1739_s0, %s1068_s30  ;;  %1350 = vmatpush3.bf16.msra.mxu0 %v1419_v2  ;;  %1403 = vmatpush3.bf16.msra.mxu1 %v1419_v2  ;;  %s1638_s29 = scalar_lea.vmem %s1743_s4, %s1068_s30 }
  0x10   : > { %v1148_v4 = vld [vmem:[%s1496_s9] sm:$0xff]   ;;  %v1291_v8 = vld [vmem:[%s1496_s9 + $0x8] sm:$0xff]   ;;  %v1292_v9 = vld [vmem:[%s1496_s9 + $0x10] sm:$0xff]   ;;  %1351 = vmatprep.subr.bf16.mxu0 %v1420_v3  ;;  %1396 = vmatprep.subr.bf16.mxu1 %v1420_v3  ;;  %s271_s10 = scalar_lea.vmem %s1745_s6, %s1749_s22 }
  0x11   : > { %v1149_v6 = vunpack.c.l.bf16 %v1148_v4  ;;  %v1150_v7 = vunpack.c.h.bf16 %v1148_v4  ;;  %v1293_v10 = vld [vmem:[%s1496_s9 + $0x18] sm:$0xff]   ;;  %v1153_v12 = vunpack.c.l.bf16 %v1291_v8  ;;  %v1154_v13 = vunpack.c.h.bf16 %v1291_v8  ;;  %v1294_v29 = vld [vmem:[%s1496_s9 + $0x20] sm:$0xff]   ;;  %v1295_v33 = vld [vmem:[%s1496_s9 + $0x28] sm:$0xff]  }
  0x12   : > { %v1157_v14 = vunpack.c.l.bf16 %v1292_v9  ;;  %v1158_v15 = vunpack.c.h.bf16 %v1292_v9  ;;  %v1161_v18 = vunpack.c.l.bf16 %v1293_v10  ;;  %v1162_v19 = vunpack.c.h.bf16 %v1293_v10  ;;  %v1296_v42 = vld [vmem:[%s1496_s9 + $0x30] sm:$0xff]   ;;  %v1542_v48 = vld [vmem:[%s1496_s9 + $0x38] sm:$0xff]   ;;  %v1298_v60 = vld [vmem:[%s1496_s9 + $0x40] sm:$0xff]  }
  0x13   : > { %v344_v16 = vmul.f32 %v1149_v6, %v1505_v5  ;;  %v345_v17 = vmul.f32 %v1150_v7, %v1505_v5  ;;  %v346_v21 = vmul.f32 %v1153_v12, %v1505_v5  ;;  %v347_v22 = vmul.f32 %v1154_v13, %v1505_v5  ;;  %1352 = vmatpush3.bf16.msra.mxu0 %v1420_v3  ;;  %v1300_v9 = vld [vmem:[%s1496_s9 + $0x50] sm:$0xff]  }
  0x14   : > { %v348_v23 = vmul.f32 %v1157_v14, %v1505_v5  ;;  %v349_v24 = vmul.f32 %v1158_v15, %v1505_v5  ;;  %v350_v27 = vmul.f32 %v1161_v18, %v1505_v5  ;;  %v351_v28 = vmul.f32 %v1162_v19, %v1505_v5  ;;  %1404 = vmatpush3.bf16.msra.mxu1 %v1420_v3  ;;  %v1299_v3 = vld [vmem:[%s1496_s9 + $0x48] sm:$0xff]   ;;  %v1301_v19 = vld [vmem:[%s1496_s9 + $0x58] sm:$0xff]  }
  0x15   : > { %v383_v25 = vadd.f32 %v1513_v11, %v344_v16  ;;  %v384_v26 = vadd.f32 %v1513_v11, %v345_v17  ;;  %v385_v32 = vadd.f32 %v1513_v11, %v346_v21  ;;  %1353 = vmatprep.subr.bf16.mxu0 %v1421_v20  ;;  %v386_v35 = vadd.f32 %v1513_v11, %v347_v22 }
  0x16   : > { %v387_v36 = vadd.f32 %v1513_v11, %v348_v23  ;;  %v388_v37 = vadd.f32 %v1513_v11, %v349_v24  ;;  %1397 = vmatprep.subr.bf16.mxu1 %v1421_v20  ;;  %v389_v39 = vadd.f32 %v1513_v11, %v350_v27  ;;  %v390_v40 = vadd.f32 %v1513_v11, %v351_v28 }
  0x17   : > { %v415_v30 = vmax.f32 %v383_v25, 0.0  ;;  %v416_v31 = vmax.f32 %v384_v26, 0.0  ;;  %v1165_v41 = vunpack.c.l.bf16 %v1294_v29  ;;  %v1166_v43 = vunpack.c.h.bf16 %v1294_v29  ;;  %1354 = vmatpush3.bf16.msra.mxu0 %v1421_v20 }
  0x18   : > { %v1169_v44 = vunpack.c.l.bf16 %v1295_v33  ;;  %v417_v45 = vmax.f32 %v385_v32, 0.0  ;;  %v1170_v47 = vunpack.c.h.bf16 %v1295_v33  ;;  %1355 = vmatprep.subr.bf16.mxu0 %v1422_v34  ;;  %v418_v50 = vmax.f32 %v386_v35, 0.0  ;;  %1405 = vmatpush3.bf16.msra.mxu1 %v1421_v20  ;;  %v1302_v32 = vld [vmem:[%s1496_s9 + $0x60] sm:$0xff]  }
  0x19   : > { %v447_v38 = vpack.c.bf16 %v416_v31, %v415_v30  ;;  %v352_v46 = vmul.f32 %v1165_v41, %v1505_v5  ;;  %v419_v51 = vmax.f32 %v387_v36, 0.0  ;;  %v420_v52 = vmax.f32 %v388_v37, 0.0  ;;  %1398 = vmatprep.subr.bf16.mxu1 %v1422_v34 }
  0x1a   : > { %v1173_v53 = vunpack.c.l.bf16 %v1296_v42  ;;  %v421_v54 = vmax.f32 %v389_v39, 0.0  ;;  %v422_v55 = vmax.f32 %v390_v40, 0.0  ;;  %v353_v56 = vmul.f32 %v1166_v43, %v1505_v5 }
  0x1b   : > { %1361 = vmatprep.mubr.bf16.mxu0 %v447_v38  ;;  %v354_v57 = vmul.f32 %v1169_v44, %v1505_v5  ;;  %v1174_v58 = vunpack.c.h.bf16 %v1296_v42  ;;  %v1177_v59 = vunpack.c.l.bf16 %v1542_v48  ;;  %1356 = vmatpush3.bf16.msra.mxu0 %v1422_v34  ;;  %v1552_v61 = vadd.f32 %v1513_v11, %v352_v46 }
  0x1c   : > { %v355_v62 = vmul.f32 %v1170_v47, %v1505_v5  ;;  %1357 = vmatprep.subr.bf16.mxu0 %v1423_v49  ;;  %v448_v0 = vpack.c.bf16 %v418_v50, %v417_v45  ;;  %v449_v1 = vpack.c.bf16 %v420_v52, %v419_v51  ;;  %1406 = vmatpush3.bf16.msra.mxu1 %v1422_v34  ;;  %v1178_v7 = vunpack.c.h.bf16 %v1542_v48  ;;  %v1303_v45 = vld [vmem:[%s1496_s9 + $0x68] sm:$0xff]  }
  0x1d   : > { %v356_v2 = vmul.f32 %v1173_v53, %v1505_v5  ;;  %v1560_v4 = vpack.c.bf16 %v422_v55, %v421_v54  ;;  %v1563_v6 = vadd.f32 %v1513_v11, %v353_v56  ;;  %1399 = vmatprep.subr.bf16.mxu1 %v1423_v49  ;;  %v1181_v8 = vunpack.c.l.bf16 %v1298_v60  ;;  %v1304_v55 = vld [vmem:[%s1496_s9 + $0x70] sm:$0xff]  }
  0x1e   : > { %v1568_v10 = vadd.f32 %v1513_v11, %v354_v57  ;;  %v1571_v12 = vmul.f32 %v1174_v58, %v1505_v5  ;;  %v1574_v13 = vmul.f32 %v1177_v59, %v1505_v5  ;;  %v1182_v14 = vunpack.c.h.bf16 %v1298_v60 }
  0x1f   : > { %1358 = vmatpush3.bf16.msra.mxu0 %v1423_v49  ;;  %v423_v15 = vmax.f32 %v1552_v61, 0.0  ;;  %v1578_v16 = vadd.f32 %v1513_v11, %v355_v62  ;;  %v360_v17 = vmul.f32 %v1181_v8, %v1505_v5  ;;  %v1185_v18 = vunpack.c.l.bf16 %v1299_v3 }
  0x20   : > { %1359 = vmatprep.subr.bf16.mxu0 %v1424_v63  ;;  %1407 = vmatpush3.bf16.msra.mxu1 %v1423_v49  ;;  %v1583_v20 = vadd.f32 %v1513_v11, %v356_v2  ;;  %v361_v21 = vmul.f32 %v1182_v14, %v1505_v5  ;;  %v1186_v22 = vunpack.c.h.bf16 %v1299_v3  ;;  %v1189_v23 = vunpack.c.l.bf16 %v1300_v9 }
  0x21   : > { %v424_v24 = vmax.f32 %v1563_v6, 0.0  ;;  %1400 = vmatprep.subr.bf16.mxu1 %v1424_v63  ;;  %v399_v25 = vadd.f32 %v1513_v11, %v360_v17  ;;  %v362_v26 = vmul.f32 %v1185_v18, %v1505_v5  ;;  %v1190_v27 = vunpack.c.h.bf16 %v1300_v9  ;;  %v1305_v17 = vld [vmem:[%s1496_s9 + $0x78] sm:$0xff]  }
  0x22   : > { %v400_v28 = vadd.f32 %v1513_v11, %v361_v21  ;;  %v363_v29 = vmul.f32 %v1186_v22, %v1505_v5  ;;  %v364_v30 = vmul.f32 %v1189_v23, %v1505_v5  ;;  %v1193_v31 = vunpack.c.l.bf16 %v1301_v19 }
  0x23   : > { %1360 = vmatpush3.bf16.msra.mxu0 %v1424_v63  ;;  %v431_v33 = vmax.f32 %v399_v25, 0.0  ;;  %v401_v34 = vadd.f32 %v1513_v11, %v362_v26  ;;  %v365_v35 = vmul.f32 %v1190_v27, %v1505_v5  ;;  %v1194_v36 = vunpack.c.h.bf16 %v1301_v19 }
  0x24   : > { %1408 = vmatpush3.bf16.msra.mxu1 %v1424_v63  ;;  %v432_v37 = vmax.f32 %v400_v28, 0.0  ;;  %v402_v38 = vadd.f32 %v1513_v11, %v363_v29  ;;  %v403_v39 = vadd.f32 %v1513_v11, %v364_v30  ;;  %v366_v40 = vmul.f32 %v1193_v31, %v1505_v5 }
  0x25   : > { %v433_v41 = vmax.f32 %v401_v34, 0.0  ;;  %v404_v42 = vadd.f32 %v1513_v11, %v365_v35  ;;  %v367_v43 = vmul.f32 %v1194_v36, %v1505_v5  ;;  %v1197_v44 = vunpack.c.l.bf16 %v1302_v32 }
  0x26   : > { %1362 = vmatmul.mubr.bf16.vlgmr.msra.gmra.mrb[0].mxu0 %v448_v0  ;;  %v455_v46 = vpack.c.bf16 %v432_v37, %v431_v33  ;;  %v434_v47 = vmax.f32 %v402_v38, 0.0  ;;  %v435_v49 = vmax.f32 %v403_v39, 0.0  ;;  %v405_v50 = vadd.f32 %v1513_v11, %v366_v40 }
  0x27   : > { %1365 = vmatprep.mubr.bf16.mxu0 %v449_v1  ;;  %v436_v51 = vmax.f32 %v404_v42, 0.0  ;;  %v406_v52 = vadd.f32 %v1513_v11, %v367_v43  ;;  %v1198_v53 = vunpack.c.h.bf16 %v1302_v32  ;;  %v368_v54 = vmul.f32 %v1197_v44, %v1505_v5 }
  0x28   : > { %1377 = vmatprep.mubr.bf16.mxu1 %v455_v46  ;;  %v456_v56 = vpack.c.bf16 %v434_v47, %v433_v41  ;;  %v437_v57 = vmax.f32 %v405_v50, 0.0  ;;  %v1201_v58 = vunpack.c.l.bf16 %v1303_v45  ;;  %v1202_v59 = vunpack.c.h.bf16 %v1303_v45 }
  0x29   : > { %v457_v60 = vpack.c.bf16 %v436_v51, %v435_v49  ;;  %v438_v61 = vmax.f32 %v406_v52, 0.0  ;;  %v369_v62 = vmul.f32 %v1198_v53, %v1505_v5  ;;  %v407_v63 = vadd.f32 %v1513_v11, %v368_v54 }
  0x2a   : > { %1378 = vmatmul.mubr.bf16.vlgmr.msra.gmra.mrb[0].mxu1 %v456_v56  ;;  %v370_v0 = vmul.f32 %v1201_v58, %v1505_v5  ;;  %v371_v1 = vmul.f32 %v1202_v59, %v1505_v5  ;;  %v1205_v2 = vunpack.c.l.bf16 %v1304_v55  ;;  %v1206_v3 = vunpack.c.h.bf16 %v1304_v55 }
  0x2b   : > { %v451_v6 = vpack.c.bf16 %v424_v24, %v423_v15  ;;  %v396_v8 = vadd.f32 %v1513_v11, %v1571_v12  ;;  %1381 = vmatprep.mubr.bf16.mxu1 %v457_v60  ;;  %v408_v9 = vadd.f32 %v1513_v11, %v369_v62  ;;  %v439_v14 = vmax.f32 %v407_v63, 0.0 }
  0x2c   : > { %v425_v18 = vmax.f32 %v1568_v10, 0.0  ;;  %v359_v19 = vmul.f32 %v1178_v7, %v1505_v5  ;;  %v372_v21 = vmul.f32 %v1205_v2, %v1505_v5  ;;  %v373_v22 = vmul.f32 %v1206_v3, %v1505_v5 }
  0x2d   : > { %v426_v15 = vmax.f32 %v1578_v16, 0.0  ;;  %v427_v23 = vmax.f32 %v1583_v20, 0.0  ;;  %v458_v12 = vpack.c.bf16 %v438_v61, %v437_v57  ;;  %v440_v24 = vmax.f32 %v408_v9, 0.0 }
  0x2e   : > { %1366 = vmatmul.mubr.bf16.gmra.mrb[4].mxu0 %v1560_v4  ;;  %v409_v25 = vadd.f32 %v1513_v11, %v370_v0  ;;  %v410_v10 = vadd.f32 %v1513_v11, %v371_v1  ;;  %v1209_v26 = vunpack.c.l.bf16 %v1305_v17  ;;  %v1210_v27 = vunpack.c.h.bf16 %v1305_v17 }
  0x2f   : > { %1369 = vmatprep.mubr.bf16.mxu0 %v451_v6  ;;  %v428_v48 = vmax.f32 %v396_v8, 0.0  ;;  %v459_v7 = vpack.c.bf16 %v440_v24, %v439_v14  ;;  %v411_v28 = vadd.f32 %v1513_v11, %v372_v21  ;;  %v412_v29 = vadd.f32 %v1513_v11, %v373_v22 }
  0x30   : > { %v452_v16 = vpack.c.bf16 %v426_v15, %v425_v18  ;;  %v397_v20 = vadd.f32 %v1513_v11, %v1574_v13  ;;  %v398_v30 = vadd.f32 %v1513_v11, %v359_v19  ;;  %v441_v4 = vmax.f32 %v409_v25, 0.0 }
  0x31   : > { %v442_v31 = vmax.f32 %v410_v10, 0.0  ;;  %v374_v32 = vmul.f32 %v1209_v26, %v1505_v5  ;;  %v375_v33 = vmul.f32 %v1210_v27, %v1505_v5  ;;  %v453_v34 = vpack.c.bf16 %v428_v48, %v427_v23 }
  0x32   : > { %1382 = vmatmul.mubr.bf16.gmra.mrb[4].mxu1 %v458_v12  ;;  %v443_v35 = vmax.f32 %v411_v28, 0.0  ;;  %v444_v36 = vmax.f32 %v412_v29, 0.0  ;;  %v429_v37 = vmax.f32 %v397_v20, 0.0  ;;  %v430_v38 = vmax.f32 %v398_v30, 0.0 }
  0x33   : > { %1385 = vmatprep.mubr.bf16.mxu1 %v459_v7  ;;  %v460_v39 = vpack.c.bf16 %v442_v31, %v441_v4  ;;  %v413_v13 = vadd.f32 %v1513_v11, %v374_v32  ;;  %v414_v40 = vadd.f32 %v1513_v11, %v375_v33 }
  0x34   : > { %v461_v41 = vpack.c.bf16 %v444_v36, %v443_v35  ;;  %v454_v42 = vpack.c.bf16 %v430_v38, %v429_v37 }
  0x35   : > { %v445_v43 = vmax.f32 %v413_v13, 0.0  ;;  %v446_v44 = vmax.f32 %v414_v40, 0.0 }
  0x36   : > { %1370 = vmatmul.mubr.bf16.gmra.mrb[8].mxu0 %v452_v16 }
  0x37   : > { %1373 = vmatprep.mubr.bf16.mxu0 %v453_v34  ;;  %v462_v5 = vpack.c.bf16 %v446_v44, %v445_v43 }
  0x3a   : > { %1386 = vmatmul.mubr.bf16.gmra.mrb[8].mxu1 %v460_v39 }
  0x3b   : > { %1389 = vmatprep.mubr.bf16.mxu1 %v461_v41 }
  0x3e   : > { %1374 = vmatmul.mubr.bf16.gmra.mrb[12].mxu0 %v454_v42 }
  0x42   : > { %1390 = vmatmul.mubr.bf16.gmra.mrb[12].mxu1 %v462_v5 }
  0xf9   : > { %v1363_v45 = vpop.f32.mrb[0].mxu0 }
  0xfa   : > { %v561_v46 = vpop.f32.mrb[1].mxu0  ;;  %v728_v56 = vmul.f32 %v1363_v45, %v1363_v45 }
  0xfb   : > { %v1364_v11 = vpop.f32.mrb[2].mxu0  ;;  %v726_v50 = vmul.f32 %v561_v46, %v561_v46 }
  0xfc   : > { %v1219_v47 = vpack.c.bf16 %v1364_v11, %v1363_v45  ;;  %v564_v49 = vpop.f32.mrb[3].mxu0  ;;  %v729_v62 = vmul.f32 %v1364_v11, %v1364_v11 }
  0xfd   : > { %v688_v51 = vadd.f32 %v564_v49, %v561_v46  ;;  %v727_v52 = vmul.f32 %v564_v49, %v564_v49  ;;  %v1214_v53 = vpack.c.bf16 %v564_v49, %v561_v46  ;;  %v1640_v54 = vpop.f32.mrb[0].mxu1 }
  0xfe   : > { %1306 = vst [vmem:[%s1638_s29 + $0x8] sm:$0xff] %v1219_v47   ;;  %v1643_v55 = vpop.f32.mrb[1].mxu1 }
  0xff   : > { %v689_v57 = vadd.f32 %v1363_v45, %v688_v51  ;;  %v758_v58 = vadd.f32 %v727_v52, %v726_v50  ;;  %1215 = vst [vmem:[%s1638_s29] sm:$0xff] %v1214_v53   ;;  %v1646_v59 = vpop.f32.mrb[2].mxu1 }
 0x100   : > { %v1259_v60 = vpack.c.bf16 %v1646_v59, %v1640_v54  ;;  %v1650_v61 = vpop.f32.mrb[3].mxu1 }
 0x101   : > { %v759_v63 = vadd.f32 %v758_v58, %v728_v56  ;;  %v1367_v0 = vpop.f32.mrb[4].mxu0  ;;  %v690_v1 = vadd.f32 %v1364_v11, %v689_v57  ;;  %v1254_v2 = vpack.c.bf16 %v1650_v61, %v1643_v55 }
 0x102   : > { %v577_v3 = vpop.f32.mrb[5].mxu0  ;;  %1314 = vst [vmem:[%s1638_s29 + $0x48] sm:$0xff] %v1259_v60   ;;  %v732_v24 = vmul.f32 %v1367_v0, %v1367_v0 }
 0x103   : > { %v691_v6 = vadd.f32 %v690_v1, %v577_v3  ;;  %v730_v8 = vmul.f32 %v577_v3, %v577_v3  ;;  %v760_v9 = vadd.f32 %v759_v63, %v729_v62  ;;  %v1368_v14 = vpop.f32.mrb[6].mxu0  ;;  %1313 = vst [vmem:[%s1638_s29 + $0x40] sm:$0xff] %v1254_v2  }
 0x104   : > { %v1229_v17 = vpack.c.bf16 %v1368_v14, %v1367_v0  ;;  %v580_v18 = vpop.f32.mrb[7].mxu0  ;;  %v733_v7 = vmul.f32 %v1368_v14, %v1368_v14 }
 0x105   : > { %v761_v19 = vadd.f32 %v760_v9, %v730_v8  ;;  %v692_v21 = vadd.f32 %v691_v6, %v580_v18  ;;  %v731_v22 = vmul.f32 %v580_v18, %v580_v18  ;;  %v1224_v15 = vpack.c.bf16 %v580_v18, %v577_v3  ;;  %v1656_v23 = vpop.f32.mrb[4].mxu1 }
 0x106   : > { %1308 = vst [vmem:[%s1638_s29 + $0x18] sm:$0xff] %v1229_v17   ;;  %v1659_v12 = vpop.f32.mrb[5].mxu1  ;;  %v742_v17 = vmul.f32 %v1643_v55, %v1643_v55 }
 0x107   : > { %v693_v25 = vadd.f32 %v1367_v0, %v692_v21  ;;  %v762_v10 = vadd.f32 %v761_v19, %v731_v22  ;;  %1307 = vst [vmem:[%s1638_s29 + $0x10] sm:$0xff] %v1224_v15   ;;  %v1662_v26 = vpop.f32.mrb[6].mxu1 }
 0x108   : > { %v1269_v27 = vpack.c.bf16 %v1662_v26, %v1656_v23  ;;  %v1666_v48 = vpop.f32.mrb[7].mxu1 }
 0x109   : > { %v763_v28 = vadd.f32 %v762_v10, %v732_v24  ;;  %v1371_v29 = vpop.f32.mrb[8].mxu0  ;;  %v694_v16 = vadd.f32 %v1368_v14, %v693_v25  ;;  %v1264_v20 = vpack.c.bf16 %v1666_v48, %v1659_v12 }
 0x10a   : > { %v593_v30 = vpop.f32.mrb[9].mxu0  ;;  %1316 = vst [vmem:[%s1638_s29 + $0x58] sm:$0xff] %v1269_v27   ;;  %v736_v41 = vmul.f32 %v1371_v29, %v1371_v29 }
 0x10b   : > { %v695_v4 = vadd.f32 %v694_v16, %v593_v30  ;;  %v734_v31 = vmul.f32 %v593_v30, %v593_v30  ;;  %v764_v32 = vadd.f32 %v763_v28, %v733_v7  ;;  %v1372_v33 = vpop.f32.mrb[10].mxu0  ;;  %1315 = vst [vmem:[%s1638_s29 + $0x50] sm:$0xff] %v1264_v20   ;;  %v743_v28 = vmul.f32 %v1650_v61, %v1650_v61 }
 0x10c   : > { %v1239_v34 = vpack.c.bf16 %v1372_v33, %v1371_v29  ;;  %v596_v35 = vpop.f32.mrb[11].mxu0  ;;  %v737_v46 = vmul.f32 %v1372_v33, %v1372_v33 }
 0x10d   : > { %v765_v36 = vadd.f32 %v764_v32, %v734_v31  ;;  %v696_v37 = vadd.f32 %v695_v4, %v596_v35  ;;  %v735_v38 = vmul.f32 %v596_v35, %v596_v35  ;;  %v1234_v39 = vpack.c.bf16 %v596_v35, %v593_v30  ;;  %v1672_v13 = vpop.f32.mrb[8].mxu1 }
 0x10e   : > { %1310 = vst [vmem:[%s1638_s29 + $0x28] sm:$0xff] %v1239_v34   ;;  %v1675_v40 = vpop.f32.mrb[9].mxu1  ;;  %v745_v30 = vmul.f32 %v1646_v59, %v1646_v59  ;;  %v746_v31 = vmul.f32 %v1659_v12, %v1659_v12  ;;  %v747_v35 = vmul.f32 %v1666_v48, %v1666_v48 }
 0x10f   : > { %v697_v42 = vadd.f32 %v1371_v29, %v696_v37  ;;  %v766_v43 = vadd.f32 %v765_v36, %v735_v38  ;;  %1309 = vst [vmem:[%s1638_s29 + $0x20] sm:$0xff] %v1234_v39   ;;  %v1678_v44 = vpop.f32.mrb[10].mxu1  ;;  %v744_v29 = vmul.f32 %v1640_v54, %v1640_v54 }
 0x110   : > { %v1279_v5 = vpack.c.bf16 %v1678_v44, %v1672_v13  ;;  %v1682_v45 = vpop.f32.mrb[11].mxu1 }
 0x111   : > { %v767_v11 = vadd.f32 %v766_v43, %v736_v41  ;;  %v1375_v47 = vpop.f32.mrb[12].mxu0  ;;  %v698_v49 = vadd.f32 %v1372_v33, %v697_v42  ;;  %v1274_v50 = vpack.c.bf16 %v1682_v45, %v1675_v40 }
 0x112   : > { %v609_v51 = vpop.f32.mrb[13].mxu0  ;;  %1318 = vst [vmem:[%s1638_s29 + $0x68] sm:$0xff] %v1279_v5   ;;  %v740_v6 = vmul.f32 %v1375_v47, %v1375_v47  ;;  %v751_v5 = vmul.f32 %v1682_v45, %v1682_v45 }
 0x113   : > { %v699_v52 = vadd.f32 %v698_v49, %v609_v51  ;;  %v738_v53 = vmul.f32 %v609_v51, %v609_v51  ;;  %v768_v56 = vadd.f32 %v767_v11, %v737_v46  ;;  %v1376_v57 = vpop.f32.mrb[14].mxu0  ;;  %1317 = vst [vmem:[%s1638_s29 + $0x60] sm:$0xff] %v1274_v50  }
 0x114   : > { %v1249_v58 = vpack.c.bf16 %v1376_v57, %v1375_v47  ;;  %v612_v60 = vpop.f32.mrb[15].mxu0  ;;  %v741_v21 = vmul.f32 %v1376_v57, %v1376_v57 }
 0x115   : > { %v769_v62 = vadd.f32 %v768_v56, %v738_v53  ;;  %v700_v63 = vadd.f32 %v699_v52, %v612_v60  ;;  %v739_v0 = vmul.f32 %v612_v60, %v612_v60  ;;  %v1244_v1 = vpack.c.bf16 %v612_v60, %v609_v51  ;;  %v1391_v2 = vpop.f32.mrb[12].mxu1 }
 0x116   : > { %1312 = vst [vmem:[%s1638_s29 + $0x38] sm:$0xff] %v1249_v58   ;;  %v673_v3 = vpop.f32.mrb[13].mxu1  ;;  %v756_v56 = vmul.f32 %v1391_v2, %v1391_v2 }
 0x117   : > { %v701_v8 = vadd.f32 %v1375_v47, %v700_v63  ;;  %v770_v9 = vadd.f32 %v769_v62, %v739_v0  ;;  %1311 = vst [vmem:[%s1638_s29 + $0x30] sm:$0xff] %v1244_v1   ;;  %v1392_v14 = vpop.f32.mrb[14].mxu1  ;;  %v754_v49 = vmul.f32 %v673_v3, %v673_v3 }
 0x118   : > { %v1289_v18 = vpack.c.bf16 %v1392_v14, %v1391_v2  ;;  %v676_v19 = vpop.f32.mrb[15].mxu1  ;;  %v757_v60 = vmul.f32 %v1392_v14, %v1392_v14 }
 0x119   : > { %v771_v22 = vadd.f32 %v770_v9, %v740_v6  ;;  %v702_v15 = vadd.f32 %v1376_v57, %v701_v8  ;;  %v1284_v24 = vpack.c.bf16 %v676_v19, %v673_v3 }
 0x11a   : > { %1320 = vst [vmem:[%s1638_s29 + $0x78] sm:$0xff] %v1289_v18  }
 0x11b   : > { %v703_v25 = vadd.f32 %v702_v15, %v1643_v55  ;;  %v772_v10 = vadd.f32 %v771_v22, %v741_v21  ;;  %1319 = vst [vmem:[%s1638_s29 + $0x70] sm:$0xff] %v1284_v24  }
 0x11d   : > { %v773_v27 = vadd.f32 %v772_v10, %v742_v17  ;;  %v704_v7 = vadd.f32 %v703_v25, %v1650_v61 }
 0x11f   : > { %v705_v16 = vadd.f32 %v1640_v54, %v704_v7  ;;  %v774_v20 = vadd.f32 %v773_v27, %v743_v28  ;;  %v748_v54 = vmul.f32 %v1656_v23, %v1656_v23 }
 0x121   : > { %v775_v4 = vadd.f32 %v774_v20, %v744_v29  ;;  %v706_v55 = vadd.f32 %v1646_v59, %v705_v16  ;;  %v749_v59 = vmul.f32 %v1662_v26, %v1662_v26 }
 0x123   : > { %v707_v32 = vadd.f32 %v706_v55, %v1659_v12  ;;  %v776_v33 = vadd.f32 %v775_v4, %v745_v30  ;;  %v750_v12 = vmul.f32 %v1675_v40, %v1675_v40 }
 0x125   : > { %v777_v34 = vadd.f32 %v776_v33, %v746_v31  ;;  %v708_v61 = vadd.f32 %v707_v32, %v1666_v48 }
 0x127   : > { %v709_v36 = vadd.f32 %v1656_v23, %v708_v61  ;;  %v778_v37 = vadd.f32 %v777_v34, %v747_v35  ;;  %v752_v23 = vmul.f32 %v1672_v13, %v1672_v13 }
 0x129   : > { %v779_v38 = vadd.f32 %v778_v37, %v748_v54  ;;  %v710_v39 = vadd.f32 %v1662_v26, %v709_v36  ;;  %v753_v26 = vmul.f32 %v1678_v44, %v1678_v44 }
 0x12b   : > { %v711_v41 = vadd.f32 %v710_v39, %v1675_v40  ;;  %v780_v42 = vadd.f32 %v779_v38, %v749_v59 }
 0x12d   : > { %v781_v43 = vadd.f32 %v780_v42, %v750_v12  ;;  %v712_v48 = vadd.f32 %v711_v41, %v1682_v45  ;;  %v755_v45 = vmul.f32 %v676_v19, %v676_v19 }
 0x12f   : > { %v713_v46 = vadd.f32 %v1672_v13, %v712_v48  ;;  %v782_v11 = vadd.f32 %v781_v43, %v751_v5 }
 0x131   : > { %v783_v47 = vadd.f32 %v782_v11, %v752_v23  ;;  %v714_v40 = vadd.f32 %v1678_v44, %v713_v46 }
 0x133   : > { %v715_v50 = vadd.f32 %v714_v40, %v673_v3  ;;  %v784_v51 = vadd.f32 %v783_v47, %v753_v26 }
 0x135   : > { %v785_v52 = vadd.f32 %v784_v51, %v754_v49  ;;  %v716_v53 = vadd.f32 %v715_v50, %v676_v19 }
 0x137   : > { %v717_v57 = vadd.f32 %v1391_v2, %v716_v53  ;;  %v786_v58 = vadd.f32 %v785_v52, %v755_v45 }
 0x139   : > { %v718_v13 = vadd.f32 %v1392_v14, %v717_v57  ;;  %v787_v62 = vadd.f32 %v786_v58, %v756_v56 }
 0x13b   : > { %v719_v63 = vrot.slane %v718_v13, 4  ;;  %v788_v0 = vadd.f32 %v787_v62, %v757_v60 }
 0x13d   : > { %v720_v1 = vadd.f32 %v719_v63, %v718_v13  ;;  %v789_v6 = vrot.slane %v788_v0, 4 }
 0x13f   : > { %v721_v8 = vrot.slane %v720_v1, 2  ;;  %v790_v44 = vadd.f32 %v789_v6, %v788_v0 }
 0x141   : > { %v722_v3 = vadd.f32 %v721_v8, %v720_v1  ;;  %v791_v9 = vrot.slane %v790_v44, 2 }
 0x143   : > { %v723_v17 = vrot.slane %v722_v3, 1  ;;  %v792_v18 = vadd.f32 %v791_v9, %v790_v44 }
 0x145   : > { %v724_v2 = vadd.f32 %v723_v17, %v722_v3  ;;  %v793_v19 = vrot.slane %v792_v18, 1 }
 0x147   : > { %725 = vst [vmem:[%s268_s7] sm:$0x1] %v724_v2  ;;  %v794_v14 = vadd.f32 %v793_v19, %v792_v18 }
 0x149   : > { %795 = vst [vmem:[%s271_s10] sm:$0x1] %v794_v14 }
 0x14a PF: > { %s17_s21 = sadd.s32 1, %s1431_s21  }
 0x14b   : > { %p14_p5 = scmp.ge.s32.totalorder %s17_s21, 4  }
 0x14d   :  { %16 = sbr.rel (!%p14_p5) target bundleno = 1 (0x1), region = 90 }

// kernel: bottleneck_forward.7
= control target key start
LH: loop header
LB: loop body
LE: loop exit
PB: predicated region body
PF: predicated region fallthrough
CT: control target
= control target key end

     0   :  { %s696_s15 = smov 0   ;;  %s852_s0 = inlined_call_operand.vmem [shape: bf16[512,128], index: 0, kind: input, shape index: {}]   ;;  %s853_s1 = inlined_call_operand.vmem [shape: f32[1,128], index: 1, kind: input, shape index: {}]   ;;  %s854_s2 = inlined_call_operand.vmem [shape: f32[1,128], index: 2, kind: input, shape index: {}]   ;;  %s855_s3 = inlined_call_operand.vmem [shape: f32[512,128], index: 3, kind: input, shape index: {}, may-alias: {3,4}]   ;;  %s856_s4 = inlined_call_operand.vmem [shape: f32[512,128], index: 4, kind: output, shape index: {}, may-alias: {3,4}]  }
   0x1 LB: > { %s561_s16 = sadd.s32 4294967295, %s669_s15   ;;  %p565_p0 = scmp.ge.s32.totalorder %s669_s15, 1  ;;  %s669_s15 = sphi %s696_s15, %s14_s15  }
   0x2   : > { %p174_p1 = scmp.lt.s32.totalorder %s669_s15, 3 }
   0x4   : > { %p175_p2 = pnand %p565_p0, %p174_p1 }
   0x5   : > { %s566_s17 = sshll.u32 (!%p175_p2), %s561_s16, 5  ;;  %v572_v40 = vld [vmem:[%s853_s1] ss:$0 sm:$0xff] (!%p175_p2) }
   0x6   : > { %178 = sbr.rel (%p175_p2) target bundleno = 67 (0x43), region = 36  ;;  %p206_p3 = scmp.lt.s32.totalorder (!%p175_p2), %s566_s17, 63 }
   0xd   : > { %s858_s17 = smov (!%p206_p3, %s566_s17), 63 }
   0xe   : > { %s567_s18 = sshll.u32 %s858_s17, 2  ;;  %s569_s24 = sshll.u32 %s858_s17, 3 }
   0xf   : > { %s710_s21 = scalar_lea.vmem %s852_s0, %s567_s18  ;;  %s740_s29 = scalar_lea.vmem %s855_s3, %s569_s24 }
  0x10   : > { %v577_v0 = vld [vmem:[%s710_s21] sm:$0xff]   ;;  %v640_v1 = vld [vmem:[%s710_s21 + $0x8] sm:$0xff]   ;;  %v641_v2 = vld [vmem:[%s710_s21 + $0x10] sm:$0xff]   ;;  %s795_s6 = scalar_lea.vmem %s856_s4, %s569_s24 }
  0x11   : > { %v578_v3 = vunpack.c.l.bf16 %v577_v0  ;;  %v579_v4 = vunpack.c.h.bf16 %v577_v0  ;;  %v582_v5 = vunpack.c.l.bf16 %v640_v1  ;;  %v583_v6 = vunpack.c.h.bf16 %v640_v1  ;;  %v642_v7 = vld [vmem:[%s710_s21 + $0x18] sm:$0xff]   ;;  %v643_v8 = vld [vmem:[%s710_s21 + $0x20] sm:$0xff]   ;;  %v644_v9 = vld [vmem:[%s710_s21 + $0x28] sm:$0xff]  }
  0x12   : > { %v586_v10 = vunpack.c.l.bf16 %v641_v2  ;;  %v587_v11 = vunpack.c.h.bf16 %v641_v2  ;;  %v590_v12 = vunpack.c.l.bf16 %v642_v7  ;;  %v591_v13 = vunpack.c.h.bf16 %v642_v7  ;;  %v645_v14 = vld [vmem:[%s710_s21 + $0x30] sm:$0xff]   ;;  %v646_v15 = vld [vmem:[%s710_s21 + $0x38] sm:$0xff]   ;;  %v647_v16 = vld [vmem:[%s710_s21 + $0x40] sm:$0xff]  }
  0x13   : > { %v594_v17 = vunpack.c.l.bf16 %v643_v8  ;;  %v595_v18 = vunpack.c.h.bf16 %v643_v8  ;;  %v598_v19 = vunpack.c.l.bf16 %v644_v9  ;;  %v599_v20 = vunpack.c.h.bf16 %v644_v9  ;;  %v648_v21 = vld [vmem:[%s710_s21 + $0x48] sm:$0xff]   ;;  %v649_v22 = vld [vmem:[%s710_s21 + $0x50] sm:$0xff]   ;;  %v650_v23 = vld [vmem:[%s710_s21 + $0x58] sm:$0xff]  }
  0x14   : > { %v602_v24 = vunpack.c.l.bf16 %v645_v14  ;;  %v603_v25 = vunpack.c.h.bf16 %v645_v14  ;;  %v606_v26 = vunpack.c.l.bf16 %v646_v15  ;;  %v607_v27 = vunpack.c.h.bf16 %v646_v15  ;;  %v651_v28 = vld [vmem:[%s710_s21 + $0x60] sm:$0xff]   ;;  %v652_v29 = vld [vmem:[%s710_s21 + $0x68] sm:$0xff]   ;;  %v653_v34 = vld [vmem:[%s710_s21 + $0x70] sm:$0xff]  }
  0x15   : > { %v610_v30 = vunpack.c.l.bf16 %v647_v16  ;;  %v611_v31 = vunpack.c.h.bf16 %v647_v16  ;;  %v614_v32 = vunpack.c.l.bf16 %v648_v21  ;;  %v615_v33 = vunpack.c.h.bf16 %v648_v21  ;;  %v654_v35 = vld [vmem:[%s710_s21 + $0x78] sm:$0xff]   ;;  %v573_v9 = vld [vmem:[%s854_s2] ss:$0 sm:$0xff] }
  0x16   : > { %v618_v36 = vunpack.c.l.bf16 %v649_v22  ;;  %v619_v37 = vunpack.c.h.bf16 %v649_v22  ;;  %v622_v38 = vunpack.c.l.bf16 %v650_v23  ;;  %v623_v39 = vunpack.c.h.bf16 %v650_v23 }
  0x17   : > { %v626_v41 = vunpack.c.l.bf16 %v651_v28  ;;  %v627_v42 = vunpack.c.h.bf16 %v651_v28  ;;  %v630_v43 = vunpack.c.l.bf16 %v652_v29  ;;  %v631_v44 = vunpack.c.h.bf16 %v652_v29 }
  0x18   : > { %v634_v45 = vunpack.c.l.bf16 %v653_v34  ;;  %v635_v46 = vunpack.c.h.bf16 %v653_v34  ;;  %v638_v47 = vunpack.c.l.bf16 %v654_v35  ;;  %v639_v48 = vunpack.c.h.bf16 %v654_v35  ;;  %v365_v34 = vld [vmem:[%s740_s29] sm:$0xff]  ;;  %v366_v35 = vld [vmem:[%s740_s29 + $0x8] sm:$0xff] }
  0x19   : > { %v294_v49 = vmul.f32 %v578_v3, %v572_v40  ;;  %v295_v50 = vmul.f32 %v579_v4, %v572_v40  ;;  %v296_v51 = vmul.f32 %v582_v5, %v572_v40  ;;  %v297_v52 = vmul.f32 %v583_v6, %v572_v40 }
  0x1a   : > { %v298_v53 = vmul.f32 %v586_v10, %v572_v40  ;;  %v299_v54 = vmul.f32 %v587_v11, %v572_v40  ;;  %v300_v55 = vmul.f32 %v590_v12, %v572_v40  ;;  %v301_v56 = vmul.f32 %v591_v13, %v572_v40 }
  0x1b   : > { %v302_v57 = vmul.f32 %v594_v17, %v572_v40  ;;  %v303_v58 = vmul.f32 %v595_v18, %v572_v40  ;;  %v304_v59 = vmul.f32 %v598_v19, %v572_v40  ;;  %v305_v60 = vmul.f32 %v599_v20, %v572_v40 }
  0x1c   : > { %v306_v61 = vmul.f32 %v602_v24, %v572_v40  ;;  %v307_v62 = vmul.f32 %v603_v25, %v572_v40  ;;  %v308_v63 = vmul.f32 %v606_v26, %v572_v40  ;;  %v309_v0 = vmul.f32 %v607_v27, %v572_v40 }
  0x1d   : > { %v310_v1 = vmul.f32 %v610_v30, %v572_v40  ;;  %v311_v2 = vmul.f32 %v611_v31, %v572_v40  ;;  %v312_v7 = vmul.f32 %v614_v32, %v572_v40  ;;  %v313_v3 = vmul.f32 %v615_v33, %v572_v40 }
  0x1e   : > { %v314_v4 = vmul.f32 %v618_v36, %v572_v40  ;;  %v315_v5 = vmul.f32 %v619_v37, %v572_v40  ;;  %v316_v6 = vmul.f32 %v622_v38, %v572_v40  ;;  %v317_v8 = vmul.f32 %v623_v39, %v572_v40  ;;  %v367_v36 = vld [vmem:[%s740_s29 + $0x10] sm:$0xff]  ;;  %v368_v37 = vld [vmem:[%s740_s29 + $0x18] sm:$0xff] }
  0x1f   : > { %v318_v10 = vmul.f32 %v626_v41, %v572_v40  ;;  %v319_v11 = vmul.f32 %v627_v42, %v572_v40  ;;  %v320_v12 = vmul.f32 %v630_v43, %v572_v40  ;;  %v321_v13 = vmul.f32 %v631_v44, %v572_v40  ;;  %v369_v42 = vld [vmem:[%s740_s29 + $0x20] sm:$0xff]  ;;  %v370_v43 = vld [vmem:[%s740_s29 + $0x28] sm:$0xff]  ;;  %v371_v44 = vld [vmem:[%s740_s29 + $0x30] sm:$0xff] }
  0x20   : > { %v322_v14 = vmul.f32 %v634_v45, %v572_v40  ;;  %v323_v15 = vmul.f32 %v635_v46, %v572_v40  ;;  %v324_v16 = vmul.f32 %v638_v47, %v572_v40  ;;  %v325_v17 = vmul.f32 %v639_v48, %v572_v40  ;;  %v372_v45 = vld [vmem:[%s740_s29 + $0x38] sm:$0xff] }
  0x21   : > { %v333_v18 = vadd.f32 %v573_v9, %v294_v49  ;;  %v334_v19 = vadd.f32 %v573_v9, %v295_v50  ;;  %v335_v20 = vadd.f32 %v573_v9, %v296_v51  ;;  %v336_v21 = vadd.f32 %v573_v9, %v297_v52  ;;  %v373_v50 = vld [vmem:[%s740_s29 + $0x40] sm:$0xff]  ;;  %v374_v51 = vld [vmem:[%s740_s29 + $0x48] sm:$0xff]  ;;  %v375_v52 = vld [vmem:[%s740_s29 + $0x50] sm:$0xff] }
  0x22   : > { %v337_v22 = vadd.f32 %v573_v9, %v298_v53  ;;  %v338_v23 = vadd.f32 %v573_v9, %v299_v54  ;;  %v339_v24 = vadd.f32 %v573_v9, %v300_v55  ;;  %v340_v25 = vadd.f32 %v573_v9, %v301_v56 }
  0x23   : > { %v341_v26 = vadd.f32 %v573_v9, %v302_v57  ;;  %v342_v27 = vadd.f32 %v573_v9, %v303_v58  ;;  %v343_v28 = vadd.f32 %v573_v9, %v304_v59  ;;  %v344_v29 = vadd.f32 %v573_v9, %v305_v60  ;;  %v376_v57 = vld [vmem:[%s740_s29 + $0x58] sm:$0xff]  ;;  %v377_v58 = vld [vmem:[%s740_s29 + $0x60] sm:$0xff]  ;;  %v378_v59 = vld [vmem:[%s740_s29 + $0x68] sm:$0xff] }
  0x24   : > { %v345_v30 = vadd.f32 %v573_v9, %v306_v61  ;;  %v346_v31 = vadd.f32 %v573_v9, %v307_v62  ;;  %v347_v32 = vadd.f32 %v573_v9, %v308_v63  ;;  %v348_v33 = vadd.f32 %v573_v9, %v309_v0  ;;  %v379_v0 = vld [vmem:[%s740_s29 + $0x70] sm:$0xff] }
  0x25   : > { %v349_v38 = vadd.f32 %v573_v9, %v310_v1  ;;  %v350_v39 = vadd.f32 %v573_v9, %v311_v2  ;;  %v351_v40 = vadd.f32 %v573_v9, %v312_v7  ;;  %v352_v41 = vadd.f32 %v573_v9, %v313_v3  ;;  %v380_v1 = vld [vmem:[%s740_s29 + $0x78] sm:$0xff]  ;;  %v381_v2 = vld [vmem:[%s740_s29 + $0x80] sm:$0xff]  ;;  %v382_v7 = vld [vmem:[%s740_s29 + $0x88] sm:$0xff] }
  0x26   : > { %v353_v46 = vadd.f32 %v573_v9, %v314_v4  ;;  %v354_v47 = vadd.f32 %v573_v9, %v315_v5  ;;  %v355_v48 = vadd.f32 %v573_v9, %v316_v6  ;;  %v356_v49 = vadd.f32 %v573_v9, %v317_v8  ;;  %v383_v3 = vld [vmem:[%s740_s29 + $0x90] sm:$0xff]  ;;  %v384_v4 = vld [vmem:[%s740_s29 + $0x98] sm:$0xff] }
  0x27   : > { %v357_v53 = vadd.f32 %v573_v9, %v318_v10  ;;  %v358_v54 = vadd.f32 %v573_v9, %v319_v11  ;;  %v359_v55 = vadd.f32 %v573_v9, %v320_v12  ;;  %v360_v56 = vadd.f32 %v573_v9, %v321_v13  ;;  %v385_v11 = vld [vmem:[%s740_s29 + $0xa0] sm:$0xff]  ;;  %v386_v12 = vld [vmem:[%s740_s29 + $0xa8] sm:$0xff]  ;;  %v387_v13 = vld [vmem:[%s740_s29 + $0xb0] sm:$0xff] }
  0x28   : > { %v361_v60 = vadd.f32 %v573_v9, %v322_v14  ;;  %v362_v61 = vadd.f32 %v573_v9, %v323_v15  ;;  %v363_v62 = vadd.f32 %v573_v9, %v324_v16  ;;  %v364_v63 = vadd.f32 %v573_v9, %v325_v17  ;;  %v388_v17 = vld [vmem:[%s740_s29 + $0xb8] sm:$0xff] }
  0x29   : > { %v397_v5 = vadd.f32 %v365_v34, %v333_v18  ;;  %v398_v6 = vadd.f32 %v366_v35, %v334_v19  ;;  %v399_v8 = vadd.f32 %v367_v36, %v335_v20  ;;  %v400_v10 = vadd.f32 %v368_v37, %v336_v21  ;;  %v389_v18 = vld [vmem:[%s740_s29 + $0xc0] sm:$0xff]  ;;  %v390_v34 = vld [vmem:[%s740_s29 + $0xc8] sm:$0xff]  ;;  %v391_v21 = vld [vmem:[%s740_s29 + $0xd0] sm:$0xff] }
  0x2a   : > { %v401_v9 = vadd.f32 %v369_v42, %v337_v22  ;;  %v402_v14 = vadd.f32 %v370_v43, %v338_v23  ;;  %v403_v15 = vadd.f32 %v371_v44, %v339_v24  ;;  %v404_v16 = vadd.f32 %v372_v45, %v340_v25  ;;  %v392_v37 = vld [vmem:[%s740_s29 + $0xd8] sm:$0xff]  ;;  %v393_v22 = vld [vmem:[%s740_s29 + $0xe0] sm:$0xff]  ;;  %v394_v44 = vld [vmem:[%s740_s29 + $0xe8] sm:$0xff] }
  0x2b   : > { %v405_v19 = vadd.f32 %v373_v50, %v341_v26  ;;  %v406_v35 = vadd.f32 %v374_v51, %v342_v27  ;;  %v407_v20 = vadd.f32 %v375_v52, %v343_v28  ;;  %v408_v36 = vadd.f32 %v376_v57, %v344_v29  ;;  %v395_v25 = vld [vmem:[%s740_s29 + $0xf0] sm:$0xff]  ;;  %v396_v45 = vld [vmem:[%s740_s29 + $0xf8] sm:$0xff] }
  0x2c   : > { %v409_v42 = vadd.f32 %v377_v58, %v345_v30  ;;  %v410_v23 = vadd.f32 %v378_v59, %v346_v31  ;;  %v411_v43 = vadd.f32 %v379_v0, %v347_v32  ;;  %v412_v24 = vadd.f32 %v380_v1, %v348_v33 }
  0x2d   : > { %v413_v26 = vadd.f32 %v381_v2, %v349_v38  ;;  %v414_v50 = vadd.f32 %v382_v7, %v350_v39  ;;  %v415_v27 = vadd.f32 %v383_v3, %v351_v40  ;;  %v416_v51 = vadd.f32 %v384_v4, %v352_v41 }
  0x2e   : > { %v774_v28 = vadd.f32 %v385_v11, %v353_v46  ;;  %v776_v52 = vadd.f32 %v386_v12, %v354_v47  ;;  %v778_v29 = vadd.f32 %v387_v13, %v355_v48  ;;  %v780_v57 = vadd.f32 %v388_v17, %v356_v49 }
  0x2f   : > { %v782_v30 = vadd.f32 %v389_v18, %v357_v53  ;;  %v784_v31 = vadd.f32 %v390_v34, %v358_v54  ;;  %v786_v32 = vadd.f32 %v391_v21, %v359_v55  ;;  %v788_v33 = vadd.f32 %v392_v37, %v360_v56 }
  0x30   : > { %v797_v38 = vadd.f32 %v393_v22, %v361_v60  ;;  %v799_v39 = vadd.f32 %v394_v44, %v362_v61  ;;  %v801_v40 = vadd.f32 %v395_v25, %v363_v62  ;;  %v803_v41 = vadd.f32 %v396_v45, %v364_v63 }
  0x31   : > { %v429_v46 = vmax.f32 %v397_v5, 0.0  ;;  %v430_v47 = vmax.f32 %v398_v6, 0.0  ;;  %v431_v48 = vmax.f32 %v399_v8, 0.0  ;;  %v432_v49 = vmax.f32 %v400_v10, 0.0 }
  0x32   : > { %v433_v53 = vmax.f32 %v401_v9, 0.0  ;;  %v434_v54 = vmax.f32 %v402_v14, 0.0  ;;  %v435_v55 = vmax.f32 %v403_v15, 0.0  ;;  %v436_v56 = vmax.f32 %v404_v16, 0.0 }
  0x33   : > { %v437_v58 = vmax.f32 %v405_v19, 0.0  ;;  %v438_v59 = vmax.f32 %v406_v35, 0.0  ;;  %v439_v60 = vmax.f32 %v407_v20, 0.0  ;;  %v440_v61 = vmax.f32 %v408_v36, 0.0  ;;  %461 = vst [vmem:[%s795_s6] sm:$0xff] %v429_v46  ;;  %462 = vst [vmem:[%s795_s6 + $0x8] sm:$0xff] %v430_v47 }
  0x34   : > { %463 = vst [vmem:[%s795_s6 + $0x10] sm:$0xff] %v431_v48  ;;  %464 = vst [vmem:[%s795_s6 + $0x18] sm:$0xff] %v432_v49  ;;  %v441_v62 = vmax.f32 %v409_v42, 0.0  ;;  %v442_v63 = vmax.f32 %v410_v23, 0.0  ;;  %v443_v0 = vmax.f32 %v411_v43, 0.0  ;;  %v444_v1 = vmax.f32 %v412_v24, 0.0 }
  0x35   : > { %465 = vst [vmem:[%s795_s6 + $0x20] sm:$0xff] %v433_v53  ;;  %466 = vst [vmem:[%s795_s6 + $0x28] sm:$0xff] %v434_v54  ;;  %v445_v2 = vmax.f32 %v413_v26, 0.0  ;;  %v446_v7 = vmax.f32 %v414_v50, 0.0  ;;  %v447_v3 = vmax.f32 %v415_v27, 0.0  ;;  %v448_v4 = vmax.f32 %v416_v51, 0.0 }
  0x36   : > { %467 = vst [vmem:[%s795_s6 + $0x30] sm:$0xff] %v435_v55  ;;  %468 = vst [vmem:[%s795_s6 + $0x38] sm:$0xff] %v436_v56  ;;  %v449_v5 = vmax.f32 %v774_v28, 0.0  ;;  %v450_v6 = vmax.f32 %v776_v52, 0.0  ;;  %v451_v8 = vmax.f32 %v778_v29, 0.0  ;;  %v452_v10 = vmax.f32 %v780_v57, 0.0 }
  0x37   : > { %469 = vst [vmem:[%s795_s6 + $0x40] sm:$0xff] %v437_v58  ;;  %470 = vst [vmem:[%s795_s6 + $0x48] sm:$0xff] %v438_v59  ;;  %v453_v11 = vmax.f32 %v782_v30, 0.0  ;;  %v454_v12 = vmax.f32 %v784_v31, 0.0  ;;  %v455_v13 = vmax.f32 %v786_v32, 0.0  ;;  %v456_v9 = vmax.f32 %v788_v33, 0.0 }
  0x38   : > { %471 = vst [vmem:[%s795_s6 + $0x50] sm:$0xff] %v439_v60  ;;  %472 = vst [vmem:[%s795_s6 + $0x58] sm:$0xff] %v440_v61  ;;  %v457_v14 = vmax.f32 %v797_v38, 0.0  ;;  %v458_v15 = vmax.f32 %v799_v39, 0.0  ;;  %v459_v16 = vmax.f32 %v801_v40, 0.0  ;;  %v460_v17 = vmax.f32 %v803_v41, 0.0 }
  0x39   : > { %473 = vst [vmem:[%s795_s6 + $0x60] sm:$0xff] %v441_v62  ;;  %474 = vst [vmem:[%s795_s6 + $0x68] sm:$0xff] %v442_v63 }
  0x3a   : > { %475 = vst [vmem:[%s795_s6 + $0x70] sm:$0xff] %v443_v0  ;;  %476 = vst [vmem:[%s795_s6 + $0x78] sm:$0xff] %v444_v1 }
  0x3b   : > { %477 = vst [vmem:[%s795_s6 + $0x80] sm:$0xff] %v445_v2  ;;  %478 = vst [vmem:[%s795_s6 + $0x88] sm:$0xff] %v446_v7 }
  0x3c   : > { %479 = vst [vmem:[%s795_s6 + $0x90] sm:$0xff] %v447_v3  ;;  %480 = vst [vmem:[%s795_s6 + $0x98] sm:$0xff] %v448_v4 }
  0x3d   : > { %481 = vst [vmem:[%s795_s6 + $0xa0] sm:$0xff] %v449_v5  ;;  %482 = vst [vmem:[%s795_s6 + $0xa8] sm:$0xff] %v450_v6 }
  0x3e   : > { %483 = vst [vmem:[%s795_s6 + $0xb0] sm:$0xff] %v451_v8  ;;  %484 = vst [vmem:[%s795_s6 + $0xb8] sm:$0xff] %v452_v10 }
  0x3f   : > { %485 = vst [vmem:[%s795_s6 + $0xc0] sm:$0xff] %v453_v11  ;;  %486 = vst [vmem:[%s795_s6 + $0xc8] sm:$0xff] %v454_v12 }
  0x40   : > { %487 = vst [vmem:[%s795_s6 + $0xd0] sm:$0xff] %v455_v13  ;;  %488 = vst [vmem:[%s795_s6 + $0xd8] sm:$0xff] %v456_v9 }
  0x41   : > { %489 = vst [vmem:[%s795_s6 + $0xe0] sm:$0xff] %v457_v14  ;;  %490 = vst [vmem:[%s795_s6 + $0xe8] sm:$0xff] %v458_v15 }
  0x42   : > { %491 = vst [vmem:[%s795_s6 + $0xf0] sm:$0xff] %v459_v16  ;;  %492 = vst [vmem:[%s795_s6 + $0xf8] sm:$0xff] %v460_v17 }
  0x43 PF: > { %s14_s15 = sadd.s32 1, %s669_s15  }
  0x44   : > { %p11_p4 = scmp.ge.s32.totalorder %s14_s15, 4  }
  0x46   :  { %13 = sbr.rel (!%p11_p4) target bundleno = 1 (0x1), region = 69 }

// kernel: bottleneck_forward.5
= control target key start
LH: loop header
LB: loop body
LE: loop exit
PB: predicated region body
PF: predicated region fallthrough
CT: control target
= control target key end

     0   :  { %s4198_s21 = smov 0   ;;  %s5365_s0 = inlined_call_operand.vmem [shape: bf16[2,16,16,128], index: 0, kind: input, shape index: {}]   ;;  %s5366_s1 = inlined_call_operand.vmem [shape: f32[1,128], index: 1, kind: input, shape index: {}]   ;;  %s5367_s2 = inlined_call_operand.vmem [shape: f32[1,128], index: 2, kind: input, shape index: {}]   ;;  %s5368_s3 = inlined_call_operand.vmem [shape: bf16[3,384,128], index: 3, kind: input, shape index: {}]   ;;  %s5369_s4 = inlined_call_operand.vmem [shape: bf16[2,16,16,128], index: 4, kind: output, shape index: {0}]   ;;  %s5370_s5 = inlined_call_operand.vmem [shape: f32[2,1,128], index: 5, kind: output, shape index: {1}]   ;;  %s5371_s6 = inlined_call_operand.vmem [shape: f32[2,1,128], index: 6, kind: output, shape index: {2}]  }
   0x1 LB: > { %s2924_s22 = sadd.s32 4294967295, %s4160_s21   ;;  %p2928_p0 = scmp.ge.s32.totalorder %s4160_s21, 1  ;;  %s4160_s21 = sphi %s4198_s21, %s17_s21  }
   0x2   : > { %p217_p1 = scmp.lt.s32.totalorder %s4160_s21, 3 }
   0x4   : > { %p218_p2 = pnand %p2928_p0, %p217_p1 }
   0x6   : > { %221 = sbr.rel (%p218_p2) target bundleno = 590 (0x24e), region = 36 }
   0xd   : > { %v4082_v0 = vld [vmem:[%s5368_s3 + $0x100] sm:$0xff]   ;;  %v4085_v3 = vld [vmem:[%s5368_s3 + $0x108] sm:$0xff]   ;;  %v4088_v6 = vld [vmem:[%s5368_s3 + $0x110] sm:$0xff]   ;;  %p253_p3 = scmp.lt.s32.totalorder %s2924_s22, 1  ;;  %vm613_vm0 = vcmask 1040384   ;;  %v4162_v24 = vmov 0  }
   0xe   : > { %v4212_v1 = vld [vmem:[%s5368_s3 + $0x140] sm:$0xff]   ;;  %3345 = vmatprep.subr.bf16.mxu0 %v4082_v0  ;;  %v4225_v4 = vld [vmem:[%s5368_s3 + $0x148] sm:$0xff]   ;;  %v4237_v7 = vld [vmem:[%s5368_s3 + $0x150] sm:$0xff]   ;;  %v463_v25 = vrot.slane %v4162_v24, 7  ;;  %vm614_vm1 = vsmask.f32 256 }
   0xf   : > { %v4084_v2 = vld [vmem:[%s5368_s3 + $0xc0] sm:$0xff]   ;;  %3897 = vmatprep.subr.bf16.mxu1 %v4212_v1  ;;  %v4087_v5 = vld [vmem:[%s5368_s3 + $0xc8] sm:$0xff]   ;;  %v4090_v8 = vld [vmem:[%s5368_s3 + $0xd0] sm:$0xff]   ;;  %s5398_s22 = smov (!%p253_p3, %s2924_s22), 1  ;;  %vm891_vm3 = vcmask 1046528  }
  0x10   : > { %3346 = vmatpush3.bf16.msra.mxu0 %v4084_v2  ;;  %3905 = vmatpush3.bf16.msra.mxu1 %v4212_v1  ;;  %v4091_v9 = vld [vmem:[%s5368_s3 + $0x118] sm:$0xff]   ;;  %v4094_v12 = vld [vmem:[%s5368_s3 + $0x120] sm:$0xff]   ;;  %v4097_v15 = vld [vmem:[%s5368_s3 + $0x128] sm:$0xff]   ;;  %s3137_s11 = sshll.u32 %s5398_s22, 7  ;;  %vm650_vm4 = vsmask.f32 7424  ;;  %s265_s7 = scalar_lea.vmem %s5370_s5, %s5398_s22 }
  0x11   : > { %3347 = vmatprep.subr.bf16.mxu0 %v4085_v3  ;;  %3898 = vmatprep.subr.bf16.mxu1 %v4225_v4  ;;  %v4250_v10 = vld [vmem:[%s5368_s3 + $0x158] sm:$0xff]   ;;  %v4265_v13 = vld [vmem:[%s5368_s3 + $0x160] sm:$0xff]   ;;  %v4282_v16 = vld [vmem:[%s5368_s3 + $0x168] sm:$0xff]   ;;  %s4303_s20 = scalar_lea.vmem %s5365_s0, %s3137_s11  ;;  %s5289_s30 = scalar_lea.vmem %s5369_s4, %s3137_s11 }
  0x12   : > { %v4093_v11 = vld [vmem:[%s5368_s3 + $0xd8] sm:$0xff]   ;;  %v4096_v14 = vld [vmem:[%s5368_s3 + $0xe0] sm:$0xff]   ;;  %v4099_v17 = vld [vmem:[%s5368_s3 + $0xe8] sm:$0xff]   ;;  %s268_s10 = scalar_lea.vmem %s5371_s6, %s5398_s22 }
  0x13   : > { %v4100_v18 = vld [vmem:[%s5368_s3 + $0x130] sm:$0xff]   ;;  %v4103_v21 = vld [vmem:[%s5368_s3 + $0x138] sm:$0xff]   ;;  %v4315_v22 = vld [vmem:[%s5366_s1] ss:$0 sm:$0xff] }
  0x14   : > { %3348 = vmatpush3.bf16.msra.mxu0 %v4087_v5  ;;  %3906 = vmatpush3.bf16.msra.mxu1 %v4225_v4  ;;  %v4296_v19 = vld [vmem:[%s5368_s3 + $0x170] sm:$0xff]   ;;  %v3172_v23 = vld [vmem:[%s4303_s20] sm:$0xff]   ;;  %v4322_v26 = vld [vmem:[%s5368_s3 + $0x178] sm:$0xff]  }
  0x15   : > { %3349 = vmatprep.subr.bf16.mxu0 %v4088_v6  ;;  %3899 = vmatprep.subr.bf16.mxu1 %v4237_v7  ;;  %v4102_v20 = vld [vmem:[%s5368_s3 + $0xf0] sm:$0xff]   ;;  %v3173_v27 = vunpack.c.l.bf16 %v3172_v23  ;;  %v3174_v28 = vunpack.c.h.bf16 %v3172_v23  ;;  %v3322_v29 = vld [vmem:[%s4303_s20 + $0x40] sm:$0xff]   ;;  %v3323_v30 = vld [vmem:[%s4303_s20 + $0x48] sm:$0xff]  }
  0x16   : > { %v4329_v31 = vld [vmem:[%s5367_s2] ss:$0 sm:$0xff]  ;;  %v3205_v32 = vunpack.c.l.bf16 %v3322_v29  ;;  %v3206_v33 = vunpack.c.h.bf16 %v3322_v29  ;;  %v3209_v34 = vunpack.c.l.bf16 %v3323_v30  ;;  %v3210_v35 = vunpack.c.h.bf16 %v3323_v30  ;;  %vm4334_vm2 = vmand %vm613_vm0, %vm614_vm1  ;;  %v4105_v39 = vld [vmem:[%s5368_s3 + $0xf8] sm:$0xff]  }
  0x17   : > { %v342_v36 = vmul.f32 %v3173_v27, %v4315_v22  ;;  %v343_v37 = vmul.f32 %v3174_v28, %v4315_v22  ;;  %v4347_v43 = vsel %vm4334_vm2, 0, %v463_v25  ;;  %v4106_v47 = vld [vmem:[%s5368_s3 + $0x40] sm:$0xff]   ;;  %v4358_v48 = vsel %vm4334_vm2, %v463_v25, 0  ;;  %v3315_v52 = vld [vmem:[%s4303_s20 + $0x8] sm:$0xff]   ;;  %v3324_v53 = vld [vmem:[%s4303_s20 + $0x50] sm:$0xff]  }
  0x18   : > { %3350 = vmatpush3.bf16.msra.mxu0 %v4090_v8  ;;  %3907 = vmatpush3.bf16.msra.mxu1 %v4237_v7  ;;  %v358_v40 = vmul.f32 %v3205_v32, %v4315_v22  ;;  %v359_v41 = vmul.f32 %v3206_v33, %v4315_v22  ;;  %v360_v42 = vmul.f32 %v3209_v34, %v4315_v22  ;;  %v652_v54 = vshrl.u32 %v4347_v43, 16  ;;  %v4368_v59 = vld [vmem:[%s4303_s20 + $0x58] sm:$0xff]   ;;  %v4126_v38 = vld [vmem:[%s5368_s3 + $0xa0] sm:$0xff]  }
  0x19   : > { %3351 = vmatprep.subr.bf16.mxu0 %v4091_v9  ;;  %3900 = vmatprep.subr.bf16.mxu1 %v4250_v10  ;;  %v380_v44 = vadd.f32 %v4329_v31, %v342_v36  ;;  %v381_v45 = vadd.f32 %v4329_v31, %v343_v37  ;;  %v361_v46 = vmul.f32 %v3210_v35, %v4315_v22  ;;  %v3177_v58 = vunpack.c.l.bf16 %v3315_v52 }
  0x1a   : > { %v396_v49 = vadd.f32 %v4329_v31, %v358_v40  ;;  %v397_v50 = vadd.f32 %v4329_v31, %v359_v41  ;;  %v398_v51 = vadd.f32 %v4329_v31, %v360_v42  ;;  %v3178_v63 = vunpack.c.h.bf16 %v3315_v52 }
  0x1b   : > { %v412_v55 = vmax.f32 %v380_v44, 0.0  ;;  %v413_v56 = vmax.f32 %v381_v45, 0.0  ;;  %v399_v57 = vadd.f32 %v4329_v31, %v361_v46  ;;  %v344_v3 = vmul.f32 %v3177_v58, %v4315_v22  ;;  %v4108_v58 = vld [vmem:[%s5368_s3 + $0x48] sm:$0xff]  }
  0x1c   : > { %3352 = vmatpush3.bf16.msra.mxu0 %v4093_v11  ;;  %3908 = vmatpush3.bf16.msra.mxu1 %v4250_v10  ;;  %v428_v60 = vmax.f32 %v396_v49, 0.0  ;;  %v429_v61 = vmax.f32 %v397_v50, 0.0  ;;  %v430_v62 = vmax.f32 %v398_v51, 0.0  ;;  %v3213_v5 = vunpack.c.l.bf16 %v3324_v53 }
  0x1d   : > { %3353 = vmatprep.subr.bf16.mxu0 %v4094_v12  ;;  %3901 = vmatprep.subr.bf16.mxu1 %v4265_v13  ;;  %v444_v0 = vpack.c.bf16 %v413_v56, %v412_v55  ;;  %v431_v2 = vmax.f32 %v399_v57, 0.0  ;;  %v345_v8 = vmul.f32 %v3178_v63, %v4315_v22  ;;  %v3214_v9 = vunpack.c.h.bf16 %v3324_v53  ;;  %v4107_v57 = vld [vmem:[%s5368_s3] sm:$0xff]  }
  0x1e   : > { %v452_v6 = vpack.c.bf16 %v429_v61, %v428_v60  ;;  %v3217_v11 = vunpack.c.l.bf16 %v4368_v59  ;;  %v362_v23 = vmul.f32 %v3213_v5, %v4315_v22  ;;  %v3218_v37 = vunpack.c.h.bf16 %v4368_v59 }
  0x1f   : > { %v468_v12 = vshrl.u32 %v444_v0, 16  ;;  %v363_v32 = vmul.f32 %v3214_v9, %v4315_v22 }
  0x20   : > { %3354 = vmatpush3.bf16.msra.mxu0 %v4096_v14  ;;  %3909 = vmatpush3.bf16.msra.mxu1 %v4265_v13  ;;  %v471_v14 = vshll.u32 %v444_v0, 16  ;;  %v400_v33 = vadd.f32 %v4329_v31, %v362_v23  ;;  %v3316_v0 = vld [vmem:[%s4303_s20 + $0x10] sm:$0xff]  }
  0x21   : > { %3355 = vmatprep.subr.bf16.mxu0 %v4097_v15  ;;  %3902 = vmatprep.subr.bf16.mxu1 %v4282_v16  ;;  %v453_v15 = vpack.c.bf16 %v431_v2, %v430_v62  ;;  %v470_v24 = vrot.slane %v468_v12, 7  ;;  %v401_v63 = vadd.f32 %v4329_v31, %v363_v32 }
  0x22   : > { %v432_v5 = vmax.f32 %v400_v33, 0.0  ;;  %v3182_v33 = vunpack.c.h.bf16 %v3316_v0 }
  0x23   : > { %v531_v25 = vshrl.u32 %v453_v15, 16  ;;  %v534_v27 = vshll.u32 %v453_v15, 16  ;;  %v473_v34 = vor.u32 %v471_v14, %v470_v24  ;;  %v4382_v35 = vsel %vm4334_vm2, %v470_v24, 0  ;;  %v4109_v15 = vld [vmem:[%s5368_s3 + $0x8] sm:$0xff]  }
  0x24   : > { %3356 = vmatpush3.bf16.msra.mxu0 %v4099_v17  ;;  %3910 = vmatpush3.bf16.msra.mxu1 %v4282_v16  ;;  %v382_v17 = vadd.f32 %v4329_v31, %v344_v3  ;;  %v433_v12 = vmax.f32 %v401_v63, 0.0  ;;  %v365_v14 = vmul.f32 %v3218_v37, %v4315_v22 }
  0x25   : > { %3357 = vmatprep.subr.bf16.mxu0 %v4100_v18  ;;  %3903 = vmatprep.subr.bf16.mxu1 %v4296_v19  ;;  %v524_v18 = vshrl.u32 %v452_v6, 16  ;;  %v533_v36 = vrot.slane %v531_v25, 7  ;;  %v4392_v44 = vsel %vm4334_vm2, 0, %v473_v34  ;;  %v4110_v25 = vld [vmem:[%s5368_s3 + $0x50] sm:$0xff]  }
  0x26   : > { %v414_v28 = vmax.f32 %v382_v17, 0.0  ;;  %v664_v49 = vshrl.u32 %v4392_v44, 16  ;;  %v666_v50 = vshll.u32 %v4392_v44, 16  ;;  %v454_v24 = vpack.c.bf16 %v433_v12, %v432_v5  ;;  %v3317_v5 = vld [vmem:[%s4303_s20 + $0x18] sm:$0xff]  }
  0x27   : > { %v526_v29 = vrot.slane %v524_v18, 7  ;;  %v536_v46 = vor.u32 %v534_v27, %v533_v36  ;;  %v3326_v27 = vld [vmem:[%s4303_s20 + $0x60] sm:$0xff]  }
  0x28   : > { %3358 = vmatpush3.bf16.msra.mxu0 %v4102_v20  ;;  %3911 = vmatpush3.bf16.msra.mxu1 %v4296_v19  ;;  %v527_v20 = vshll.u32 %v452_v6, 16  ;;  %v668_v60 = vrot.slane %v666_v50, 1  ;;  %v364_v6 = vmul.f32 %v3217_v11, %v4315_v22 }
  0x29   : > { %3359 = vmatprep.subr.bf16.mxu0 %v4103_v21  ;;  %3904 = vmatprep.subr.bf16.mxu1 %v4322_v26  ;;  %v383_v21 = vadd.f32 %v4329_v31, %v345_v8  ;;  %v4388_v41 = vsel %vm4334_vm2, %v526_v29, 0  ;;  %v4408_v55 = vsel %vm4334_vm2, 0, %v536_v46 }
  0x2a   : > { %v529_v40 = vor.u32 %v527_v20, %v526_v29  ;;  %v920_v45 = vrot.slane %v4388_v41, 1  ;;  %v922_v61 = vrot.slane %v4408_v55, 1  ;;  %v669_v8 = vor.u32 %v668_v60, %v664_v49 }
  0x2b   : > { %v415_v30 = vmax.f32 %v383_v21, 0.0  ;;  %v402_v18 = vadd.f32 %v4329_v31, %v364_v6  ;;  %v3181_v20 = vunpack.c.l.bf16 %v3316_v0  ;;  %v347_v49 = vmul.f32 %v3182_v33, %v4315_v22 }
  0x2c   : > { %3360 = vmatpush3.bf16.msra.mxu0 %v4105_v39  ;;  %3912 = vmatpush3.bf16.msra.mxu1 %v4322_v26  ;;  %v671_v39 = vshll.u32 %v4382_v35, 16  ;;  %v4403_v52 = vsel %vm4334_vm2, 0, %v529_v40  ;;  %v4457_v40 = vld [vmem:[%s4303_s20 + $0x68] sm:$0xff]  }
  0x2d   : > { %3753 = vmatprep.subr.bf16.mxu0 %v4212_v1  ;;  %3481 = vmatprep.subr.bf16.mxu1 %v4106_v47  ;;  %v445_v42 = vpack.c.bf16 %v415_v30, %v414_v28  ;;  %v4397_v47 = vsel %vm4334_vm2, %v533_v36, 0  ;;  %v919_v53 = vrot.slane %v4403_v52, 1  ;;  %v654_v28 = vshll.u32 %v4347_v43, 16 }
  0x2e   : > { %v673_v51 = vrot.slane %v671_v39, 1  ;;  %v923_v56 = vrot.slane %v4397_v47, 1  ;;  %v403_v30 = vadd.f32 %v4329_v31, %v365_v14  ;;  %v434_v32 = vmax.f32 %v402_v18, 0.0  ;;  %v4113_v18 = vld [vmem:[%s5368_s3 + $0x18] sm:$0xff]  }
  0x2f   : > { %v475_v59 = vshrl.u32 %v445_v42, 16  ;;  %v478_v62 = vshll.u32 %v445_v42, 16  ;;  %v4421_v2 = vsel %vm891_vm3, %v919_v53, %v920_v45  ;;  %v538_v39 = vshrl.u32 %v454_v24, 16  ;;  %v4111_v53 = vld [vmem:[%s5368_s3 + $0x10] sm:$0xff]  }
  0x30   : > { %3785 = vmatprep.mubr.bf16.mxu1 %v4421_v2  ;;  %v4426_v9 = vsel %vm891_vm3, %v922_v61, %v923_v56  ;;  %v4439_v21 = vsel %vm650_vm4, %v669_v8, %v673_v51  ;;  %v541_v42 = vshll.u32 %v454_v24, 16  ;;  %v435_v45 = vmax.f32 %v403_v30, 0.0  ;;  %v4112_v56 = vld [vmem:[%s5368_s3 + $0x58] sm:$0xff]  }
  0x31   : > { %v477_v3 = vrot.slane %v475_v59, 7  ;;  %3786 = vmatmul.mubr.bf16.vlgmr.msra.gmra.mrb[0].mxu1 %v4426_v9  ;;  %1248 = vmatprep.mubr.bf16.mxu0 %v4439_v21  ;;  %v346_v46 = vmul.f32 %v3181_v20, %v4315_v22  ;;  %v540_v51 = vrot.slane %v538_v39, 7  ;;  %v385_v60 = vadd.f32 %v4329_v31, %v347_v49  ;;  %v4506_v39 = vld [vmem:[%s4303_s20 + $0x70] sm:$0xff]  }
  0x32   : > { %3482 = vmatpush3.bf16.msra.mxu1 %v4107_v57  ;;  %1249 = vmatmul.mubr.bf16.vlgmr.msra.gmra.mrb[0].mxu0 %v4392_v44  ;;  %v3221_v57 = vunpack.c.l.bf16 %v3326_v27  ;;  %v3225_v61 = vunpack.c.l.bf16 %v4457_v40  ;;  %v3226_v30 = vunpack.c.h.bf16 %v4457_v40 }
  0x33   : > { %v480_v17 = vor.u32 %v478_v62, %v477_v3  ;;  %v4435_v11 = vsel %vm4334_vm2, %v477_v3, 0  ;;  %3483 = vmatprep.subr.bf16.mxu1 %v4108_v58  ;;  %3754 = vmatpush3.bf16.msra.mxu0 %v4212_v1  ;;  %v3222_v1 = vunpack.c.h.bf16 %v3326_v27  ;;  %v455_v58 = vpack.c.bf16 %v435_v45, %v434_v32 }
  0x34   : > { %v683_v23 = vshll.u32 %v4435_v11, 16  ;;  %3755 = vmatprep.subr.bf16.mxu0 %v4225_v4  ;;  %v384_v59 = vadd.f32 %v4329_v31, %v346_v46  ;;  %v543_v63 = vor.u32 %v541_v42, %v540_v51  ;;  %v4474_v0 = vsel %vm4334_vm2, %v540_v51, 0 }
  0x35   : > { %v4450_v29 = vsel %vm4334_vm2, 0, %v480_v17  ;;  %v366_v3 = vmul.f32 %v3221_v57, %v4315_v22  ;;  %v926_v6 = vrot.slane %v4474_v0, 1  ;;  %v545_v8 = vshrl.u32 %v455_v58, 16 }
  0x36   : > { %v676_v34 = vshrl.u32 %v4450_v29, 16  ;;  %v678_v36 = vshll.u32 %v4450_v29, 16  ;;  %v685_v37 = vrot.slane %v683_v23, 1  ;;  %3484 = vmatpush3.bf16.msra.mxu1 %v4109_v15  ;;  %v548_v12 = vshll.u32 %v455_v58, 16 }
  0x37   : > { %3485 = vmatprep.subr.bf16.mxu1 %v4110_v25  ;;  %v416_v14 = vmax.f32 %v384_v59, 0.0  ;;  %3756 = vmatpush3.bf16.msra.mxu0 %v4225_v4  ;;  %v4485_v17 = vsel %vm4334_vm2, 0, %v543_v63  ;;  %v417_v20 = vmax.f32 %v385_v60, 0.0  ;;  %v367_v23 = vmul.f32 %v3222_v1, %v4315_v22  ;;  %v4114_v4 = vld [vmem:[%s5368_s3 + $0x60] sm:$0xff]  }
  0x38   : > { %v680_v50 = vrot.slane %v678_v36, 1  ;;  %3757 = vmatprep.subr.bf16.mxu0 %v4237_v7  ;;  %v925_v24 = vrot.slane %v4485_v17, 1  ;;  %v547_v25 = vrot.slane %v545_v8, 7  ;;  %v404_v27 = vadd.f32 %v4329_v31, %v366_v3  ;;  %v4115_v36 = vld [vmem:[%s5368_s3 + $0x20] sm:$0xff]  }
  0x39   : > { %v446_v32 = vpack.c.bf16 %v417_v20, %v416_v14  ;;  %v405_v33 = vadd.f32 %v4329_v31, %v367_v23  ;;  %v369_v57 = vmul.f32 %v3226_v30, %v4315_v22  ;;  %v3186_v58 = vunpack.c.h.bf16 %v3317_v5 }
  0x3a   : > { %v681_v62 = vor.u32 %v680_v50, %v676_v34  ;;  %3486 = vmatpush3.bf16.msra.mxu1 %v4111_v53  ;;  %v368_v34 = vmul.f32 %v3225_v61, %v4315_v22  ;;  %v4509_v42 = vsel %vm891_vm3, %v925_v24, %v926_v6  ;;  %v550_v45 = vor.u32 %v548_v12, %v547_v25  ;;  %v4117_v6 = vld [vmem:[%s5368_s3 + $0x28] sm:$0xff]  }
  0x3b   : > { %3487 = vmatprep.subr.bf16.mxu1 %v4112_v56  ;;  %v4513_v40 = vsel %vm4334_vm2, %v547_v25, 0  ;;  %v436_v46 = vmax.f32 %v404_v27, 0.0  ;;  %3758 = vmatpush3.bf16.msra.mxu0 %v4237_v7  ;;  %v482_v50 = vshrl.u32 %v446_v32, 16  ;;  %v485_v51 = vshll.u32 %v446_v32, 16  ;;  %v4116_v7 = vld [vmem:[%s5368_s3 + $0x68] sm:$0xff]   ;;  %v4118_v25 = vld [vmem:[%s5368_s3 + $0x70] sm:$0xff]  }
  0x3c   : > { %v4481_v15 = vsel %vm650_vm4, %v681_v62, %v685_v37  ;;  %v3185_v37 = vunpack.c.l.bf16 %v3317_v5  ;;  %3789 = vmatprep.mubr.bf16.mxu1 %v4509_v42  ;;  %v929_v49 = vrot.slane %v4513_v40, 1  ;;  %v437_v53 = vmax.f32 %v405_v33, 0.0  ;;  %3759 = vmatprep.subr.bf16.mxu0 %v4250_v10 }
  0x3d   : > { %1256 = vmatprep.mubr.bf16.mxu0 %v4481_v15  ;;  %v4520_v56 = vsel %vm4334_vm2, 0, %v550_v45  ;;  %v406_v1 = vadd.f32 %v4329_v31, %v368_v34  ;;  %v484_v60 = vrot.slane %v482_v50, 7  ;;  %v407_v63 = vadd.f32 %v4329_v31, %v369_v57  ;;  %v3329_v34 = vld [vmem:[%s4303_s20 + $0x78] sm:$0xff]  }
  0x3e   : > { %1257 = vmatmul.mubr.bf16.gmra.mrb[4].mxu0 %v4450_v29  ;;  %3488 = vmatpush3.bf16.msra.mxu1 %v4113_v18  ;;  %v928_v59 = vrot.slane %v4520_v56, 1  ;;  %v456_v61 = vpack.c.bf16 %v437_v53, %v436_v46  ;;  %v348_v62 = vmul.f32 %v3185_v37, %v4315_v22  ;;  %v349_v8 = vmul.f32 %v3186_v58, %v4315_v22  ;;  %v4120_v57 = vld [vmem:[%s5368_s3 + $0x78] sm:$0xff]  }
  0x3f   : > { %3489 = vmatprep.subr.bf16.mxu1 %v4114_v4  ;;  %v438_v3 = vmax.f32 %v406_v1, 0.0  ;;  %v3229_v12 = vunpack.c.l.bf16 %v4506_v39  ;;  %3760 = vmatpush3.bf16.msra.mxu0 %v4250_v10  ;;  %v487_v14 = vor.u32 %v485_v51, %v484_v60  ;;  %v4542_v18 = vsel %vm4334_vm2, %v484_v60, 0 }
  0x40   : > { %v4538_v5 = vsel %vm891_vm3, %v928_v59, %v929_v49  ;;  %v552_v20 = vshrl.u32 %v456_v61, 16  ;;  %3761 = vmatprep.subr.bf16.mxu0 %v4265_v13  ;;  %v695_v23 = vshll.u32 %v4542_v18, 16  ;;  %v555_v4 = vshll.u32 %v456_v61, 16  ;;  %v4119_v49 = vld [vmem:[%s5368_s3 + $0x30] sm:$0xff]  }
  0x41   : > { %5383 = vst [vmem:[#allocation2_spill] sm:$0xff] %v4538_v5  ;;  %3790 = vmatmul.mubr.bf16.gmra.mrb[4].mxu1 %v4538_v5  ;;  %v439_v24 = vmax.f32 %v407_v63, 0.0  ;;  %v386_v10 = vadd.f32 %v4329_v31, %v348_v62  ;;  %v4553_v27 = vsel %vm4334_vm2, 0, %v487_v14  ;;  %v387_v32 = vadd.f32 %v4329_v31, %v349_v8 }
  0x42   : > { %3490 = vmatpush3.bf16.msra.mxu1 %v4115_v36  ;;  %v554_v30 = vrot.slane %v552_v20, 7  ;;  %v3230_v33 = vunpack.c.h.bf16 %v4506_v39  ;;  %v688_v36 = vshrl.u32 %v4553_v27, 16  ;;  %v690_v37 = vshll.u32 %v4553_v27, 16 }
  0x43   : > { %3491 = vmatprep.subr.bf16.mxu1 %v4116_v7  ;;  %v697_v45 = vrot.slane %v695_v23, 1  ;;  %v457_v46 = vpack.c.bf16 %v439_v24, %v438_v3  ;;  %3762 = vmatpush3.bf16.msra.mxu0 %v4265_v13  ;;  %v418_v39 = vmax.f32 %v386_v10, 0.0  ;;  %v419_v53 = vmax.f32 %v387_v32, 0.0  ;;  %v3318_v24 = vld [vmem:[%s4303_s20 + $0x20] sm:$0xff]  }
  0x44   : > { %v557_v50 = vor.u32 %v555_v4, %v554_v30  ;;  %v4566_v51 = vsel %vm4334_vm2, %v554_v30, 0  ;;  %3763 = vmatprep.subr.bf16.mxu0 %v4282_v16  ;;  %v692_v1 = vrot.slane %v690_v37, 1  ;;  %v370_v61 = vmul.f32 %v3229_v12, %v4315_v22  ;;  %v4121_v12 = vld [vmem:[%s5368_s3 + $0x38] sm:$0xff]   ;;  %v4601_v32 = vld [vmem:[%s5368_s3 + $0x80] sm:$0xff]  }
  0x45   : > { %v932_v7 = vrot.slane %v4566_v51, 1  ;;  %v559_v58 = vshrl.u32 %v457_v46, 16  ;;  %v562_v59 = vshll.u32 %v457_v46, 16  ;;  %v447_v60 = vpack.c.bf16 %v419_v53, %v418_v39 }
  0x46   : > { %3492 = vmatpush3.bf16.msra.mxu1 %v4117_v6  ;;  %v4575_v13 = vsel %vm4334_vm2, 0, %v557_v50  ;;  %v371_v62 = vmul.f32 %v3230_v33, %v4315_v22  ;;  %v693_v63 = vor.u32 %v692_v1, %v688_v36  ;;  %v3233_v8 = vunpack.c.l.bf16 %v3329_v34 }
  0x47   : > { %3493 = vmatprep.subr.bf16.mxu1 %v4118_v25  ;;  %v931_v3 = vrot.slane %v4575_v13, 1  ;;  %v561_v6 = vrot.slane %v559_v58, 7  ;;  %3764 = vmatpush3.bf16.msra.mxu0 %v4282_v16  ;;  %v489_v14 = vshrl.u32 %v447_v60, 16  ;;  %v492_v20 = vshll.u32 %v447_v60, 16 }
  0x48   : > { %v408_v23 = vadd.f32 %v4329_v31, %v370_v61  ;;  %v409_v4 = vadd.f32 %v4329_v31, %v371_v62  ;;  %3765 = vmatprep.subr.bf16.mxu0 %v4296_v19  ;;  %v4589_v10 = vsel %vm650_vm4, %v693_v63, %v697_v45  ;;  %v372_v50 = vmul.f32 %v3233_v8, %v4315_v22  ;;  %v4129_v61 = vld [vmem:[%s5368_s3 + $0x1c0] sm:$0xff]  }
  0x49   : > { %v4592_v25 = vsel %vm891_vm3, %v931_v3, %v932_v7  ;;  %v564_v16 = vor.u32 %v562_v59, %v561_v6  ;;  %v4596_v30 = vsel %vm4334_vm2, %v561_v6, 0  ;;  %1264 = vmatprep.mubr.bf16.mxu0 %v4589_v10  ;;  %v491_v36 = vrot.slane %v489_v14, 7 }
  0x4a   : > { %3494 = vmatpush3.bf16.msra.mxu1 %v4119_v49  ;;  %5384 = vst [vmem:[#allocation3_spill] sm:$0xff] %v4592_v25  ;;  %3793 = vmatprep.mubr.bf16.mxu1 %v4592_v25  ;;  %v935_v33 = vrot.slane %v4596_v30, 1  ;;  %v440_v37 = vmax.f32 %v408_v23, 0.0  ;;  %v441_v45 = vmax.f32 %v409_v4, 0.0  ;;  %v3234_v49 = vunpack.c.h.bf16 %v3329_v34 }
  0x4b   : > { %3495 = vmatprep.subr.bf16.mxu1 %v4120_v57  ;;  %1265 = vmatmul.mubr.bf16.gmra.mrb[8].mxu0 %v4553_v27  ;;  %v4609_v46 = vsel %vm4334_vm2, 0, %v564_v16  ;;  %v3189_v39 = vunpack.c.l.bf16 %v3318_v24  ;;  %v494_v57 = vor.u32 %v492_v20, %v491_v36  ;;  %v4615_v1 = vsel %vm4334_vm2, %v491_v36, 0 }
  0x4c   : > { %v934_v53 = vrot.slane %v4609_v46, 1  ;;  %v458_v7 = vpack.c.bf16 %v441_v45, %v440_v37  ;;  %3766 = vmatpush3.bf16.msra.mxu0 %v4296_v19  ;;  %v707_v58 = vshll.u32 %v4615_v1, 16  ;;  %v373_v59 = vmul.f32 %v3234_v49, %v4315_v22 }
  0x4d   : > { %v410_v34 = vadd.f32 %v4329_v31, %v372_v50  ;;  %v3190_v60 = vunpack.c.h.bf16 %v3318_v24  ;;  %3767 = vmatprep.subr.bf16.mxu0 %v4322_v26  ;;  %v4631_v19 = vsel %vm4334_vm2, 0, %v494_v57  ;;  %v656_v36 = vrot.slane %v654_v28, 1 }
  0x4e   : > { %3496 = vmatpush3.bf16.msra.mxu1 %v4121_v12  ;;  %v4627_v62 = vsel %vm891_vm3, %v934_v53, %v935_v33  ;;  %v566_v63 = vshrl.u32 %v458_v7, 16  ;;  %v569_v3 = vshll.u32 %v458_v7, 16  ;;  %v700_v6 = vshrl.u32 %v4631_v19, 16  ;;  %v3319_v53 = vld [vmem:[%s4303_s20 + $0x28] sm:$0xff]  }
  0x4f   : > { %3801 = vmatprep.subr.bf16.mxu1 %v4601_v32  ;;  %5385 = vst [vmem:[#allocation4_spill] sm:$0xff] %v4627_v62  ;;  %3794 = vmatmul.mubr.bf16.gmra.mrb[8].mxu1 %v4627_v62  ;;  %v702_v8 = vshll.u32 %v4631_v19, 16  ;;  %v709_v14 = vrot.slane %v707_v58, 1  ;;  %v411_v20 = vadd.f32 %v4329_v31, %v373_v59  ;;  %v442_v4 = vmax.f32 %v410_v34, 0.0  ;;  %v3320_v58 = vld [vmem:[%s4303_s20 + $0x30] sm:$0xff]  }
  0x50   : > { %v568_v23 = vrot.slane %v566_v63, 7  ;;  %v350_v12 = vmul.f32 %v3189_v39, %v4315_v22  ;;  %v351_v24 = vmul.f32 %v3190_v60, %v4315_v22  ;;  %3768 = vmatpush3.bf16.msra.mxu0 %v4322_v26  ;;  %v659_v37 = vshll.u32 %v4358_v48, 16 }
  0x51   : > { %v704_v16 = vrot.slane %v702_v8, 1  ;;  %v443_v33 = vmax.f32 %v411_v20, 0.0  ;;  %3617 = vmatprep.subr.bf16.mxu0 %v4129_v61  ;;  %v657_v28 = vor.u32 %v656_v36, %v652_v54 }
  0x52   : > { %v571_v45 = vor.u32 %v569_v3, %v568_v23  ;;  %v4645_v49 = vsel %vm4334_vm2, %v568_v23, 0  ;;  %v388_v50 = vadd.f32 %v4329_v31, %v350_v12  ;;  %v389_v39 = vadd.f32 %v4329_v31, %v351_v24 }
  0x53   : > { %v705_v57 = vor.u32 %v704_v16, %v700_v6  ;;  %v938_v26 = vrot.slane %v4645_v49, 1  ;;  %v459_v7 = vpack.c.bf16 %v443_v33, %v442_v4  ;;  %v661_v61 = vrot.slane %v659_v37, 1 }
  0x54   : > { %v4656_v59 = vsel %vm4334_vm2, 0, %v571_v45  ;;  %v420_v34 = vmax.f32 %v388_v50, 0.0  ;;  %v421_v60 = vmax.f32 %v389_v39, 0.0  ;;  %v3193_v23 = vunpack.c.l.bf16 %v3319_v53  ;;  %v3321_v50 = vld [vmem:[%s4303_s20 + $0x38] sm:$0xff]  }
  0x55   : > { %v4659_v63 = vsel %vm650_vm4, %v705_v57, %v709_v14  ;;  %v937_v3 = vrot.slane %v4656_v59, 1  ;;  %v573_v6 = vshrl.u32 %v459_v7, 16  ;;  %v576_v8 = vshll.u32 %v459_v7, 16 }
  0x56   : > { %1272 = vmatprep.mubr.bf16.mxu0 %v4659_v63  ;;  %v448_v20 = vpack.c.bf16 %v421_v60, %v420_v34  ;;  %v4664_v54 = vsel %vm650_vm4, %v657_v28, %v661_v61  ;;  %v3194_v4 = vunpack.c.h.bf16 %v3319_v53  ;;  %v3197_v24 = vunpack.c.l.bf16 %v3320_v58 }
  0x57   : > { %v4667_v12 = vsel %vm891_vm3, %v937_v3, %v938_v26  ;;  %1273 = vmatmul.mubr.bf16.gmra.mrb[12].mxu0 %v4631_v19  ;;  %v575_v14 = vrot.slane %v573_v6, 7  ;;  %v3198_v16 = vunpack.c.h.bf16 %v3320_v58  ;;  %v352_v37 = vmul.f32 %v3193_v23, %v4315_v22 }
  0x58   : > { %5386 = vst [vmem:[#allocation5_spill] sm:$0xff] %v4667_v12  ;;  %3797 = vmatprep.mubr.bf16.mxu1 %v4667_v12  ;;  %v496_v33 = vshrl.u32 %v448_v20, 16  ;;  %v499_v36 = vshll.u32 %v448_v20, 16  ;;  %v353_v45 = vmul.f32 %v3194_v4, %v4315_v22  ;;  %v354_v57 = vmul.f32 %v3197_v24, %v4315_v22 }
  0x59   : > { %v578_v39 = vor.u32 %v576_v8, %v575_v14  ;;  %v4676_v53 = vsel %vm4334_vm2, %v575_v14, 0  ;;  %v355_v26 = vmul.f32 %v3198_v16, %v4315_v22  ;;  %v390_v58 = vadd.f32 %v4329_v31, %v352_v37 }
  0x5a   : > { %v1020_v7 = vrot.slane %v4676_v53, 1  ;;  %v498_v28 = vrot.slane %v496_v33, 7  ;;  %v391_v34 = vadd.f32 %v4329_v31, %v353_v45  ;;  %v392_v61 = vadd.f32 %v4329_v31, %v354_v57 }
  0x5b   : > { %v4685_v60 = vsel %vm4334_vm2, 0, %v578_v39  ;;  %v393_v3 = vadd.f32 %v4329_v31, %v355_v26  ;;  %v3201_v6 = vunpack.c.l.bf16 %v3321_v50  ;;  %v422_v4 = vmax.f32 %v390_v58, 0.0 }
  0x5c   : > { %v1019_v8 = vrot.slane %v4685_v60, 1  ;;  %v501_v20 = vor.u32 %v499_v36, %v498_v28  ;;  %v4692_v23 = vsel %vm4334_vm2, %v498_v28, 0  ;;  %v423_v24 = vmax.f32 %v391_v34, 0.0 }
  0x5d   : > { %v719_v14 = vshll.u32 %v4692_v23, 16  ;;  %v424_v16 = vmax.f32 %v392_v61, 0.0  ;;  %v425_v33 = vmax.f32 %v393_v3, 0.0  ;;  %v3202_v39 = vunpack.c.h.bf16 %v3321_v50 }
  0x5e   : > { %v4696_v37 = vsel %vm891_vm3, %v1019_v8, %v1020_v7  ;;  %v4700_v45 = vsel %vm4334_vm2, 0, %v501_v20  ;;  %v356_v36 = vmul.f32 %v3201_v6, %v4315_v22  ;;  %v449_v28 = vpack.c.bf16 %v423_v24, %v422_v4 }
  0x5f   : > { %5387 = vst [vmem:[#allocation6_spill] sm:$0xff] %v4696_v37  ;;  %3798 = vmatmul.mubr.bf16.gmra.mrb[12].mxu1 %v4696_v37  ;;  %v712_v57 = vshrl.u32 %v4700_v45, 16  ;;  %v714_v26 = vshll.u32 %v4700_v45, 16  ;;  %v450_v58 = vpack.c.bf16 %v425_v33, %v424_v16  ;;  %v357_v7 = vmul.f32 %v3202_v39, %v4315_v22 }
  0x60   : > { %1714 = vmatprep.mubr.bf16.mxu1 %v4664_v54  ;;  %v394_v34 = vadd.f32 %v4329_v31, %v356_v36  ;;  %v721_v3 = vrot.slane %v719_v14, 1  ;;  %v503_v8 = vshrl.u32 %v449_v28, 16  ;;  %v506_v50 = vshll.u32 %v449_v28, 16  ;;  %v4123_v14 = vld [vmem:[%s5368_s3 + $0x88] sm:$0xff]  }
  0x61   : > { %v716_v61 = vrot.slane %v714_v26, 1  ;;  %v510_v20 = vshrl.u32 %v450_v58, 16  ;;  %v513_v6 = vshll.u32 %v450_v58, 16  ;;  %v395_v37 = vadd.f32 %v4329_v31, %v357_v7 }
  0x62   : > { %v426_v12 = vmax.f32 %v394_v34, 0.0  ;;  %v505_v25 = vrot.slane %v503_v8, 7 }
  0x63   : > { %v717_v62 = vor.u32 %v716_v61, %v712_v57  ;;  %v512_v5 = vrot.slane %v510_v20, 7  ;;  %v427_v4 = vmax.f32 %v395_v37, 0.0 }
  0x64   : > { %v508_v16 = vor.u32 %v506_v50, %v505_v25  ;;  %v4715_v22 = vsel %vm4334_vm2, %v505_v25, 0 }
  0x65   : > { %v4711_v24 = vsel %vm650_vm4, %v717_v62, %v721_v3  ;;  %v731_v31 = vshll.u32 %v4715_v22, 16  ;;  %v515_v33 = vor.u32 %v513_v6, %v512_v5  ;;  %v4724_v37 = vsel %vm4334_vm2, %v512_v5, 0 }
  0x66   : > { %1280 = vmatprep.mubr.bf16.mxu0 %v4711_v24  ;;  %v451_v62 = vpack.c.bf16 %v427_v4, %v426_v12  ;;  %v4730_v25 = vsel %vm4334_vm2, 0, %v508_v16  ;;  %v743_v39 = vshll.u32 %v4724_v37, 16 }
  0x67   : > { %1281 = vmatmul.mubr.bf16.gmra.mrb[16].mxu0 %v4700_v45  ;;  %1715 = vmatmul.mubr.bf16.vlgmr.msra.gmra.mrb[16].mxu1 %v4347_v43  ;;  %v724_v36 = vshrl.u32 %v4730_v25, 16  ;;  %v726_v57 = vshll.u32 %v4730_v25, 16  ;;  %v4739_v5 = vsel %vm4334_vm2, 0, %v515_v33  ;;  %v733_v7 = vrot.slane %v731_v31, 1  ;;  %v4125_v31 = vld [vmem:[%s5368_s3 + $0x98] sm:$0xff]  }
  0x68   : > { %3802 = vmatpush3.bf16.msra.mxu1 %v4601_v32  ;;  %1722 = vmatprep.mubr.bf16.mxu1 %v4439_v21  ;;  %v736_v12 = vshrl.u32 %v4739_v5, 16  ;;  %v738_v26 = vshll.u32 %v4739_v5, 16  ;;  %v517_v28 = vshrl.u32 %v451_v62, 16  ;;  %v4124_v32 = vld [vmem:[%s5368_s3 + $0x90] sm:$0xff]   ;;  %v520_v34 = vshll.u32 %v451_v62, 16 }
  0x69   : > { %3803 = vmatprep.subr.bf16.mxu1 %v4123_v14  ;;  %v728_v58 = vrot.slane %v726_v57, 1  ;;  %v745_v3 = vrot.slane %v743_v39, 1 }
  0x6a   : > { %v740_v61 = vrot.slane %v738_v26, 1  ;;  %v519_v21 = vrot.slane %v517_v28, 7 }
  0x6b   : > { %v729_v8 = vor.u32 %v728_v58, %v724_v36  ;;  %v760_v58 = vshrl.u32 %v4403_v52, 16 }
  0x6c   : > { %3804 = vmatpush3.bf16.msra.mxu1 %v4123_v14  ;;  %v741_v50 = vor.u32 %v740_v61, %v736_v12  ;;  %v522_v20 = vor.u32 %v520_v34, %v519_v21  ;;  %v4748_v6 = vsel %vm4334_vm2, %v519_v21, 0  ;;  %v762_v12 = vshll.u32 %v4403_v52, 16 }
  0x6d   : > { %3805 = vmatprep.subr.bf16.mxu1 %v4124_v32  ;;  %v4751_v4 = vsel %vm650_vm4, %v729_v8, %v733_v7  ;;  %v755_v16 = vshll.u32 %v4748_v6, 16  ;;  %v767_v34 = vshll.u32 %v4388_v41, 16  ;;  %v774_v21 = vshll.u32 %v4408_v55, 16  ;;  %v4128_v41 = vld [vmem:[%s5368_s3 + $0xb0] sm:$0xff]  }
  0x6e   : > { %1288 = vmatprep.mubr.bf16.mxu0 %v4751_v4  ;;  %v4760_v14 = vsel %vm650_vm4, %v741_v50, %v745_v3  ;;  %v4764_v33 = vsel %vm4334_vm2, 0, %v522_v20  ;;  %v764_v7 = vrot.slane %v762_v12, 1  ;;  %v772_v50 = vshrl.u32 %v4408_v55, 16 }
  0x6f   : > { %1723 = vmatmul.mubr.bf16.gmra.mrb[20].mxu1 %v4392_v44  ;;  %1289 = vmatmul.mubr.bf16.gmra.mrb[20].mxu0 %v4730_v25  ;;  %v748_v62 = vshrl.u32 %v4764_v33, 16  ;;  %v750_v39 = vshll.u32 %v4764_v33, 16  ;;  %v757_v57 = vrot.slane %v755_v16, 1  ;;  %v769_v3 = vrot.slane %v767_v34, 1 }
  0x70   : > { %1730 = vmatprep.mubr.bf16.mxu1 %v4481_v15  ;;  %1296 = vmatprep.mubr.bf16.mxu0 %v4760_v14  ;;  %v765_v61 = vor.u32 %v764_v7, %v760_v58  ;;  %v776_v20 = vrot.slane %v774_v21, 1  ;;  %v779_v16 = vshll.u32 %v4397_v47, 16  ;;  %v4807_v47 = vld [vmem:[%s5368_s3 + $0x200] sm:$0xff]   ;;  %v784_v12 = vshrl.u32 %v4485_v17, 16 }
  0x71   : > { %3806 = vmatpush3.bf16.msra.mxu1 %v4124_v32  ;;  %v752_v36 = vrot.slane %v750_v39, 1  ;;  %v4127_v32 = vld [vmem:[%s5368_s3 + $0xa8] sm:$0xff]   ;;  %v798_v34 = vshll.u32 %v4520_v56, 16 }
  0x72   : > { %3807 = vmatprep.subr.bf16.mxu1 %v4125_v31  ;;  %v4792_v8 = vsel %vm650_vm4, %v765_v61, %v769_v3  ;;  %v781_v39 = vrot.slane %v779_v16, 1  ;;  %v796_v61 = vshrl.u32 %v4520_v56, 16  ;;  %v803_v3 = vshll.u32 %v4513_v40, 16 }
  0x73   : > { %v753_v26 = vor.u32 %v752_v36, %v748_v62  ;;  %v777_v62 = vor.u32 %v776_v20, %v772_v50  ;;  %v786_v36 = vshll.u32 %v4485_v17, 16  ;;  %v810_v50 = vshll.u32 %v4575_v13, 16 }
  0x74   : > { %v808_v16 = vshrl.u32 %v4575_v13, 16  ;;  %v815_v40 = vshll.u32 %v4566_v51, 16  ;;  %v827_v51 = vshll.u32 %v4596_v30, 16  ;;  %v839_v30 = vshll.u32 %v4645_v49, 16 }
  0x75   : > { %3808 = vmatpush3.bf16.msra.mxu1 %v4125_v31  ;;  %v4776_v28 = vsel %vm650_vm4, %v753_v26, %v757_v57  ;;  %v4137_v31 = vld [vmem:[%s5368_s3 + $0xb8] sm:$0xff]   ;;  %v4810_v57 = vsel %vm650_vm4, %v777_v62, %v781_v39  ;;  %v791_v26 = vshll.u32 %v4474_v0, 16  ;;  %v800_v0 = vrot.slane %v798_v34, 1 }
  0x76   : > { %3809 = vmatprep.subr.bf16.mxu1 %v4126_v38  ;;  %v817_v39 = vrot.slane %v815_v40, 1  ;;  %v834_v34 = vshll.u32 %v4656_v59, 16  ;;  %v1012_v49 = vshll.u32 %v4676_v53, 16  ;;  %v895_v53 = vrot.slane %v4392_v44, 1 }
  0x77   : > { %1731 = vmatmul.mubr.bf16.gmra.mrb[24].mxu1 %v4450_v29  ;;  %1297 = vmatmul.mubr.bf16.gmra.mrb[24].mxu0 %v4739_v5  ;;  %v793_v7 = vrot.slane %v791_v26, 1  ;;  %v801_v21 = vor.u32 %v800_v0, %v796_v61  ;;  %v832_v0 = vshrl.u32 %v4656_v59, 16  ;;  %v902_v44 = vrot.slane %v4542_v18, 1  ;;  %v4132_v18 = vld [vmem:[%s5368_s3 + $0x188] sm:$0xff]  }
  0x78   : > { %1738 = vmatprep.mubr.bf16.mxu1 %v4589_v10  ;;  %1304 = vmatprep.mubr.bf16.mxu0 %v4776_v28 }
  0x79   : > { %3810 = vmatpush3.bf16.msra.mxu1 %v4126_v38  ;;  %v788_v38 = vrot.slane %v786_v36, 1  ;;  %v822_v36 = vshll.u32 %v4609_v46, 16 }
  0x7a   : > { %3811 = vmatprep.subr.bf16.mxu1 %v4127_v32 }
  0x7b   : > { %v789_v58 = vor.u32 %v788_v38, %v784_v12  ;;  %v820_v38 = vshrl.u32 %v4609_v46, 16  ;;  %v824_v26 = vrot.slane %v822_v36, 1 }
  0x7d   : > { %3812 = vmatpush3.bf16.msra.mxu1 %v4127_v32  ;;  %v4821_v32 = vsel %vm650_vm4, %v789_v58, %v793_v7  ;;  %v825_v58 = vor.u32 %v824_v26, %v820_v38  ;;  %v829_v7 = vrot.slane %v827_v51, 1  ;;  %v896_v38 = vrot.slane %v4382_v35, 1 }
  0x7e   : > { %3813 = vmatprep.subr.bf16.mxu1 %v4128_v41  ;;  %v899_v51 = vrot.slane %v4435_v11, 1 }
  0x7f   : > { %1739 = vmatmul.mubr.bf16.gmra.mrb[28].mxu1 %v4553_v27  ;;  %1305 = vmatmul.mubr.bf16.gmra.mrb[28].mxu0 %v4764_v33  ;;  %v4851_v61 = vsel %vm650_vm4, %v825_v58, %v829_v7  ;;  %v4879_v26 = vsel %vm891_vm3, %v895_v53, %v896_v38  ;;  %v898_v58 = vrot.slane %v4450_v29, 1  ;;  %v901_v7 = vrot.slane %v4553_v27, 1  ;;  %v4138_v53 = vld [vmem:[%s5368_s3 + $0x1e0] sm:$0xff]  }
  0x80   : > { %1746 = vmatprep.mubr.bf16.mxu1 %v4659_v63  ;;  %1312 = vmatprep.mubr.bf16.mxu0 %v4792_v8  ;;  %v913_v38 = vrot.slane %v4739_v5, 1 }
  0x81   : > { %3814 = vmatpush3.bf16.msra.mxu1 %v4128_v41  ;;  %v805_v41 = vrot.slane %v803_v3, 1  ;;  %v836_v3 = vrot.slane %v834_v34, 1  ;;  %v4890_v35 = vsel %vm891_vm3, %v898_v58, %v899_v51  ;;  %v4130_v34 = vld [vmem:[%s5368_s3 + $0x180] sm:$0xff]   ;;  %v4899_v11 = vsel %vm891_vm3, %v901_v7, %v902_v44 }
  0x82   : > { %3815 = vmatprep.subr.bf16.mxu1 %v4137_v31  ;;  %v914_v51 = vrot.slane %v4724_v37, 1  ;;  %v4139_v7 = vld [vmem:[%s5368_s3 + $0x1a0] sm:$0xff]   ;;  %v4141_v37 = vld [vmem:[%s5368_s3 + $0x1a8] sm:$0xff]  }
  0x83   : > { %v4831_v20 = vsel %vm650_vm4, %v801_v21, %v805_v41  ;;  %v837_v21 = vor.u32 %v836_v3, %v832_v0  ;;  %v841_v41 = vrot.slane %v839_v30, 1  ;;  %v4131_v0 = vld [vmem:[%s5368_s3 + $0x1c8] sm:$0xff]   ;;  %v904_v3 = vrot.slane %v4631_v19, 1 }
  0x84   : > { %v905_v30 = vrot.slane %v4615_v1, 1  ;;  %v4135_v1 = vld [vmem:[%s5368_s3 + $0x1d8] sm:$0xff]   ;;  %v4951_v44 = vsel %vm891_vm3, %v913_v38, %v914_v51  ;;  %v5388_v38 = vld [vmem:[#allocation2_spill] sm:$0xff] }
  0x85   : > { %3816 = vmatpush3.bf16.msra.mxu1 %v4137_v31  ;;  %v812_v31 = vrot.slane %v810_v50, 1  ;;  %v1007_v50 = vshll.u32 %v4685_v60, 16 }
  0x86   : > { %3849 = vmatprep.subr.bf16.mxu1 %v4807_v47 }
  0x87   : > { %1747 = vmatmul.mubr.bf16.gmra.mrb[32].mxu1 %v4631_v19  ;;  %1313 = vmatmul.mubr.bf16.gmra.mrb[32].mxu0 %v4403_v52  ;;  %v813_v62 = vor.u32 %v812_v31, %v808_v16  ;;  %v4861_v16 = vsel %vm650_vm4, %v837_v21, %v841_v41  ;;  %v1005_v31 = vshrl.u32 %v4685_v60, 16  ;;  %v1009_v40 = vrot.slane %v1007_v50, 1  ;;  %v4133_v21 = vld [vmem:[%s5368_s3 + $0x1d0] sm:$0xff]  }
  0x88   : > { %1754 = vmatprep.mubr.bf16.mxu1 %v4711_v24  ;;  %1320 = vmatprep.mubr.bf16.mxu0 %v4810_v57  ;;  %v907_v41 = vrot.slane %v4700_v45, 1  ;;  %v908_v50 = vrot.slane %v4692_v23, 1  ;;  %v4136_v23 = vld [vmem:[%s5368_s3 + $0x198] sm:$0xff]  }
  0x89   : > { %v4841_v12 = vsel %vm650_vm4, %v813_v62, %v817_v39  ;;  %v1010_v62 = vor.u32 %v1009_v40, %v1005_v31  ;;  %v1014_v39 = vrot.slane %v1012_v49, 1  ;;  %v4916_v31 = vsel %vm891_vm3, %v904_v3, %v905_v30  ;;  %v4134_v40 = vld [vmem:[%s5368_s3 + $0x190] sm:$0xff]  }
  0x8a   : > { %v4925_v49 = vsel %vm891_vm3, %v907_v41, %v908_v50  ;;  %v893_v3 = vrot.slane %v4358_v48, 1  ;;  %v4142_v30 = vld [vmem:[%s5368_s3 + $0x1f0] sm:$0xff]   ;;  %v4144_v48 = vld [vmem:[%s5368_s3 + $0x1f8] sm:$0xff]  }
  0x8b   : > { %v4870_v36 = vsel %vm650_vm4, %v1010_v62, %v1014_v39  ;;  %v910_v62 = vrot.slane %v4730_v25, 1  ;;  %v911_v39 = vrot.slane %v4715_v22, 1  ;;  %v4140_v22 = vld [vmem:[%s5368_s3 + $0x1e8] sm:$0xff]   ;;  %v4143_v41 = vld [vmem:[%s5368_s3 + $0x1b0] sm:$0xff]  }
  0x8d   : > { %v4942_v58 = vsel %vm891_vm3, %v910_v62, %v911_v39 }
  0x8f   : > { %1755 = vmatmul.mubr.bf16.gmra.mrb[36].mxu1 %v4700_v45  ;;  %1321 = vmatmul.mubr.bf16.gmra.mrb[36].mxu0 %v4408_v55 }
  0x90   : > { %1762 = vmatprep.mubr.bf16.mxu1 %v4751_v4  ;;  %1328 = vmatprep.mubr.bf16.mxu0 %v4821_v32 }
  0x97   : > { %1763 = vmatmul.mubr.bf16.gmra.mrb[40].mxu1 %v4730_v25  ;;  %1329 = vmatmul.mubr.bf16.gmra.mrb[40].mxu0 %v4485_v17 }
  0x98   : > { %1770 = vmatprep.mubr.bf16.mxu1 %v4760_v14  ;;  %1336 = vmatprep.mubr.bf16.mxu0 %v4831_v20 }
  0x9f   : > { %1771 = vmatmul.mubr.bf16.gmra.mrb[44].mxu1 %v4739_v5  ;;  %1337 = vmatmul.mubr.bf16.gmra.mrb[44].mxu0 %v4520_v56 }
  0xa0   : > { %1778 = vmatprep.mubr.bf16.mxu1 %v4776_v28  ;;  %1344 = vmatprep.mubr.bf16.mxu0 %v4841_v12 }
  0xa7   : > { %1779 = vmatmul.mubr.bf16.gmra.mrb[48].mxu1 %v4764_v33  ;;  %1345 = vmatmul.mubr.bf16.gmra.mrb[48].mxu0 %v4575_v13 }
  0xa8   : > { %1786 = vmatprep.mubr.bf16.mxu1 %v4792_v8  ;;  %1352 = vmatprep.mubr.bf16.mxu0 %v4851_v61 }
  0xaf   : > { %1787 = vmatmul.mubr.bf16.gmra.mrb[52].mxu1 %v4403_v52  ;;  %1353 = vmatmul.mubr.bf16.gmra.mrb[52].mxu0 %v4609_v46 }
  0xb0   : > { %1794 = vmatprep.mubr.bf16.mxu1 %v4810_v57  ;;  %1360 = vmatprep.mubr.bf16.mxu0 %v4861_v16 }
  0xb7   : > { %1795 = vmatmul.mubr.bf16.gmra.mrb[56].mxu1 %v4408_v55  ;;  %1361 = vmatmul.mubr.bf16.gmra.mrb[56].mxu0 %v4656_v59 }
  0xb8   : > { %1802 = vmatprep.mubr.bf16.mxu1 %v4821_v32  ;;  %1368 = vmatprep.mubr.bf16.mxu0 %v4870_v36 }
  0xbf   : > { %1803 = vmatmul.mubr.bf16.gmra.mrb[60].mxu1 %v4485_v17  ;;  %1369 = vmatmul.mubr.bf16.gmra.mrb[60].mxu0 %v4685_v60 }
  0xc0   : > { %1810 = vmatprep.mubr.bf16.mxu1 %v4831_v20  ;;  %3769 = vmatprep.mubr.bf16.mxu0 %v4879_v26 }
  0xc7   : > { %1811 = vmatmul.mubr.bf16.gmra.mrb[64].mxu1 %v4520_v56  ;;  %3770 = vmatmul.mubr.bf16.vlgmr.msra.gmra.mrb[64].mxu0 %v4890_v35 }
  0xc8   : > { %1818 = vmatprep.mubr.bf16.mxu1 %v4841_v12  ;;  %3618 = vmatpush3.bf16.msra.mxu0 %v4130_v34  ;;  %v916_v34 = vrot.slane %v4764_v33, 1 }
  0xc9   : > { %3773 = vmatprep.mubr.bf16.mxu0 %v4899_v11  ;;  %3619 = vmatprep.subr.bf16.mxu0 %v4131_v0  ;;  %v917_v0 = vrot.slane %v4748_v6, 1  ;;  %v4145_v6 = vld [vmem:[%s5368_s3 + $0x1b8] sm:$0xff]  }
  0xcc   : > { %3620 = vmatpush3.bf16.msra.mxu0 %v4132_v18  ;;  %v892_v18 = vrot.slane %v4347_v43, 1 }
  0xcd   : > { %3621 = vmatprep.subr.bf16.mxu0 %v4133_v21  ;;  %v4968_v21 = vsel %vm891_vm3, %v916_v34, %v917_v0 }
  0xce   : > { %v4974_v50 = vsel %vm891_vm3, %v892_v18, %v893_v3 }
  0xcf   : > { %1819 = vmatmul.mubr.bf16.gmra.mrb[68].mxu1 %v4575_v13  ;;  %3774 = vmatmul.mubr.bf16.gmra.mrb[68].mxu0 %v4916_v31 }
  0xd0   : > { %1826 = vmatprep.mubr.bf16.mxu1 %v4851_v61  ;;  %3622 = vmatpush3.bf16.msra.mxu0 %v4134_v40  ;;  %v4147_v40 = vld [vmem:[%s5368_s3 + $0x208] sm:$0xff]  }
  0xd1   : > { %3777 = vmatprep.mubr.bf16.mxu0 %v4925_v49  ;;  %3623 = vmatprep.subr.bf16.mxu0 %v4135_v1  ;;  %v4149_v1 = vld [vmem:[%s5368_s3 + $0x218] sm:$0xff]  }
  0xd4   : > { %3624 = vmatpush3.bf16.msra.mxu0 %v4136_v23 }
  0xd5   : > { %3625 = vmatprep.subr.bf16.mxu0 %v4138_v53 }
  0xd7   : > { %1827 = vmatmul.mubr.bf16.gmra.mrb[72].mxu1 %v4609_v46  ;;  %3778 = vmatmul.mubr.bf16.gmra.mrb[72].mxu0 %v4942_v58 }
  0xd8   : > { %1834 = vmatprep.mubr.bf16.mxu1 %v4861_v16  ;;  %3626 = vmatpush3.bf16.msra.mxu0 %v4139_v7  ;;  %v5389_v7 = vld [vmem:[#allocation3_spill] sm:$0xff] }
  0xd9   : > { %3781 = vmatprep.mubr.bf16.mxu0 %v4951_v44  ;;  %3627 = vmatprep.subr.bf16.mxu0 %v4140_v22 }
  0xdc   : > { %3628 = vmatpush3.bf16.msra.mxu0 %v4141_v37  ;;  %v5391_v37 = vld [vmem:[#allocation5_spill] sm:$0xff] }
  0xdd   : > { %3629 = vmatprep.subr.bf16.mxu0 %v4142_v30 }
  0xdf   : > { %1835 = vmatmul.mubr.bf16.gmra.mrb[76].mxu1 %v4656_v59  ;;  %3782 = vmatmul.mubr.bf16.gmra.mrb[76].mxu0 %v4968_v21 }
  0xe0   : > { %3817 = vmatprep.mubr.bf16.mxu1 %v4974_v50  ;;  %3630 = vmatpush3.bf16.msra.mxu0 %v4143_v41 }
  0xe1   : > { %2229 = vmatprep.mubr.bf16.mxu0 %v4481_v15  ;;  %3631 = vmatprep.subr.bf16.mxu0 %v4144_v48  ;;  %v4148_v15 = vld [vmem:[%s5368_s3 + $0x210] sm:$0xff]  }
  0xe4   : > { %3632 = vmatpush3.bf16.msra.mxu0 %v4145_v6 }
  0xe7   : > { %3818 = vmatmul.mubr.bf16.vlgmr.msra.gmra.mrb[80].mxu1 %v4879_v26  ;;  %2230 = vmatmul.mubr.bf16.vlgmr.msra.gmra.mrb[80].mxu0 %v4450_v29  ;;  %v4150_v29 = vld [vmem:[%s5368_s3 + $0x220] sm:$0xff]  }
  0xe8   : > { %3850 = vmatpush3.bf16.msra.mxu1 %v4807_v47  ;;  %3821 = vmatprep.mubr.bf16.mxu1 %v4890_v35 }
  0xe9   : > { %2237 = vmatprep.mubr.bf16.mxu0 %v4589_v10  ;;  %3851 = vmatprep.subr.bf16.mxu1 %v4147_v40  ;;  %v4151_v10 = vld [vmem:[%s5368_s3 + $0x228] sm:$0xff]  }
  0xec   : > { %3852 = vmatpush3.bf16.msra.mxu1 %v4147_v40 }
  0xed   : > { %3853 = vmatprep.subr.bf16.mxu1 %v4148_v15 }
  0xef   : > { %3822 = vmatmul.mubr.bf16.gmra.mrb[84].mxu1 %v4899_v11  ;;  %2238 = vmatmul.mubr.bf16.gmra.mrb[84].mxu0 %v4553_v27  ;;  %v4152_v27 = vld [vmem:[%s5368_s3 + $0x230] sm:$0xff]  }
  0xf0   : > { %3825 = vmatprep.mubr.bf16.mxu1 %v4916_v31  ;;  %2245 = vmatprep.mubr.bf16.mxu0 %v4659_v63  ;;  %v4153_v63 = vld [vmem:[%s5368_s3 + $0x238] sm:$0xff]  }
  0xf1   : > { %3854 = vmatpush3.bf16.msra.mxu1 %v4148_v15 }
  0xf2   : > { %3855 = vmatprep.subr.bf16.mxu1 %v4149_v1 }
  0xf5   : > { %3856 = vmatpush3.bf16.msra.mxu1 %v4149_v1 }
  0xf6   : > { %3857 = vmatprep.subr.bf16.mxu1 %v4150_v29 }
  0xf7   : > { %3826 = vmatmul.mubr.bf16.gmra.mrb[88].mxu1 %v4925_v49  ;;  %2246 = vmatmul.mubr.bf16.gmra.mrb[88].mxu0 %v4631_v19 }
  0xf8   : > { %3829 = vmatprep.mubr.bf16.mxu1 %v4942_v58  ;;  %2253 = vmatprep.mubr.bf16.mxu0 %v4711_v24 }
  0xf9   : > { %3858 = vmatpush3.bf16.msra.mxu1 %v4150_v29 }
  0xfa   : > { %3859 = vmatprep.subr.bf16.mxu1 %v4151_v10 }
  0xfd   : > { %3860 = vmatpush3.bf16.msra.mxu1 %v4151_v10 }
  0xfe   : > { %3861 = vmatprep.subr.bf16.mxu1 %v4152_v27 }
  0xff   : > { %3830 = vmatmul.mubr.bf16.gmra.mrb[92].mxu1 %v4951_v44  ;;  %2254 = vmatmul.mubr.bf16.gmra.mrb[92].mxu0 %v4700_v45 }
 0x100   : > { %3833 = vmatprep.mubr.bf16.mxu1 %v4968_v21  ;;  %2261 = vmatprep.mubr.bf16.mxu0 %v4751_v4 }
 0x101   : > { %3862 = vmatpush3.bf16.msra.mxu1 %v4152_v27 }
 0x102   : > { %3863 = vmatprep.subr.bf16.mxu1 %v4153_v63 }
 0x105   : > { %v3361_v19 = vpop.f32.mrb[0].mxu0  ;;  %3864 = vmatpush3.bf16.msra.mxu1 %v4153_v63 }
 0x106   : > { %v3362_v24 = vpop.f32.mrb[1].mxu0 }
 0x107   : > { %3834 = vmatmul.mubr.bf16.gmra.mrb[0].mxu1 %v4421_v2  ;;  %v5025_v47 = vadd.f32 %v3362_v24, %v3361_v19  ;;  %v3364_v26 = vpop.f32.mrb[2].mxu0  ;;  %2262 = vmatmul.mubr.bf16.gmra.mrb[96].mxu0 %v4730_v25 }
 0x108   : > { %3837 = vmatprep.mubr.bf16.mxu1 %v4426_v9  ;;  %v3365_v23 = vpop.f32.mrb[3].mxu0  ;;  %2269 = vmatprep.mubr.bf16.mxu0 %v4760_v14  ;;  %v5390_v14 = vld [vmem:[#allocation4_spill] sm:$0xff] }
 0x109   : > { %v5030_v45 = vadd.f32 %v3365_v23, %v3364_v26 }
 0x10f   : > { %3838 = vmatmul.mubr.bf16.gmra.mrb[4].mxu1 %v4509_v42  ;;  %2270 = vmatmul.mubr.bf16.gmra.mrb[100].mxu0 %v4739_v5 }
 0x110   : > { %3841 = vmatprep.mubr.bf16.mxu1 %v5388_v38  ;;  %2277 = vmatprep.mubr.bf16.mxu0 %v4776_v28 }
 0x111   : > { %v3367_v4 = vpop.f32.mrb[4].mxu0 }
 0x112   : > { %v3368_v62 = vpop.f32.mrb[5].mxu0 }
 0x113   : > { %v5033_v39 = vadd.f32 %v3368_v62, %v3367_v4  ;;  %v3370_v53 = vpop.f32.mrb[6].mxu0 }
 0x114   : > { %v3371_v51 = vpop.f32.mrb[7].mxu0 }
 0x115   : > { %v5038_v25 = vadd.f32 %v3371_v51, %v3370_v53 }
 0x117   : > { %3842 = vmatmul.mubr.bf16.gmra.mrb[8].mxu1 %v5389_v7  ;;  %2278 = vmatmul.mubr.bf16.gmra.mrb[104].mxu0 %v4764_v33 }
 0x118   : > { %3845 = vmatprep.mubr.bf16.mxu1 %v5390_v14  ;;  %2285 = vmatprep.mubr.bf16.mxu0 %v4792_v8 }
 0x11e   : > { %v3373_v22 = vpop.f32.mrb[8].mxu0 }
 0x11f   : > { %3846 = vmatmul.mubr.bf16.gmra.mrb[12].mxu1 %v5391_v37  ;;  %v3374_v34 = vpop.f32.mrb[9].mxu0  ;;  %2286 = vmatmul.mubr.bf16.gmra.mrb[108].mxu0 %v4403_v52 }
 0x120   : > { %3865 = vmatprep.mubr.bf16.mxu1 %v4890_v35  ;;  %v5047_v5 = vadd.f32 %v3374_v34, %v3373_v22  ;;  %v3376_v28 = vpop.f32.mrb[10].mxu0  ;;  %2293 = vmatprep.mubr.bf16.mxu0 %v4810_v57 }
 0x121   : > { %v3377_v0 = vpop.f32.mrb[11].mxu0 }
 0x122   : > { %v5050_v18 = vadd.f32 %v3377_v0, %v3376_v28 }
 0x127   : > { %3866 = vmatmul.mubr.bf16.vlgmr.msra.gmra.mrb[80].mxu1 %v4899_v11  ;;  %2294 = vmatmul.mubr.bf16.gmra.mrb[112].mxu0 %v4408_v55 }
 0x128   : > { %3869 = vmatprep.mubr.bf16.mxu1 %v4916_v31  ;;  %2301 = vmatprep.mubr.bf16.mxu0 %v4821_v32 }
 0x12a   : > { %v3379_v33 = vpop.f32.mrb[12].mxu0 }
 0x12b   : > { %v3380_v52 = vpop.f32.mrb[13].mxu0 }
 0x12c   : > { %v5056_v8 = vadd.f32 %v3380_v52, %v3379_v33  ;;  %v3382_v35 = vpop.f32.mrb[14].mxu0 }
 0x12d   : > { %v3383_v3 = vpop.f32.mrb[15].mxu0 }
 0x12e   : > { %v5058_v30 = vadd.f32 %v3383_v3, %v3382_v35 }
 0x12f   : > { %3870 = vmatmul.mubr.bf16.gmra.mrb[84].mxu1 %v4925_v49  ;;  %2302 = vmatmul.mubr.bf16.gmra.mrb[116].mxu0 %v4485_v17 }
 0x130   : > { %3873 = vmatprep.mubr.bf16.mxu1 %v4942_v58  ;;  %2309 = vmatprep.mubr.bf16.mxu0 %v4831_v20 }
 0x137   : > { %3874 = vmatmul.mubr.bf16.gmra.mrb[88].mxu1 %v4951_v44  ;;  %2310 = vmatmul.mubr.bf16.gmra.mrb[120].mxu0 %v4520_v56 }
 0x138   : > { %3877 = vmatprep.mubr.bf16.mxu1 %v4968_v21  ;;  %2317 = vmatprep.mubr.bf16.mxu0 %v4841_v12 }
 0x13a   : > { %v3385_v55 = vpop.f32.mrb[16].mxu0  ;;  %v3497_v57 = vpop.f32.mrb[16].mxu1 }
 0x13b   : > { %v3386_v32 = vpop.f32.mrb[17].mxu0  ;;  %v3498_v11 = vpop.f32.mrb[17].mxu1 }
 0x13c   : > { %v5068_v31 = vadd.f32 %v3386_v32, %v3385_v55  ;;  %v5070_v49 = vadd.f32 %v3498_v11, %v3497_v57  ;;  %v3388_v17 = vpop.f32.mrb[18].mxu0  ;;  %v3500_v58 = vpop.f32.mrb[18].mxu1 }
 0x13d   : > { %v3389_v41 = vpop.f32.mrb[19].mxu0  ;;  %v3501_v20 = vpop.f32.mrb[19].mxu1 }
 0x13e   : > { %v5072_v48 = vadd.f32 %v3389_v41, %v3388_v17  ;;  %v5074_v44 = vadd.f32 %v3501_v20, %v3500_v58 }
 0x13f   : > { %3878 = vmatmul.mubr.bf16.gmra.mrb[92].mxu1 %v4421_v2  ;;  %2318 = vmatmul.mubr.bf16.gmra.mrb[124].mxu0 %v4575_v13 }
 0x140   : > { %3881 = vmatprep.mubr.bf16.mxu1 %v4426_v9  ;;  %2325 = vmatprep.mubr.bf16.mxu0 %v4851_v61 }
 0x142   : > { %v3503_v56 = vpop.f32.mrb[20].mxu1  ;;  %v3391_v12 = vpop.f32.mrb[20].mxu0 }
 0x143   : > { %v3504_v21 = vpop.f32.mrb[21].mxu1  ;;  %v3392_v6 = vpop.f32.mrb[21].mxu0 }
 0x144   : > { %v5080_v40 = vadd.f32 %v3504_v21, %v3503_v56  ;;  %v3506_v15 = vpop.f32.mrb[22].mxu1  ;;  %v5082_v1 = vadd.f32 %v3392_v6, %v3391_v12  ;;  %v3394_v29 = vpop.f32.mrb[22].mxu0 }
 0x145   : > { %v3507_v10 = vpop.f32.mrb[23].mxu1  ;;  %v3395_v27 = vpop.f32.mrb[23].mxu0 }
 0x146   : > { %v5084_v63 = vadd.f32 %v3507_v10, %v3506_v15  ;;  %v5086_v2 = vadd.f32 %v3395_v27, %v3394_v29 }
 0x147   : > { %3882 = vmatmul.mubr.bf16.gmra.mrb[0].mxu1 %v4509_v42  ;;  %2326 = vmatmul.mubr.bf16.gmra.mrb[128].mxu0 %v4609_v46 }
 0x148   : > { %3885 = vmatprep.mubr.bf16.mxu1 %v5388_v38  ;;  %2333 = vmatprep.mubr.bf16.mxu0 %v4861_v16 }
 0x14a   : > { %v3509_v9 = vpop.f32.mrb[24].mxu1  ;;  %v3397_v13 = vpop.f32.mrb[24].mxu0 }
 0x14b   : > { %v3510_v61 = vpop.f32.mrb[25].mxu1  ;;  %v3398_v19 = vpop.f32.mrb[25].mxu0 }
 0x14c   : > { %v5092_v24 = vadd.f32 %v3510_v61, %v3509_v9  ;;  %v3512_v26 = vpop.f32.mrb[26].mxu1  ;;  %v5094_v23 = vadd.f32 %v3398_v19, %v3397_v13  ;;  %v3400_v4 = vpop.f32.mrb[26].mxu0 }
 0x14d   : > { %v3513_v62 = vpop.f32.mrb[27].mxu1  ;;  %v3401_v53 = vpop.f32.mrb[27].mxu0 }
 0x14e   : > { %v5096_v51 = vadd.f32 %v3513_v62, %v3512_v26  ;;  %v5098_v42 = vadd.f32 %v3401_v53, %v3400_v4 }
 0x14f   : > { %3886 = vmatmul.mubr.bf16.gmra.mrb[4].mxu1 %v5389_v7  ;;  %2334 = vmatmul.mubr.bf16.gmra.mrb[132].mxu0 %v4656_v59  ;;  %v5392_v59 = vld [vmem:[#allocation6_spill] sm:$0xff] }
 0x150   : > { %3889 = vmatprep.mubr.bf16.mxu1 %v5390_v14  ;;  %2341 = vmatprep.mubr.bf16.mxu0 %v4870_v36 }
 0x152   : > { %v3515_v46 = vpop.f32.mrb[28].mxu1  ;;  %v3403_v16 = vpop.f32.mrb[28].mxu0 }
 0x153   : > { %v3516_v38 = vpop.f32.mrb[29].mxu1  ;;  %v3404_v22 = vpop.f32.mrb[29].mxu0 }
 0x154   : > { %v5104_v34 = vadd.f32 %v3516_v38, %v3515_v46  ;;  %v3518_v28 = vpop.f32.mrb[30].mxu1  ;;  %v5106_v0 = vadd.f32 %v3404_v22, %v3403_v16  ;;  %v3406_v33 = vpop.f32.mrb[30].mxu0 }
 0x155   : > { %v3519_v52 = vpop.f32.mrb[31].mxu1  ;;  %v3407_v35 = vpop.f32.mrb[31].mxu0 }
 0x156   : > { %v5108_v3 = vadd.f32 %v3519_v52, %v3518_v28  ;;  %v5110_v7 = vadd.f32 %v3407_v35, %v3406_v33 }
 0x157   : > { %3890 = vmatmul.mubr.bf16.gmra.mrb[8].mxu1 %v5391_v37  ;;  %2342 = vmatmul.mubr.bf16.gmra.mrb[136].mxu0 %v4685_v60 }
 0x158   : > { %3893 = vmatprep.mubr.bf16.mxu1 %v5392_v59  ;;  %2349 = vmatprep.mubr.bf16.mxu0 %v4664_v54 }
 0x15a   : > { %v3521_v36 = vpop.f32.mrb[32].mxu1  ;;  %v3409_v14 = vpop.f32.mrb[32].mxu0 }
 0x15b   : > { %v3522_v55 = vpop.f32.mrb[33].mxu1  ;;  %v3410_v57 = vpop.f32.mrb[33].mxu0 }
 0x15c   : > { %v5116_v32 = vadd.f32 %v3522_v55, %v3521_v36  ;;  %v3524_v11 = vpop.f32.mrb[34].mxu1  ;;  %v3411_v17 = vadd.f32 %v3410_v57, %v3409_v14  ;;  %v3412_v58 = vpop.f32.mrb[34].mxu0 }
 0x15d   : > { %v3525_v41 = vpop.f32.mrb[35].mxu1  ;;  %v3413_v20 = vpop.f32.mrb[35].mxu0 }
 0x15e   : > { %v5118_v56 = vadd.f32 %v3525_v41, %v3524_v11  ;;  %v3414_v37 = vadd.f32 %v3413_v20, %v3412_v58 }
 0x15f   : > { %3894 = vmatmul.mubr.bf16.gmra.mrb[12].mxu1 %v4974_v50  ;;  %2350 = vmatmul.mubr.bf16.gmra.mrb[140].mxu0 %v4347_v43 }
 0x162   : > { %v3527_v60 = vpop.f32.mrb[36].mxu1  ;;  %v3415_v54 = vpop.f32.mrb[36].mxu0 }
 0x163   : > { %v3528_v12 = vpop.f32.mrb[37].mxu1  ;;  %v3416_v21 = vpop.f32.mrb[37].mxu0 }
 0x164   : > { %v5122_v6 = vadd.f32 %v3528_v12, %v3527_v60  ;;  %v3530_v15 = vpop.f32.mrb[38].mxu1  ;;  %v3417_v29 = vadd.f32 %v3416_v21, %v3415_v54  ;;  %v3418_v10 = vpop.f32.mrb[38].mxu0 }
 0x165   : > { %v3531_v27 = vpop.f32.mrb[39].mxu1  ;;  %v3419_v9 = vpop.f32.mrb[39].mxu0 }
 0x166   : > { %v5124_v13 = vadd.f32 %v3531_v27, %v3530_v15  ;;  %v3420_v61 = vadd.f32 %v3419_v9, %v3418_v10 }
 0x16a   : > { %v3533_v19 = vpop.f32.mrb[40].mxu1  ;;  %v3421_v26 = vpop.f32.mrb[40].mxu0 }
 0x16b   : > { %v3534_v4 = vpop.f32.mrb[41].mxu1  ;;  %v3422_v50 = vpop.f32.mrb[41].mxu0 }
 0x16c   : > { %v5126_v62 = vadd.f32 %v3534_v4, %v3533_v19  ;;  %v3536_v43 = vpop.f32.mrb[42].mxu1  ;;  %v3423_v53 = vadd.f32 %v3422_v50, %v3421_v26  ;;  %v3424_v46 = vpop.f32.mrb[42].mxu0 }
 0x16d   : > { %v3537_v16 = vpop.f32.mrb[43].mxu1  ;;  %v3425_v38 = vpop.f32.mrb[43].mxu0 }
 0x16e   : > { %v5128_v22 = vadd.f32 %v3537_v16, %v3536_v43  ;;  %v3426_v28 = vadd.f32 %v3425_v38, %v3424_v46 }
 0x172   : > { %v3539_v33 = vpop.f32.mrb[44].mxu1  ;;  %v3427_v52 = vpop.f32.mrb[44].mxu0 }
 0x173   : > { %v3540_v35 = vpop.f32.mrb[45].mxu1  ;;  %v3428_v59 = vpop.f32.mrb[45].mxu0 }
 0x174   : > { %v5130_v36 = vadd.f32 %v3540_v35, %v3539_v33  ;;  %v3542_v14 = vpop.f32.mrb[46].mxu1  ;;  %v3429_v55 = vadd.f32 %v3428_v59, %v3427_v52  ;;  %v3430_v57 = vpop.f32.mrb[46].mxu0 }
 0x175   : > { %v3543_v11 = vpop.f32.mrb[47].mxu1  ;;  %v3431_v58 = vpop.f32.mrb[47].mxu0 }
 0x176   : > { %v5132_v41 = vadd.f32 %v3543_v11, %v3542_v14  ;;  %v3432_v20 = vadd.f32 %v3431_v58, %v3430_v57 }
 0x17a   : > { %v3545_v60 = vpop.f32.mrb[48].mxu1  ;;  %v3433_v54 = vpop.f32.mrb[48].mxu0 }
 0x17b   : > { %v3546_v12 = vpop.f32.mrb[49].mxu1  ;;  %v3434_v21 = vpop.f32.mrb[49].mxu0 }
 0x17c   : > { %v3547_v15 = vadd.f32 %v3546_v12, %v3545_v60  ;;  %v3548_v10 = vpop.f32.mrb[50].mxu1  ;;  %v3435_v27 = vadd.f32 %v3434_v21, %v3433_v54  ;;  %v3436_v9 = vpop.f32.mrb[50].mxu0 }
 0x17d   : > { %v3549_v19 = vpop.f32.mrb[51].mxu1  ;;  %v3437_v4 = vpop.f32.mrb[51].mxu0 }
 0x17e   : > { %v5134_v26 = vadd.f32 %v3547_v15, %v3411_v17  ;;  %v3550_v50 = vadd.f32 %v3549_v19, %v3548_v10  ;;  %v3438_v43 = vadd.f32 %v3437_v4, %v3436_v9 }
 0x180   : > { %v5136_v46 = vadd.f32 %v3550_v50, %v3414_v37 }
 0x182   : > { %v3551_v16 = vpop.f32.mrb[52].mxu1  ;;  %v3439_v38 = vpop.f32.mrb[52].mxu0 }
 0x183   : > { %v3552_v33 = vpop.f32.mrb[53].mxu1  ;;  %v3440_v52 = vpop.f32.mrb[53].mxu0 }
 0x184   : > { %v3553_v35 = vadd.f32 %v3552_v33, %v3551_v16  ;;  %v3554_v59 = vpop.f32.mrb[54].mxu1  ;;  %v5138_v14 = vadd.f32 %v3440_v52, %v3439_v38  ;;  %v3442_v57 = vpop.f32.mrb[54].mxu0 }
 0x185   : > { %v3555_v11 = vpop.f32.mrb[55].mxu1  ;;  %v3443_v60 = vpop.f32.mrb[55].mxu0 }
 0x186   : > { %v5140_v58 = vadd.f32 %v3553_v35, %v3417_v29  ;;  %v3556_v17 = vadd.f32 %v3555_v11, %v3554_v59  ;;  %v5142_v54 = vadd.f32 %v3443_v60, %v3442_v57 }
 0x188   : > { %v5144_v12 = vadd.f32 %v3556_v17, %v3420_v61 }
 0x18a   : > { %v3557_v37 = vpop.f32.mrb[56].mxu1  ;;  %v3445_v21 = vpop.f32.mrb[56].mxu0 }
 0x18b   : > { %v3558_v15 = vpop.f32.mrb[57].mxu1  ;;  %v3446_v10 = vpop.f32.mrb[57].mxu0 }
 0x18c   : > { %v3559_v9 = vadd.f32 %v3558_v15, %v3557_v37  ;;  %v3560_v19 = vpop.f32.mrb[58].mxu1  ;;  %v5146_v4 = vadd.f32 %v3446_v10, %v3445_v21  ;;  %v3448_v50 = vpop.f32.mrb[58].mxu0 }
 0x18d   : > { %v3561_v16 = vpop.f32.mrb[59].mxu1  ;;  %v3449_v29 = vpop.f32.mrb[59].mxu0 }
 0x18e   : > { %v5148_v38 = vadd.f32 %v3559_v9, %v3423_v53  ;;  %v3562_v33 = vadd.f32 %v3561_v16, %v3560_v19  ;;  %v5150_v52 = vadd.f32 %v3449_v29, %v3448_v50 }
 0x190   : > { %5393 = vst [vmem:[#allocation2_spill] sm:$0xff] %v5148_v38  ;;  %v5152_v35 = vadd.f32 %v3562_v33, %v3426_v28 }
 0x192   : > { %5394 = vst [vmem:[#allocation3_spill] sm:$0xff] %v5152_v35  ;;  %v3563_v61 = vpop.f32.mrb[60].mxu1  ;;  %v3451_v59 = vpop.f32.mrb[60].mxu0 }
 0x193   : > { %v3564_v57 = vpop.f32.mrb[61].mxu1  ;;  %v3452_v11 = vpop.f32.mrb[61].mxu0 }
 0x194   : > { %v3565_v60 = vadd.f32 %v3564_v57, %v3563_v61  ;;  %v3566_v17 = vpop.f32.mrb[62].mxu1  ;;  %v5154_v37 = vadd.f32 %v3452_v11, %v3451_v59  ;;  %v3454_v21 = vpop.f32.mrb[62].mxu0 }
 0x195   : > { %v3567_v15 = vpop.f32.mrb[63].mxu1  ;;  %v3455_v53 = vpop.f32.mrb[63].mxu0 }
 0x196   : > { %v5156_v10 = vadd.f32 %v3565_v60, %v3429_v55  ;;  %v3568_v9 = vadd.f32 %v3567_v15, %v3566_v17  ;;  %v5158_v38 = vadd.f32 %v3455_v53, %v3454_v21 }
 0x198   : > { %v5160_v19 = vadd.f32 %v3568_v9, %v3432_v20 }
 0x19a   : > { %v3569_v28 = vpop.f32.mrb[64].mxu1  ;;  %v3771_v50 = vpop.f32.mrb[64].mxu0 }
 0x19b   : > { %v3570_v16 = vpop.f32.mrb[65].mxu1  ;;  %v1420_v29 = vadd.f32 %v3771_v50, %v5033_v39  ;;  %v1411_v33 = vpop.f32.mrb[65].mxu0 }
 0x19c   : > { %v3571_v61 = vadd.f32 %v3570_v16, %v3569_v28  ;;  %v3572_v57 = vpop.f32.mrb[66].mxu1  ;;  %v1412_v59 = vadd.f32 %v5025_v47, %v1411_v33  ;;  %v3772_v11 = vpop.f32.mrb[66].mxu0 }
 0x19d   : > { %v3573_v35 = vpop.f32.mrb[67].mxu1  ;;  %v5165_v55 = vadd.f32 %v5080_v40, %v1420_v29  ;;  %v1423_v20 = vadd.f32 %v3772_v11, %v5038_v25  ;;  %v1414_v17 = vpop.f32.mrb[67].mxu0 }
 0x19e   : > { %v5167_v60 = vadd.f32 %v3571_v61, %v3435_v27  ;;  %v3574_v21 = vadd.f32 %v3573_v35, %v3572_v57  ;;  %v5171_v15 = vadd.f32 %v5070_v49, %v1412_v59  ;;  %v1415_v39 = vadd.f32 %v5030_v45, %v1414_v17 }
 0x19f   : > { %v5175_v53 = vadd.f32 %v5084_v63, %v1423_v20 }
 0x1a0   : > { %v5177_v47 = vadd.f32 %v3574_v21, %v3438_v43  ;;  %v5180_v9 = vadd.f32 %v5074_v44, %v1415_v39 }
 0x1a2   : > { %v3575_v40 = vpop.f32.mrb[68].mxu1  ;;  %v3775_v27 = vpop.f32.mrb[68].mxu0 }
 0x1a3   : > { %v3576_v28 = vpop.f32.mrb[69].mxu1  ;;  %v1436_v25 = vadd.f32 %v3775_v27, %v5056_v8  ;;  %v1427_v50 = vpop.f32.mrb[69].mxu0 }
 0x1a4   : > { %v3577_v35 = vadd.f32 %v3576_v28, %v3575_v40  ;;  %v3578_v16 = vpop.f32.mrb[70].mxu1  ;;  %v1428_v49 = vadd.f32 %v5047_v5, %v1427_v50  ;;  %v3776_v29 = vpop.f32.mrb[70].mxu0 }
 0x1a5   : > { %v3579_v45 = vpop.f32.mrb[71].mxu1  ;;  %v5185_v63 = vadd.f32 %v5104_v34, %v1436_v25  ;;  %v1439_v44 = vadd.f32 %v3776_v29, %v5058_v30  ;;  %v1430_v33 = vpop.f32.mrb[71].mxu0 }
 0x1a6   : > { %v5188_v43 = vadd.f32 %v3577_v35, %v5138_v14  ;;  %v3580_v61 = vadd.f32 %v3579_v45, %v3578_v16  ;;  %v5192_v57 = vadd.f32 %v5092_v24, %v1428_v49  ;;  %v1431_v8 = vadd.f32 %v5050_v18, %v1430_v33 }
 0x1a7   : > { %v5196_v59 = vadd.f32 %v5108_v3, %v1439_v44 }
 0x1a8   : > { %v5199_v5 = vadd.f32 %v3580_v61, %v5142_v54  ;;  %v5202_v34 = vadd.f32 %v5096_v51, %v1431_v8 }
 0x1aa   : > { %v3581_v14 = vpop.f32.mrb[72].mxu1  ;;  %v3779_v11 = vpop.f32.mrb[72].mxu0 }
 0x1ab   : > { %v3582_v20 = vpop.f32.mrb[73].mxu1  ;;  %v1452_v30 = vadd.f32 %v3779_v11, %v5082_v1  ;;  %v1443_v17 = vpop.f32.mrb[73].mxu0 }
 0x1ac   : > { %v3583_v21 = vadd.f32 %v3582_v20, %v3581_v14  ;;  %v3584_v24 = vpop.f32.mrb[74].mxu1  ;;  %v1444_v39 = vadd.f32 %v5068_v31, %v1443_v17  ;;  %v3780_v18 = vpop.f32.mrb[74].mxu0 }
 0x1ad   : > { %v3585_v40 = vpop.f32.mrb[75].mxu1  ;;  %v5207_v3 = vadd.f32 %v5122_v6, %v1452_v30  ;;  %v1455_v51 = vadd.f32 %v3780_v18, %v5086_v2  ;;  %v1446_v27 = vpop.f32.mrb[75].mxu0 }
 0x1ae   : > { %v5210_v54 = vadd.f32 %v3583_v21, %v5146_v4  ;;  %v3586_v28 = vadd.f32 %v3585_v40, %v3584_v24  ;;  %v5214_v25 = vadd.f32 %v5116_v32, %v1444_v39  ;;  %v1447_v1 = vadd.f32 %v5072_v48, %v1446_v27 }
 0x1af   : > { %v5218_v50 = vadd.f32 %v5124_v13, %v1455_v51 }
 0x1b0   : > { %v5221_v31 = vadd.f32 %v3586_v28, %v5150_v52  ;;  %v1752_v6 = vadd.f32 %v5118_v56, %v1447_v1 }
 0x1b2   : > { %v3587_v35 = vpop.f32.mrb[76].mxu1  ;;  %v3783_v4 = vpop.f32.mrb[76].mxu0 }
 0x1b3   : > { %v3588_v16 = vpop.f32.mrb[77].mxu1  ;;  %v1468_v2 = vadd.f32 %v3783_v4, %v5106_v0  ;;  %v1459_v49 = vpop.f32.mrb[77].mxu0 }
 0x1b4   : > { %v3589_v29 = vadd.f32 %v3588_v16, %v3587_v35  ;;  %v3590_v45 = vpop.f32.mrb[78].mxu1  ;;  %v1460_v32 = vadd.f32 %v5094_v23, %v1459_v49  ;;  %v3784_v44 = vpop.f32.mrb[78].mxu0 }
 0x1b5   : > { %v3591_v48 = vpop.f32.mrb[79].mxu1  ;;  %v5227_v13 = vadd.f32 %v5130_v36, %v1468_v2  ;;  %v1471_v56 = vadd.f32 %v3784_v44, %v5110_v7  ;;  %v1462_v33 = vpop.f32.mrb[79].mxu0 }
 0x1b6   : > { %v5230_v52 = vadd.f32 %v3589_v29, %v5154_v37  ;;  %v3592_v61 = vadd.f32 %v3591_v48, %v3590_v45  ;;  %v1765_v8 = vadd.f32 %v5126_v62, %v1460_v32  ;;  %v1463_v0 = vadd.f32 %v5098_v42, %v1462_v33 }
 0x1b7   : > { %v5236_v14 = vadd.f32 %v5132_v41, %v1471_v56 }
 0x1b8   : > { %v5239_v23 = vadd.f32 %v3592_v61, %v5158_v38  ;;  %v1768_v36 = vadd.f32 %v5128_v22, %v1463_v0 }
 0x1ba   : > { %v3633_v11 = vpop.f32.mrb[80].mxu0 }
 0x1bb   : > { %v3634_v20 = vpop.f32.mrb[81].mxu0 }
 0x1bc   : > { %v3635_v37 = vadd.f32 %v3634_v20, %v3633_v11  ;;  %v3636_v30 = vpop.f32.mrb[82].mxu0 }
 0x1bd   : > { %v3637_v17 = vpop.f32.mrb[83].mxu0 }
 0x1be   : > { %v3638_v7 = vadd.f32 %v3637_v17, %v3636_v30  ;;  %v5243_v21 = vadd.f32 %v3635_v37, %v5171_v15 }
 0x1c0   : > { %v5246_v62 = vadd.f32 %v3638_v7, %v5180_v9 }
 0x1c2   : > { %v3639_v42 = vpop.f32.mrb[84].mxu0 }
 0x1c3   : > { %v3640_v41 = vpop.f32.mrb[85].mxu0 }
 0x1c4   : > { %v3641_v24 = vadd.f32 %v3640_v41, %v3639_v42  ;;  %v3642_v39 = vpop.f32.mrb[86].mxu0 }
 0x1c5   : > { %v3643_v38 = vpop.f32.mrb[87].mxu0 }
 0x1c6   : > { %v3644_v18 = vadd.f32 %v3643_v38, %v3642_v39  ;;  %v3915_v22 = vadd.f32 %v3641_v24, %v5165_v55 }
 0x1c8   : > { %v3923_v40 = vadd.f32 %v3644_v18, %v5175_v53 }
 0x1ca   : > { %v3645_v51 = vpop.f32.mrb[88].mxu0 }
 0x1cb   : > { %v3646_v27 = vpop.f32.mrb[89].mxu0 }
 0x1cc   : > { %v3647_v28 = vadd.f32 %v3646_v27, %v3645_v51  ;;  %v3648_v1 = vpop.f32.mrb[90].mxu0 }
 0x1cd   : > { %v3649_v35 = vpop.f32.mrb[91].mxu0 }
 0x1ce   : > { %v3650_v15 = vadd.f32 %v3649_v35, %v3648_v1  ;;  %v5251_v4 = vadd.f32 %v3647_v28, %v5192_v57 }
 0x1d0   : > { %v5254_v9 = vadd.f32 %v3650_v15, %v5202_v34 }
 0x1d2   : > { %v3651_v16 = vpop.f32.mrb[92].mxu0 }
 0x1d3   : > { %v3652_v2 = vpop.f32.mrb[93].mxu0 }
 0x1d4   : > { %v3653_v49 = vadd.f32 %v3652_v2, %v3651_v16  ;;  %v3654_v29 = vpop.f32.mrb[94].mxu0 }
 0x1d5   : > { %v3655_v45 = vpop.f32.mrb[95].mxu0 }
 0x1d6   : > { %v3656_v55 = vadd.f32 %v3655_v45, %v3654_v29  ;;  %v5257_v53 = vadd.f32 %v3653_v49, %v5185_v63 }
 0x1d8   : > { %v5260_v32 = vadd.f32 %v3656_v55, %v5196_v59 }
 0x1da   : > { %v3657_v44 = vpop.f32.mrb[96].mxu0 }
 0x1db   : > { %v3658_v48 = vpop.f32.mrb[97].mxu0 }
 0x1dc   : > { %v3659_v56 = vadd.f32 %v3658_v48, %v3657_v44  ;;  %v3660_v57 = vpop.f32.mrb[98].mxu0 }
 0x1dd   : > { %v3661_v33 = vpop.f32.mrb[99].mxu0 }
 0x1de   : > { %v3662_v61 = vadd.f32 %v3661_v33, %v3660_v57  ;;  %v5263_v34 = vadd.f32 %v3659_v56, %v5214_v25 }
 0x1e0   : > { %v5265_v0 = vadd.f32 %v3662_v61, %v1752_v6 }
 0x1e2   : > { %v3663_v11 = vpop.f32.mrb[100].mxu0 }
 0x1e3   : > { %v3664_v20 = vpop.f32.mrb[101].mxu0 }
 0x1e4   : > { %v3665_v37 = vadd.f32 %v3664_v20, %v3663_v11  ;;  %v3666_v30 = vpop.f32.mrb[102].mxu0 }
 0x1e5   : > { %v3667_v63 = vpop.f32.mrb[103].mxu0 }
 0x1e6   : > { %v3668_v17 = vadd.f32 %v3667_v63, %v3666_v30  ;;  %v5268_v59 = vadd.f32 %v3665_v37, %v5207_v3 }
 0x1e8   : > { %v5271_v7 = vadd.f32 %v3668_v17, %v5218_v50 }
 0x1ea   : > { %v3669_v42 = vpop.f32.mrb[104].mxu0 }
 0x1eb   : > { %v3670_v41 = vpop.f32.mrb[105].mxu0 }
 0x1ec   : > { %v3671_v24 = vadd.f32 %v3670_v41, %v3669_v42  ;;  %v3672_v39 = vpop.f32.mrb[106].mxu0 }
 0x1ed   : > { %v3673_v25 = vpop.f32.mrb[107].mxu0 }
 0x1ee   : > { %v3674_v38 = vadd.f32 %v3673_v25, %v3672_v39  ;;  %v5273_v6 = vadd.f32 %v3671_v24, %v1765_v8 }
 0x1f0   : > { %v5275_v18 = vadd.f32 %v3674_v38, %v1768_v36 }
 0x1f2   : > { %v3675_v51 = vpop.f32.mrb[108].mxu0 }
 0x1f3   : > { %v3676_v27 = vpop.f32.mrb[109].mxu0 }
 0x1f4   : > { %v3677_v28 = vadd.f32 %v3676_v27, %v3675_v51  ;;  %v3678_v1 = vpop.f32.mrb[110].mxu0 }
 0x1f5   : > { %v3679_v3 = vpop.f32.mrb[111].mxu0 }
 0x1f6   : > { %v3680_v35 = vadd.f32 %v3679_v3, %v3678_v1  ;;  %v5278_v50 = vadd.f32 %v3677_v28, %v5227_v13 }
 0x1f8   : > { %v5281_v15 = vadd.f32 %v3680_v35, %v5236_v14 }
 0x1fa   : > { %v3867_v16 = vpop.f32.mrb[80].mxu1  ;;  %v3681_v2 = vpop.f32.mrb[112].mxu0 }
 0x1fb   : > { %v3916_v49 = vadd.f32 %v3915_v22, %v3867_v16  ;;  %v2392_v8 = vpop.f32.mrb[81].mxu1  ;;  %v3682_v29 = vpop.f32.mrb[113].mxu0 }
 0x1fc   : > { %v3920_v36 = vadd.f32 %v5243_v21, %v2392_v8  ;;  %v3868_v45 = vpop.f32.mrb[82].mxu1  ;;  %v3683_v55 = vadd.f32 %v3682_v29, %v3681_v2  ;;  %v3684_v44 = vpop.f32.mrb[114].mxu0 }
 0x1fd   : > { %v3924_v48 = vadd.f32 %v3923_v40, %v3868_v45  ;;  %v2395_v56 = vpop.f32.mrb[83].mxu1  ;;  %v3685_v13 = vpop.f32.mrb[115].mxu0  ;;  %v2591_v37 = vmul.f32 %v3916_v49, %v3916_v49 }
 0x1fe   : > { %v3928_v14 = vadd.f32 %v5246_v62, %v2395_v56  ;;  %v3686_v57 = vadd.f32 %v3685_v13, %v3684_v44  ;;  %v5293_v21 = vadd.f32 %v5134_v26, %v3683_v55  ;;  %v2589_v33 = vmul.f32 %v3920_v36, %v3920_v36 }
 0x1ff   : > { %v3243_v22 = vpack.c.bf16 %v3924_v48, %v3916_v49  ;;  %v2592_v24 = vmul.f32 %v3924_v48, %v3924_v48 }
 0x200   : > { %v2551_v61 = vadd.f32 %v3928_v14, %v3920_v36  ;;  %v2590_v40 = vmul.f32 %v3928_v14, %v3928_v14  ;;  %v3238_v11 = vpack.c.bf16 %v3928_v14, %v3920_v36  ;;  %v5297_v20 = vadd.f32 %v5136_v46, %v3686_v57 }
 0x201   : > { %3330 = vst [vmem:[%s5289_s30 + $0x8] sm:$0xff] %v3243_v22  }
 0x202   : > { %v2552_v30 = vadd.f32 %v3916_v49, %v2551_v61  ;;  %v2621_v63 = vadd.f32 %v2590_v40, %v2589_v33  ;;  %3239 = vst [vmem:[%s5289_s30] sm:$0xff] %v3238_v11   ;;  %v3871_v17 = vpop.f32.mrb[84].mxu1  ;;  %v3687_v42 = vpop.f32.mrb[116].mxu0 }
 0x203   : > { %v3932_v62 = vadd.f32 %v5257_v53, %v3871_v17  ;;  %v2408_v41 = vpop.f32.mrb[85].mxu1  ;;  %v3688_v39 = vpop.f32.mrb[117].mxu0 }
 0x204   : > { %v2622_v26 = vadd.f32 %v2621_v63, %v2591_v37  ;;  %v3936_v25 = vadd.f32 %v5251_v4, %v2408_v41  ;;  %v2553_v38 = vadd.f32 %v3924_v48, %v2552_v30  ;;  %v3872_v51 = vpop.f32.mrb[86].mxu1  ;;  %v3689_v27 = vadd.f32 %v3688_v39, %v3687_v42  ;;  %v3690_v46 = vpop.f32.mrb[118].mxu0  ;;  %v5395_v39 = vld [vmem:[#allocation2_spill] sm:$0xff] }
 0x205   : > { %v3940_v28 = vadd.f32 %v5260_v32, %v3872_v51  ;;  %v2411_v1 = vpop.f32.mrb[87].mxu1  ;;  %v3691_v2 = vpop.f32.mrb[119].mxu0  ;;  %v2595_v44 = vmul.f32 %v3932_v62, %v3932_v62 }
 0x206   : > { %v2554_v3 = vadd.f32 %v3936_v25, %v2553_v38  ;;  %v2593_v35 = vmul.f32 %v3936_v25, %v3936_v25  ;;  %v2623_v16 = vadd.f32 %v2622_v26, %v2592_v24  ;;  %v3944_v53 = vadd.f32 %v5254_v9, %v2411_v1 }
 0x207   : > { %v3253_v49 = vpack.c.bf16 %v3940_v28, %v3932_v62  ;;  %v3692_v8 = vadd.f32 %v3691_v2, %v3690_v46  ;;  %v5305_v29 = vadd.f32 %v5140_v58, %v3689_v27  ;;  %v2596_v57 = vmul.f32 %v3940_v28, %v3940_v28  ;;  %v5396_v46 = vld [vmem:[#allocation3_spill] sm:$0xff] }
 0x208   : > { %v2624_v4 = vadd.f32 %v2623_v16, %v2593_v35  ;;  %v2555_v36 = vadd.f32 %v3944_v53, %v2554_v3  ;;  %v2594_v45 = vmul.f32 %v3944_v53, %v3944_v53  ;;  %v3248_v55 = vpack.c.bf16 %v3944_v53, %v3936_v25 }
 0x209   : > { %3332 = vst [vmem:[%s5289_s30 + $0x18] sm:$0xff] %v3253_v49   ;;  %v5309_v32 = vadd.f32 %v5144_v12, %v3692_v8 }
 0x20a   : > { %v2556_v48 = vadd.f32 %v3932_v62, %v2555_v36  ;;  %v2625_v56 = vadd.f32 %v2624_v4, %v2594_v45  ;;  %3331 = vst [vmem:[%s5289_s30 + $0x10] sm:$0xff] %v3248_v55   ;;  %v3875_v13 = vpop.f32.mrb[88].mxu1  ;;  %v3693_v14 = vpop.f32.mrb[120].mxu0 }
 0x20b   : > { %v3948_v9 = vadd.f32 %v5268_v59, %v3875_v13  ;;  %v2424_v22 = vpop.f32.mrb[89].mxu1  ;;  %v3694_v33 = vpop.f32.mrb[121].mxu0 }
 0x20c   : > { %v2626_v58 = vadd.f32 %v2625_v56, %v2595_v44  ;;  %v3952_v61 = vadd.f32 %v5263_v34, %v2424_v22  ;;  %v2557_v40 = vadd.f32 %v3940_v28, %v2556_v48  ;;  %v3876_v11 = vpop.f32.mrb[90].mxu1  ;;  %v3695_v37 = vadd.f32 %v3694_v33, %v3693_v14  ;;  %v3696_v12 = vpop.f32.mrb[122].mxu0 }
 0x20d   : > { %v3956_v30 = vadd.f32 %v5271_v7, %v3876_v11  ;;  %v2427_v63 = vpop.f32.mrb[91].mxu1  ;;  %v3697_v41 = vpop.f32.mrb[123].mxu0  ;;  %v2599_v28 = vmul.f32 %v3948_v9, %v3948_v9 }
 0x20e   : > { %v2558_v17 = vadd.f32 %v3952_v61, %v2557_v40  ;;  %v2597_v42 = vmul.f32 %v3952_v61, %v3952_v61  ;;  %v2627_v62 = vadd.f32 %v2626_v58, %v2596_v57  ;;  %v3960_v59 = vadd.f32 %v5265_v0, %v2427_v63 }
 0x20f   : > { %v3263_v24 = vpack.c.bf16 %v3956_v30, %v3948_v9  ;;  %v3698_v26 = vadd.f32 %v3697_v41, %v3696_v12  ;;  %v5317_v25 = vadd.f32 %v5395_v39, %v3695_v37  ;;  %v2600_v53 = vmul.f32 %v3956_v30, %v3956_v30 }
 0x210   : > { %v2628_v34 = vadd.f32 %v2627_v62, %v2597_v42  ;;  %v2559_v38 = vadd.f32 %v3960_v59, %v2558_v17  ;;  %v2598_v51 = vmul.f32 %v3960_v59, %v3960_v59  ;;  %v3258_v27 = vpack.c.bf16 %v3960_v59, %v3952_v61 }
 0x211   : > { %3334 = vst [vmem:[%s5289_s30 + $0x28] sm:$0xff] %v3263_v24   ;;  %v5321_v7 = vadd.f32 %v5396_v46, %v3698_v26 }
 0x212   : > { %v2560_v1 = vadd.f32 %v3948_v9, %v2559_v38  ;;  %v2629_v3 = vadd.f32 %v2628_v34, %v2598_v51  ;;  %3333 = vst [vmem:[%s5289_s30 + $0x20] sm:$0xff] %v3258_v27   ;;  %v3879_v35 = vpop.f32.mrb[92].mxu1  ;;  %v3699_v16 = vpop.f32.mrb[124].mxu0 }
 0x213   : > { %v3964_v0 = vadd.f32 %v5278_v50, %v3879_v35  ;;  %v2440_v2 = vpop.f32.mrb[93].mxu1  ;;  %v3700_v8 = vpop.f32.mrb[125].mxu0 }
 0x214   : > { %v2630_v49 = vadd.f32 %v2629_v3, %v2599_v28  ;;  %v3968_v4 = vadd.f32 %v5273_v6, %v2440_v2  ;;  %v2561_v36 = vadd.f32 %v3956_v30, %v2560_v1  ;;  %v3880_v45 = vpop.f32.mrb[94].mxu1  ;;  %v3701_v55 = vadd.f32 %v3700_v8, %v3699_v16  ;;  %v3702_v44 = vpop.f32.mrb[126].mxu0 }
 0x215   : > { %v3972_v48 = vadd.f32 %v5281_v15, %v3880_v45  ;;  %v2443_v56 = vpop.f32.mrb[95].mxu1  ;;  %v3703_v22 = vpop.f32.mrb[127].mxu0  ;;  %v2603_v15 = vmul.f32 %v3964_v0, %v3964_v0 }
 0x216   : > { %v2562_v13 = vadd.f32 %v3968_v4, %v2561_v36  ;;  %v2601_v14 = vmul.f32 %v3968_v4, %v3968_v4  ;;  %v2631_v9 = vadd.f32 %v2630_v49, %v2600_v53  ;;  %v3976_v50 = vadd.f32 %v5275_v18, %v2443_v56 }
 0x217   : > { %v3273_v57 = vpack.c.bf16 %v3972_v48, %v3964_v0  ;;  %v3704_v58 = vadd.f32 %v3703_v22, %v3702_v44  ;;  %v3990_v33 = vadd.f32 %v5156_v10, %v3701_v55  ;;  %v2604_v62 = vmul.f32 %v3972_v48, %v3972_v48 }
 0x218   : > { %v2632_v6 = vadd.f32 %v2631_v9, %v2601_v14  ;;  %v2563_v61 = vadd.f32 %v3976_v50, %v2562_v13  ;;  %v2602_v40 = vmul.f32 %v3976_v50, %v3976_v50  ;;  %v3268_v11 = vpack.c.bf16 %v3976_v50, %v3968_v4 }
 0x219   : > { %3336 = vst [vmem:[%s5289_s30 + $0x38] sm:$0xff] %v3273_v57   ;;  %v3996_v37 = vadd.f32 %v5160_v19, %v3704_v58 }
 0x21a   : > { %v2564_v12 = vadd.f32 %v3964_v0, %v2563_v61  ;;  %v2633_v30 = vadd.f32 %v2632_v6, %v2602_v40  ;;  %3335 = vst [vmem:[%s5289_s30 + $0x30] sm:$0xff] %v3268_v11   ;;  %v3883_v63 = vpop.f32.mrb[0].mxu1  ;;  %v3705_v17 = vpop.f32.mrb[128].mxu0 }
 0x21b   : > { %v3979_v42 = vadd.f32 %v5305_v29, %v3883_v63  ;;  %v2456_v18 = vpop.f32.mrb[1].mxu1  ;;  %v3706_v59 = vpop.f32.mrb[129].mxu0 }
 0x21c   : > { %v2634_v41 = vadd.f32 %v2633_v30, %v2603_v15  ;;  %v3982_v10 = vadd.f32 %v5293_v21, %v2456_v18  ;;  %v2565_v24 = vadd.f32 %v3972_v48, %v2564_v12  ;;  %v3884_v26 = vpop.f32.mrb[2].mxu1  ;;  %v3707_v39 = vadd.f32 %v3706_v59, %v3705_v17  ;;  %v3708_v34 = vpop.f32.mrb[130].mxu0 }
 0x21d   : > { %v3985_v19 = vadd.f32 %v5309_v32, %v3884_v26  ;;  %v2459_v38 = vpop.f32.mrb[3].mxu1  ;;  %v3709_v28 = vpop.f32.mrb[131].mxu0  ;;  %v2607_v32 = vmul.f32 %v3979_v42, %v3979_v42 }
 0x21e   : > { %v2566_v51 = vadd.f32 %v3982_v10, %v2565_v24  ;;  %v2605_v27 = vmul.f32 %v3982_v10, %v3982_v10  ;;  %v2635_v46 = vadd.f32 %v2634_v41, %v2604_v62  ;;  %v3988_v29 = vadd.f32 %v5297_v20, %v2459_v38 }
 0x21f   : > { %v3283_v1 = vpack.c.bf16 %v3985_v19, %v3979_v42  ;;  %v3710_v3 = vadd.f32 %v3709_v28, %v3708_v34  ;;  %v4005_v35 = vadd.f32 %v5167_v60, %v3707_v39  ;;  %v2608_v20 = vmul.f32 %v3985_v19, %v3985_v19 }
 0x220   : > { %v2636_v21 = vadd.f32 %v2635_v46, %v2605_v27  ;;  %v2567_v16 = vadd.f32 %v3988_v29, %v2566_v51  ;;  %v2606_v0 = vmul.f32 %v3988_v29, %v3988_v29  ;;  %v3278_v2 = vpack.c.bf16 %v3988_v29, %v3982_v10 }
 0x221   : > { %3338 = vst [vmem:[%s5289_s30 + $0x48] sm:$0xff] %v3283_v1   ;;  %v4011_v53 = vadd.f32 %v5177_v47, %v3710_v3 }
 0x222   : > { %v2568_v49 = vadd.f32 %v3979_v42, %v2567_v16  ;;  %v2637_v8 = vadd.f32 %v2636_v21, %v2606_v0  ;;  %3337 = vst [vmem:[%s5289_s30 + $0x40] sm:$0xff] %v3278_v2   ;;  %v3887_v4 = vpop.f32.mrb[4].mxu1  ;;  %v3711_v36 = vpop.f32.mrb[132].mxu0 }
 0x223   : > { %v3991_v45 = vadd.f32 %v3990_v33, %v3887_v4  ;;  %v2472_v55 = vpop.f32.mrb[5].mxu1  ;;  %v3712_v48 = vpop.f32.mrb[133].mxu0 }
 0x224   : > { %v2638_v44 = vadd.f32 %v2637_v8, %v2607_v32  ;;  %v3994_v60 = vadd.f32 %v5317_v25, %v2472_v55  ;;  %v2569_v56 = vadd.f32 %v3985_v19, %v2568_v49  ;;  %v3888_v13 = vpop.f32.mrb[6].mxu1  ;;  %v3713_v14 = vadd.f32 %v3712_v48, %v3711_v36  ;;  %v3714_v9 = vpop.f32.mrb[134].mxu0 }
 0x225   : > { %v3997_v22 = vadd.f32 %v3996_v37, %v3888_v13  ;;  %v2475_v47 = vpop.f32.mrb[7].mxu1  ;;  %v3715_v6 = vpop.f32.mrb[135].mxu0  ;;  %v2611_v37 = vmul.f32 %v3991_v45, %v3991_v45 }
 0x226   : > { %v2570_v50 = vadd.f32 %v3994_v60, %v2569_v56  ;;  %v2609_v57 = vmul.f32 %v3994_v60, %v3994_v60  ;;  %v2639_v58 = vadd.f32 %v2638_v44, %v2608_v20  ;;  %v4000_v33 = vadd.f32 %v5321_v7, %v2475_v47 }
 0x227   : > { %v3293_v61 = vpack.c.bf16 %v3997_v22, %v3991_v45  ;;  %v3716_v40 = vadd.f32 %v3715_v6, %v3714_v9  ;;  %v4002_v11 = vadd.f32 %v5188_v43, %v3713_v14  ;;  %v2612_v7 = vmul.f32 %v3997_v22, %v3997_v22 }
 0x228   : > { %v2640_v15 = vadd.f32 %v2639_v58, %v2609_v57  ;;  %v2571_v25 = vadd.f32 %v4000_v33, %v2570_v50  ;;  %v2610_v12 = vmul.f32 %v4000_v33, %v4000_v33  ;;  %v3288_v30 = vpack.c.bf16 %v4000_v33, %v3994_v60 }
 0x229   : > { %3340 = vst [vmem:[%s5289_s30 + $0x58] sm:$0xff] %v3293_v61   ;;  %v4008_v63 = vadd.f32 %v5199_v5, %v3716_v40 }
 0x22a   : > { %v2572_v17 = vadd.f32 %v3991_v45, %v2571_v25  ;;  %v2641_v42 = vadd.f32 %v2640_v15, %v2610_v12  ;;  %3339 = vst [vmem:[%s5289_s30 + $0x50] sm:$0xff] %v3288_v30   ;;  %v3891_v18 = vpop.f32.mrb[8].mxu1  ;;  %v3717_v62 = vpop.f32.mrb[136].mxu0 }
 0x22b   : > { %v4003_v41 = vadd.f32 %v4002_v11, %v3891_v18  ;;  %v2488_v59 = vpop.f32.mrb[9].mxu1  ;;  %v3718_v24 = vpop.f32.mrb[137].mxu0 }
 0x22c   : > { %v2642_v10 = vadd.f32 %v2641_v42, %v2611_v37  ;;  %v4006_v26 = vadd.f32 %v4005_v35, %v2488_v59  ;;  %v2573_v43 = vadd.f32 %v3997_v22, %v2572_v17  ;;  %v3892_v39 = vpop.f32.mrb[10].mxu1  ;;  %v3719_v34 = vadd.f32 %v3718_v24, %v3717_v62  ;;  %v3720_v19 = vpop.f32.mrb[138].mxu0 }
 0x22d   : > { %v4009_v38 = vadd.f32 %v4008_v63, %v3892_v39  ;;  %v2491_v51 = vpop.f32.mrb[11].mxu1  ;;  %v3721_v28 = vpop.f32.mrb[139].mxu0  ;;  %v2615_v49 = vmul.f32 %v4003_v41, %v4003_v41 }
 0x22e   : > { %v2574_v5 = vadd.f32 %v4006_v26, %v2573_v43  ;;  %v2613_v27 = vmul.f32 %v4006_v26, %v4006_v26  ;;  %v2643_v46 = vadd.f32 %v2642_v10, %v2612_v7  ;;  %v4012_v29 = vadd.f32 %v4011_v53, %v2491_v51 }
 0x22f   : > { %v3303_v1 = vpack.c.bf16 %v4009_v38, %v4003_v41  ;;  %v3722_v3 = vadd.f32 %v3721_v28, %v3720_v19  ;;  %v4017_v21 = vadd.f32 %v5210_v54, %v3719_v34  ;;  %v2616_v20 = vmul.f32 %v4009_v38, %v4009_v38 }
 0x230   : > { %v2644_v16 = vadd.f32 %v2643_v46, %v2613_v27  ;;  %v2575_v0 = vadd.f32 %v4012_v29, %v2574_v5  ;;  %v2614_v35 = vmul.f32 %v4012_v29, %v4012_v29  ;;  %v3298_v2 = vpack.c.bf16 %v4012_v29, %v4006_v26 }
 0x231   : > { %3342 = vst [vmem:[%s5289_s30 + $0x68] sm:$0xff] %v3303_v1   ;;  %v4023_v32 = vadd.f32 %v5221_v31, %v3722_v3 }
 0x232   : > { %v2576_v8 = vadd.f32 %v4003_v41, %v2575_v0  ;;  %v2645_v4 = vadd.f32 %v2644_v16, %v2614_v35  ;;  %3341 = vst [vmem:[%s5289_s30 + $0x60] sm:$0xff] %v3298_v2   ;;  %v3895_v36 = vpop.f32.mrb[12].mxu1  ;;  %v3723_v45 = vpop.f32.mrb[140].mxu0 }
 0x233   : > { %v2504_v55 = vpop.f32.mrb[13].mxu1  ;;  %v3724_v44 = vpop.f32.mrb[141].mxu0 }
 0x234   : > { %v2646_v53 = vadd.f32 %v2645_v4, %v2615_v49  ;;  %v4018_v48 = vadd.f32 %v4017_v21, %v2504_v55  ;;  %v2577_v60 = vadd.f32 %v4009_v38, %v2576_v8  ;;  %v3896_v54 = vpop.f32.mrb[14].mxu1  ;;  %v3725_v56 = vadd.f32 %v3724_v44, %v3723_v45  ;;  %v3726_v13 = vpop.f32.mrb[142].mxu0 }
 0x235   : > { %v2507_v14 = vpop.f32.mrb[15].mxu1  ;;  %v3727_v47 = vpop.f32.mrb[143].mxu0 }
 0x236   : > { %v2578_v9 = vadd.f32 %v4018_v48, %v2577_v60  ;;  %v2617_v22 = vmul.f32 %v4018_v48, %v4018_v48  ;;  %v2647_v31 = vadd.f32 %v2646_v53, %v2616_v20  ;;  %v4024_v50 = vadd.f32 %v4023_v32, %v2507_v14 }
 0x237   : > { %v4014_v57 = vadd.f32 %v5230_v52, %v3725_v56  ;;  %v3728_v58 = vadd.f32 %v3727_v47, %v3726_v13 }
 0x238   : > { %v2648_v6 = vadd.f32 %v2647_v31, %v2617_v22  ;;  %v2579_v33 = vadd.f32 %v4024_v50, %v2578_v9  ;;  %v2618_v61 = vmul.f32 %v4024_v50, %v4024_v50  ;;  %v3308_v40 = vpack.c.bf16 %v4024_v50, %v4018_v48 }
 0x239   : > { %v4015_v11 = vadd.f32 %v4014_v57, %v3895_v36  ;;  %v4020_v15 = vadd.f32 %v5239_v23, %v3728_v58 }
 0x23a   : > { %v2649_v25 = vadd.f32 %v2648_v6, %v2618_v61  ;;  %3343 = vst [vmem:[%s5289_s30 + $0x70] sm:$0xff] %v3308_v40  }
 0x23b   : > { %v2619_v12 = vmul.f32 %v4015_v11, %v4015_v11  ;;  %v4021_v30 = vadd.f32 %v4020_v15, %v3896_v54  ;;  %v2580_v63 = vadd.f32 %v4015_v11, %v2579_v33 }
 0x23d   : > { %v2620_v37 = vmul.f32 %v4021_v30, %v4021_v30  ;;  %v3313_v17 = vpack.c.bf16 %v4021_v30, %v4015_v11  ;;  %v2581_v42 = vadd.f32 %v4021_v30, %v2580_v63  ;;  %v2650_v52 = vadd.f32 %v2649_v25, %v2619_v12 }
 0x23f   : > { %3344 = vst [vmem:[%s5289_s30 + $0x78] sm:$0xff] %v3313_v17   ;;  %v2582_v18 = vrot.slane %v2581_v42, 4  ;;  %v2651_v62 = vadd.f32 %v2650_v52, %v2620_v37 }
 0x241   : > { %v2583_v41 = vadd.f32 %v2582_v18, %v2581_v42  ;;  %v2652_v59 = vrot.slane %v2651_v62, 4 }
 0x243   : > { %v2584_v7 = vrot.slane %v2583_v41, 2  ;;  %v2653_v10 = vadd.f32 %v2652_v59, %v2651_v62 }
 0x245   : > { %v2585_v24 = vadd.f32 %v2584_v7, %v2583_v41  ;;  %v2654_v23 = vrot.slane %v2653_v10, 2 }
 0x247   : > { %v2586_v26 = vrot.slane %v2585_v24, 1  ;;  %v2655_v43 = vadd.f32 %v2654_v23, %v2653_v10 }
 0x249   : > { %v2587_v39 = vadd.f32 %v2586_v26, %v2585_v24  ;;  %v2656_v34 = vrot.slane %v2655_v43, 1 }
 0x24b   : > { %2588 = vst [vmem:[%s265_s7] sm:$0x1] %v2587_v39  ;;  %v2657_v19 = vadd.f32 %v2656_v34, %v2655_v43 }
 0x24d   : > { %2658 = vst [vmem:[%s268_s10] sm:$0x1] %v2657_v19 }
 0x24e PF: > { %s17_s21 = sadd.s32 1, %s4160_s21  }
 0x24f   : > { %p14_p4 = scmp.ge.s32.totalorder %s17_s21, 4  }
 0x251   :  { %16 = sbr.rel (!%p14_p4) target bundleno = 1 (0x1), region = 92 }

</bundles_post_ra>
